<compile_context>
chip_gen: v7x
topology: tpu7x:2x2x1
jax: 0.10.0
libtpu: 0.0.40
codegen_flags: <defaults>
</compile_context>

<pallas_src>
import functools

import jax
import jax.numpy as jnp
from jax import lax
from jax.experimental import pallas as pl
from jax.experimental.pallas import tpu as pltpu

MXU_DTYPE = jnp.bfloat16          # MXU operand dtype; accumulation is always f32.
LANE = 128                        # lane width: gate / class / feature padding target.
SUBLANE = 8                       # f32 sublane tile.
VMEM_LIMIT_BYTES = 32 * 1024 * 1024
_NEG_BIG = float(jnp.finfo(jnp.float32).min)   # finite "-inf" for the running max.


# ----------------------------------------------------------------------------
# Small helpers (trace-time Python ints only).
# ----------------------------------------------------------------------------
def _round_up(n, m):
    return ((n + m - 1) // m) * m


def _largest_divisor_at_most(n, cap):
    d = max(1, min(n, cap))
    while n % d:
        d -= 1
    return d


def _tiles(T, B_pad):
    """(T-chunk, batch tile).  Both divide their padded extents exactly.
    TODO(synk): for awkward T (large primes) mask tail steps instead of
    degrading to tiny chunks; sizes re-derivable for v7x's 64 MiB VMEM."""
    Tc = _largest_divisor_at_most(T, 16)
    Bt = _largest_divisor_at_most(B_pad // SUBLANE, 16) * SUBLANE   # <=128, divides B_pad
    return Tc, Bt


# ----------------------------------------------------------------------------
# Shared gate math (f32 elementwise; VPU/EUP).  H_pad is lane-aligned so every
# gate slice is a full 128-lane tile.
# ----------------------------------------------------------------------------
def _lstm_gates(z, c, Hp):
    i_g = jax.nn.sigmoid(z[:, 0 * Hp:1 * Hp])
    f_g = jax.nn.sigmoid(z[:, 1 * Hp:2 * Hp])
    g_g = jnp.tanh(z[:, 2 * Hp:3 * Hp])
    o_g = jax.nn.sigmoid(z[:, 3 * Hp:4 * Hp])
    c_new = f_g * c + i_g * g_g
    h_new = o_g * jnp.tanh(c_new)
    return h_new, c_new


def _chunk_input_projection(x_ref, wih_ref, b_ref, zx_scr):
    """Fused input projection for one T-chunk: ONE (Tc*Bt, In) @ (In, 4H) MXU
    matmul into VMEM scratch; zx never round-trips through HBM."""
    Tc, Bt, In = x_ref.shape
    # f32 collapse of (Tc, Bt=8k, In) leading dims is layout-trivial; cast to the
    # MXU dtype only afterwards.
    x2d = x_ref[...].reshape(Tc * Bt, In).astype(wih_ref.dtype)
    zx_scr[...] = (jnp.dot(x2d, wih_ref[...], preferred_element_type=jnp.float32)
                   + b_ref[...])


# ----------------------------------------------------------------------------
# Kernel 1: one LSTM layer (non-last).  Grid = (batch tiles, T chunks); x chunk
# streams in, hidden-sequence chunk streams out; h/c live in VMEM scratch.
# ----------------------------------------------------------------------------
def _lstm_layer_kernel(x_ref, wih_ref, whh_ref, b_ref, hseq_ref,
                       zx_scr, h_scr, c_scr):
    Tc, Bt, _ = x_ref.shape
    Hp = h_scr.shape[-1]

    @pl.when(pl.program_id(1) == 0)          # new batch tile: reset state
    def _():
        h_scr[...] = jnp.zeros_like(h_scr)
        c_scr[...] = jnp.zeros_like(c_scr)

    _chunk_input_projection(x_ref, wih_ref, b_ref, zx_scr)

    def step(t, carry):
        h = h_scr[...]
        c = c_scr[...]
        row = pl.multiple_of(t * Bt, Bt)
        # W_hh streamed from VMEM each step (not hoisted: a hoisted (H,4H)
        # operand spills the vreg file at real H).
        z = zx_scr[pl.ds(row, Bt), :] + jnp.dot(
            h.astype(whh_ref.dtype), whh_ref[...],
            preferred_element_type=jnp.float32)
        h_new, c_new = _lstm_gates(z, c, Hp)
        h_scr[...] = h_new
        c_scr[...] = c_new
        hseq_ref[t] = h_new
        return carry

    # Unrolled: cross-iteration visibility lets the hseq store / c-path math
    # overlap the next step's MXU push.
    lax.fori_loop(0, Tc, step, 0, unroll=True)


def lstm_layer_seq(x, w_ih_t, w_hh_t, b):
    """x: (T, B_pad, In_pad) f32 time-major.  Returns (T, B_pad, H_pad) f32."""
    T, B_pad, In_pad = x.shape
    Hp = w_hh_t.shape[0]
    Tc, Bt = _tiles(T, B_pad)
    grid = (B_pad // Bt, T // Tc)
    return pl.pallas_call(
        _lstm_layer_kernel,
        out_shape=jax.ShapeDtypeStruct((T, B_pad, Hp), jnp.float32),
        grid_spec=pltpu.PrefetchScalarGridSpec(
            num_scalar_prefetch=0,
            grid=grid,
            in_specs=[
                pl.BlockSpec((Tc, Bt, In_pad), lambda bi, ti: (ti, bi, 0)),
                pl.BlockSpec(w_ih_t.shape, lambda bi, ti: (0, 0)),
                pl.BlockSpec(w_hh_t.shape, lambda bi, ti: (0, 0)),
                pl.BlockSpec(b.shape, lambda bi, ti: (0, 0)),
            ],
            out_specs=pl.BlockSpec((Tc, Bt, Hp), lambda bi, ti: (ti, bi, 0)),
            scratch_shapes=[
                pltpu.VMEM((Tc * Bt, 4 * Hp), jnp.float32),   # zx chunk (never in HBM)
                pltpu.VMEM((Bt, Hp), jnp.float32),            # h
                pltpu.VMEM((Bt, Hp), jnp.float32),            # c
            ]),
        compiler_params=pltpu.CompilerParams(
            dimension_semantics=("parallel", "arbitrary"),
            vmem_limit_bytes=VMEM_LIMIT_BYTES),
    )(x, w_ih_t, w_hh_t, b)


# ----------------------------------------------------------------------------
# Kernel 2: last LSTM layer with the global max-pool fused as a running max,
# plus the fc + softmax head.  Never materializes (T, B, H) in HBM.
# ----------------------------------------------------------------------------
def _lstm_last_layer_head_kernel(x_ref, wih_ref, whh_ref, b_ref,
                                 wfc_ref, bfc_ref, out_ref,
                                 zx_scr, h_scr, c_scr, hmax_scr):
    Tc, Bt, _ = x_ref.shape
    Hp = h_scr.shape[-1]

    @pl.when(pl.program_id(1) == 0)
    def _():
        h_scr[...] = jnp.zeros_like(h_scr)
        c_scr[...] = jnp.zeros_like(c_scr)
        hmax_scr[...] = jnp.full_like(hmax_scr, _NEG_BIG)

    _chunk_input_projection(x_ref, wih_ref, b_ref, zx_scr)

    def step(t, carry):
        h = h_scr[...]
        c = c_scr[...]
        row = pl.multiple_of(t * Bt, Bt)
        z = zx_scr[pl.ds(row, Bt), :] + jnp.dot(
            h.astype(whh_ref.dtype), whh_ref[...],
            preferred_element_type=jnp.float32)
        h_new, c_new = _lstm_gates(z, c, Hp)
        h_scr[...] = h_new
        c_scr[...] = c_new
        hmax_scr[...] = jnp.maximum(hmax_scr[...], h_new)   # fused global max pool
        return carry

    lax.fori_loop(0, Tc, step, 0, unroll=True)

    # fc + softmax on the pooled features, written once at the final T chunk.
    # (Padded logit columns carry a -1e30 bias -> exp underflows to exactly 0.)
    @pl.when(pl.program_id(1) == pl.num_programs(1) - 1)
    def _():
        m = hmax_scr[...]
        logits = (jnp.dot(m.astype(wfc_ref.dtype), wfc_ref[...],
                          preferred_element_type=jnp.float32) + bfc_ref[...])
        zl = logits - jnp.max(logits, axis=1, keepdims=True)
        e = jnp.exp(zl)
        denom = jnp.sum(e, axis=1, keepdims=True)
        r = pl.reciprocal(denom, approx=True)     # EUP slot (off the VPU path)
        r = r * (2.0 - denom * r)                 # one Newton step -> f32-accurate
        out_ref[...] = e * r


def lstm_last_layer_head(x, w_ih_t, w_hh_t, b, fc_w_t, fc_b):
    """x: (T, B_pad, In_pad) f32.  Returns softmax probabilities (B_pad, C_pad)."""
    T, B_pad, In_pad = x.shape
    Hp = w_hh_t.shape[0]
    Cp = fc_w_t.shape[1]
    Tc, Bt = _tiles(T, B_pad)
    grid = (B_pad // Bt, T // Tc)
    return pl.pallas_call(
        _lstm_last_layer_head_kernel,
        out_shape=jax.ShapeDtypeStruct((B_pad, Cp), jnp.float32),
        grid_spec=pltpu.PrefetchScalarGridSpec(
            num_scalar_prefetch=0,
            grid=grid,
            in_specs=[
                pl.BlockSpec((Tc, Bt, In_pad), lambda bi, ti: (ti, bi, 0)),
                pl.BlockSpec(w_ih_t.shape, lambda bi, ti: (0, 0)),
                pl.BlockSpec(w_hh_t.shape, lambda bi, ti: (0, 0)),
                pl.BlockSpec(b.shape, lambda bi, ti: (0, 0)),
                pl.BlockSpec(fc_w_t.shape, lambda bi, ti: (0, 0)),
                pl.BlockSpec(fc_b.shape, lambda bi, ti: (0, 0)),
            ],
            # Same output block across the T axis -> resident; written at last chunk.
            out_specs=pl.BlockSpec((Bt, Cp), lambda bi, ti: (bi, 0)),
            scratch_shapes=[
                pltpu.VMEM((Tc * Bt, 4 * Hp), jnp.float32),   # zx chunk
                pltpu.VMEM((Bt, Hp), jnp.float32),            # h
                pltpu.VMEM((Bt, Hp), jnp.float32),            # c
                pltpu.VMEM((Bt, Hp), jnp.float32),            # running max over time
            ]),
        compiler_params=pltpu.CompilerParams(
            dimension_semantics=("parallel", "arbitrary"),
            vmem_limit_bytes=VMEM_LIMIT_BYTES),
    )(x, w_ih_t, w_hh_t, b, fc_w_t, fc_b)


# ----------------------------------------------------------------------------
# Full model forward.
# ----------------------------------------------------------------------------
@functools.partial(jax.jit, static_argnames=("num_classes",))
def lstm_model_forward(token_ids, params, *, num_classes):
    # token_ids: (B, T) int32
    B, T = token_ids.shape
    B_pad = _round_up(B, SUBLANE)
    ids = jnp.zeros((B_pad, T), jnp.int32).at[:B, :].set(token_ids)

    # TODO(synk): the embedding row gather stays in XLA (a dynamic-row gather has
    # no clean single-kernel Pallas TPU equivalent at these shapes).  Gathering
    # from the transposed (tiny int32) id matrix gives time-major activations
    # directly — no (B, T, E) activation transpose.
    x = jnp.take(params["embedding_pad"], ids.T, axis=0)     # (T, B_pad, E_pad) f32

    layers = params["lstm_layers"]
    for layer in layers[:-1]:
        x = lstm_layer_seq(x, layer["w_ih_t"], layer["w_hh_t"], layer["b"])
    last = layers[-1]
    out_pad = lstm_last_layer_head(x, last["w_ih_t"], last["w_hh_t"], last["b"],
                                   params["fc_w_t"], params["fc_b"])
    return out_pad[:B, :num_classes]                          # (B, C)


# ----------------------------------------------------------------------------
# Parameter init (PyTorch-default distributions) with lane-dense, gate-major
# padded layouts precomputed once (no per-forward transposes / pads).
# ----------------------------------------------------------------------------
def _pad_gate_major(w_t, in_dim, in_pad, H, H_pad, dtype):
    """w_t: (in_dim, 4H) with gate blocks [i|f|g|o] -> (in_pad, 4*H_pad), each
    gate on its own 128-lane-aligned column block; padding is zero."""
    out = jnp.zeros((in_pad, 4 * H_pad), dtype=dtype)
    for g in range(4):
        out = out.at[:in_dim, g * H_pad:g * H_pad + H].set(
            w_t[:, g * H:(g + 1) * H].astype(dtype))
    return out


def _pad_gate_major_bias(bvec, H, H_pad):
    out = jnp.zeros((1, 4 * H_pad), jnp.float32)
    for g in range(4):
        out = out.at[0, g * H_pad:g * H_pad + H].set(bvec[g * H:(g + 1) * H])
    return out


def init_params(key, num_embeddings, embedding_size, hidden, num_layers,
                num_classes):
    E_pad = _round_up(embedding_size, LANE)
    H_pad = _round_up(hidden, LANE)      # on v6e/v7x rounding K to 256 fills the MXU better
    C_pad = _round_up(num_classes, LANE)

    keys = jax.random.split(key, 3 + 4 * num_layers)
    ki = iter(keys)
    params = {}

    # nn.Embedding default init: N(0, 1); padded feature columns are zero.
    emb = jax.random.normal(next(ki), (num_embeddings, embedding_size),
                            dtype=jnp.float32)
    params["embedding_pad"] = (jnp.zeros((num_embeddings, E_pad), jnp.float32)
                               .at[:, :embedding_size].set(emb))

    # nn.LSTM default init: U(-1/sqrt(H), 1/sqrt(H)); padded gate columns get
    # zero weight + zero bias, so padded h/c columns stay exactly 0.
    k = 1.0 / jnp.sqrt(jnp.float32(hidden))
    layers = []
    for l in range(num_layers):
        in_sz = embedding_size if l == 0 else hidden
        in_pad = E_pad if l == 0 else H_pad
        w_ih = jax.random.uniform(next(ki), (4 * hidden, in_sz),
                                  minval=-k, maxval=k, dtype=jnp.float32)
        w_hh = jax.random.uniform(next(ki), (4 * hidden, hidden),
                                  minval=-k, maxval=k, dtype=jnp.float32)
        b_ih = jax.random.uniform(next(ki), (4 * hidden,),
                                  minval=-k, maxval=k, dtype=jnp.float32)
        b_hh = jax.random.uniform(next(ki), (4 * hidden,),
                                  minval=-k, maxval=k, dtype=jnp.float32)
        layers.append({
            "w_ih_t": _pad_gate_major(jnp.transpose(w_ih), in_sz, in_pad,
                                      hidden, H_pad, MXU_DTYPE),   # (in_pad, 4H_pad)
            "w_hh_t": _pad_gate_major(jnp.transpose(w_hh), hidden, H_pad,
                                      hidden, H_pad, MXU_DTYPE),   # (H_pad, 4H_pad)
            "b": _pad_gate_major_bias(b_ih + b_hh, hidden, H_pad),  # (1, 4H_pad) f32
        })
    params["lstm_layers"] = layers

    # nn.Linear default init: U(-1/sqrt(H), 1/sqrt(H)).  Padded output columns
    # get a -1e30 bias so their softmax probability underflows to exactly 0.
    fc_w = jax.random.uniform(next(ki), (num_classes, hidden),
                              minval=-k, maxval=k, dtype=jnp.float32)
    fc_b = jax.random.uniform(next(ki), (num_classes,),
                              minval=-k, maxval=k, dtype=jnp.float32)
    params["fc_w_t"] = (jnp.zeros((H_pad, C_pad), MXU_DTYPE)
                        .at[:hidden, :num_classes]
                        .set(jnp.transpose(fc_w).astype(MXU_DTYPE)))
    params["fc_b"] = (jnp.full((1, C_pad), -1e30, jnp.float32)
                      .at[0, :num_classes].set(fc_b))
    return params


if __name__ == "__main__":
    NUM_EMBEDDINGS = 32
    EMBEDDING_SIZE = 16
    HIDDEN = 32
    NUM_LAYERS = 2
    NUM_CLASSES = 4
    BATCH = 2
    SEQ = 8

    key = jax.random.PRNGKey(0)
    k_param, k_data = jax.random.split(key)
    params = init_params(k_param, NUM_EMBEDDINGS, EMBEDDING_SIZE, HIDDEN,
                         NUM_LAYERS, NUM_CLASSES)
    token_ids = jax.random.randint(k_data, (BATCH, SEQ), 0, NUM_EMBEDDINGS,
                                   dtype=jnp.int32)

    out = lstm_model_forward(token_ids, params, num_classes=NUM_CLASSES)
    out = jax.block_until_ready(out)

    assert out.shape == (BATCH, NUM_CLASSES), out.shape
    row_sums = jnp.sum(out, axis=1)
    assert bool(jnp.all(jnp.abs(row_sums - 1.0) < 1e-3)), row_sums
    assert bool(jnp.all(jnp.isfinite(out))), out
    print("KERNEL_OK")
</pallas_src>

<mosaic_0001>
module attributes {stable_mosaic.version = 11 : i64} {
  func.func @_lstm_last_layer_head_kernel(%arg0: i32, %arg1: i32, %arg2: memref<8x8x128xf32, #tpu.memory_space<vmem>>, %arg3: memref<128x512xbf16, #tpu.memory_space<vmem>>, %arg4: memref<128x512xbf16, #tpu.memory_space<vmem>>, %arg5: memref<1x512xf32, #tpu.memory_space<vmem>>, %arg6: memref<128x128xbf16, #tpu.memory_space<vmem>>, %arg7: memref<1x128xf32, #tpu.memory_space<vmem>>, %arg8: memref<8x128xf32, #tpu.memory_space<vmem>>, %arg9: memref<64x512xf32, #tpu.memory_space<vmem>>, %arg10: memref<8x128xf32, #tpu.memory_space<vmem>>, %arg11: memref<8x128xf32, #tpu.memory_space<vmem>>, %arg12: memref<8x128xf32, #tpu.memory_space<vmem>>) attributes {dimension_semantics = [#tpu.dimension_semantics<parallel>, #tpu.dimension_semantics<arbitrary>], iteration_bounds = array<i64: 1, 1>, scalar_prefetch = 0 : i64, scratch_operands = 4 : i64, tpu.core_type = #tpu.core_type<tc>, window_params = [{transform_indices = @transform_0, window_bounds = array<i64: 8, 8, 128>}, {pipeline_mode = #tpu.pipeline_mode<synchronous>, transform_indices = @transform_1, window_bounds = array<i64: 128, 512>}, {pipeline_mode = #tpu.pipeline_mode<synchronous>, transform_indices = @transform_2, window_bounds = array<i64: 128, 512>}, {pipeline_mode = #tpu.pipeline_mode<synchronous>, transform_indices = @transform_3, window_bounds = array<i64: 1, 512>}, {pipeline_mode = #tpu.pipeline_mode<synchronous>, transform_indices = @transform_4, window_bounds = array<i64: 128, 128>}, {pipeline_mode = #tpu.pipeline_mode<synchronous>, transform_indices = @transform_5, window_bounds = array<i64: 1, 128>}, {transform_indices = @transform_6, window_bounds = array<i64: 8, 128>}]} {
    %c0_i32 = arith.constant 0 : i32
    %0 = arith.cmpi eq, %arg1, %c0_i32 : i32
    %1 = arith.extui %0 : i1 to i32
    %c0_i32_0 = arith.constant 0 : i32
    %2 = arith.cmpi ne, %1, %c0_i32_0 : i32
    scf.if %2 {
      %cst_172 = arith.constant 0.000000e+00 : f32
      %335 = vector.broadcast %cst_172 : f32 to vector<8x128xf32>
      %c0_173 = arith.constant 0 : index
      %c0_174 = arith.constant 0 : index
      %336 = vector.load %arg10[%c0_173, %c0_174] : memref<8x128xf32, #tpu.memory_space<vmem>>, vector<8x128xf32>
      tpu.vector_store %arg10[%c0_173, %c0_174], %335 {strides = array<i32>} : memref<8x128xf32, #tpu.memory_space<vmem>>, vector<8x128xf32>,
      %cst_175 = arith.constant 0.000000e+00 : f32
      %337 = vector.broadcast %cst_175 : f32 to vector<8x128xf32>
      %c0_176 = arith.constant 0 : index
      %c0_177 = arith.constant 0 : index
      %338 = vector.load %arg11[%c0_176, %c0_177] : memref<8x128xf32, #tpu.memory_space<vmem>>, vector<8x128xf32>
      tpu.vector_store %arg11[%c0_176, %c0_177], %337 {strides = array<i32>} : memref<8x128xf32, #tpu.memory_space<vmem>>, vector<8x128xf32>,
      %cst_178 = arith.constant -3.40282347E+38 : f32
      %339 = vector.broadcast %cst_178 : f32 to vector<8x128xf32>
      %c0_179 = arith.constant 0 : index
      %c0_180 = arith.constant 0 : index
      %340 = vector.load %arg12[%c0_179, %c0_180] : memref<8x128xf32, #tpu.memory_space<vmem>>, vector<8x128xf32>
      tpu.vector_store %arg12[%c0_179, %c0_180], %339 {strides = array<i32>} : memref<8x128xf32, #tpu.memory_space<vmem>>, vector<8x128xf32>,
    } else {
    }
    %c0 = arith.constant 0 : index
    %c0_1 = arith.constant 0 : index
    %c0_2 = arith.constant 0 : index
    %3 = vector.load %arg2[%c0, %c0_1, %c0_2] : memref<8x8x128xf32, #tpu.memory_space<vmem>>, vector<8x8x128xf32>
    %4 = vector.shape_cast %3 : vector<8x8x128xf32> to vector<64x128xf32>
    %5 = arith.truncf %4 : vector<64x128xf32> to vector<64x128xbf16>
    %c0_3 = arith.constant 0 : index
    %c0_4 = arith.constant 0 : index
    %6 = vector.load %arg3[%c0_3, %c0_4] : memref<128x512xbf16, #tpu.memory_space<vmem>>, vector<128x512xbf16>
    %cst = arith.constant dense<0.000000e+00> : vector<64x512xf32>
    %7 = tpu.matmul %5, %6, %cst {dimension_numbers = #tpu.dot_dimension_numbers<[1], [0], [0], [1], [0, 0, 1, 1], [], []>} : vector<64x128xbf16>, vector<128x512xbf16>, vector<64x512xf32> -> vector<64x512xf32>
    %c0_5 = arith.constant 0 : index
    %c0_6 = arith.constant 0 : index
    %8 = vector.load %arg5[%c0_5, %c0_6] : memref<1x512xf32, #tpu.memory_space<vmem>>, vector<1x512xf32>
    %9 = vector.broadcast %8 : vector<1x512xf32> to vector<64x512xf32>
    %10 = arith.addf %7, %9 : vector<64x512xf32>
    %c0_7 = arith.constant 0 : index
    %c0_8 = arith.constant 0 : index
    %11 = vector.load %arg9[%c0_7, %c0_8] : memref<64x512xf32, #tpu.memory_space<vmem>>, vector<64x512xf32>
    tpu.vector_store %arg9[%c0_7, %c0_8], %10 {strides = array<i32>} : memref<64x512xf32, #tpu.memory_space<vmem>>, vector<64x512xf32>,
    %c0_i32_9 = arith.constant 0 : i32
    %c0_10 = arith.constant 0 : index
    %c0_11 = arith.constant 0 : index
    %12 = vector.load %arg10[%c0_10, %c0_11] : memref<8x128xf32, #tpu.memory_space<vmem>>, vector<8x128xf32>
    %c0_12 = arith.constant 0 : index
    %c0_13 = arith.constant 0 : index
    %13 = vector.load %arg11[%c0_12, %c0_13] : memref<8x128xf32, #tpu.memory_space<vmem>>, vector<8x128xf32>
    %c8_i32 = arith.constant 8 : i32
    %14 = arith.muli %c0_i32_9, %c8_i32 : i32
    %15 = tpu.assume_multiple %14, 8 : i32
    %16 = arith.index_cast %15 : i32 to index
    %c0_14 = arith.constant 0 : index
    %17 = vector.load %arg9[%16, %c0_14] : memref<64x512xf32, #tpu.memory_space<vmem>>, vector<8x512xf32>
    %18 = arith.truncf %12 : vector<8x128xf32> to vector<8x128xbf16>
    %c0_15 = arith.constant 0 : index
    %c0_16 = arith.constant 0 : index
    %19 = vector.load %arg4[%c0_15, %c0_16] : memref<128x512xbf16, #tpu.memory_space<vmem>>, vector<128x512xbf16>
    %cst_17 = arith.constant dense<0.000000e+00> : vector<8x512xf32>
    %20 = tpu.matmul %18, %19, %cst_17 {dimension_numbers = #tpu.dot_dimension_numbers<[1], [0], [0], [1], [0, 0, 1, 1], [], []>} : vector<8x128xbf16>, vector<128x512xbf16>, vector<8x512xf32> -> vector<8x512xf32>
    %21 = arith.addf %17, %20 : vector<8x512xf32>
    %22 = vector.extract_strided_slice %21 {offsets = [0, 0], sizes = [8, 128], strides = [1, 1]} : vector<8x512xf32> to vector<8x128xf32>
    %23 = arith.negf %22 : vector<8x128xf32>
    %24 = math.exp %23 : vector<8x128xf32>
    %cst_18 = arith.constant 1.000000e+00 : f32
    %25 = vector.broadcast %cst_18 : f32 to vector<8x128xf32>
    %26 = arith.addf %25, %24 : vector<8x128xf32>
    %27 = arith.divf %25, %26 : vector<8x128xf32>
    %28 = vector.extract_strided_slice %21 {offsets = [0, 128], sizes = [8, 128], strides = [1, 1]} : vector<8x512xf32> to vector<8x128xf32>
    %29 = arith.negf %28 : vector<8x128xf32>
    %30 = math.exp %29 : vector<8x128xf32>
    %cst_19 = arith.constant 1.000000e+00 : f32
    %31 = vector.broadcast %cst_19 : f32 to vector<8x128xf32>
    %32 = arith.addf %31, %30 : vector<8x128xf32>
    %33 = arith.divf %31, %32 : vector<8x128xf32>
    %34 = vector.extract_strided_slice %21 {offsets = [0, 256], sizes = [8, 128], strides = [1, 1]} : vector<8x512xf32> to vector<8x128xf32>
    %35 = math.tanh %34 : vector<8x128xf32>
    %36 = vector.extract_strided_slice %21 {offsets = [0, 384], sizes = [8, 128], strides = [1, 1]} : vector<8x512xf32> to vector<8x128xf32>
    %37 = arith.negf %36 : vector<8x128xf32>
    %38 = math.exp %37 : vector<8x128xf32>
    %cst_20 = arith.constant 1.000000e+00 : f32
    %39 = vector.broadcast %cst_20 : f32 to vector<8x128xf32>
    %40 = arith.addf %39, %38 : vector<8x128xf32>
    %41 = arith.divf %39, %40 : vector<8x128xf32>
    %42 = arith.mulf %33, %13 : vector<8x128xf32>
    %43 = arith.mulf %27, %35 : vector<8x128xf32>
    %44 = arith.addf %42, %43 : vector<8x128xf32>
    %45 = math.tanh %44 : vector<8x128xf32>
    %46 = arith.mulf %41, %45 : vector<8x128xf32>
    %c0_21 = arith.constant 0 : index
    %c0_22 = arith.constant 0 : index
    %47 = vector.load %arg10[%c0_21, %c0_22] : memref<8x128xf32, #tpu.memory_space<vmem>>, vector<8x128xf32>
    tpu.vector_store %arg10[%c0_21, %c0_22], %46 {strides = array<i32>} : memref<8x128xf32, #tpu.memory_space<vmem>>, vector<8x128xf32>,
    %c0_23 = arith.constant 0 : index
    %c0_24 = arith.constant 0 : index
    %48 = vector.load %arg11[%c0_23, %c0_24] : memref<8x128xf32, #tpu.memory_space<vmem>>, vector<8x128xf32>
    tpu.vector_store %arg11[%c0_23, %c0_24], %44 {strides = array<i32>} : memref<8x128xf32, #tpu.memory_space<vmem>>, vector<8x128xf32>,
    %c0_25 = arith.constant 0 : index
    %c0_26 = arith.constant 0 : index
    %49 = vector.load %arg12[%c0_25, %c0_26] : memref<8x128xf32, #tpu.memory_space<vmem>>, vector<8x128xf32>
    %50 = arith.maximumf %49, %46 : vector<8x128xf32>
    %c0_27 = arith.constant 0 : index
    %c0_28 = arith.constant 0 : index
    %51 = vector.load %arg12[%c0_27, %c0_28] : memref<8x128xf32, #tpu.memory_space<vmem>>, vector<8x128xf32>
    tpu.vector_store %arg12[%c0_27, %c0_28], %50 {strides = array<i32>} : memref<8x128xf32, #tpu.memory_space<vmem>>, vector<8x128xf32>,
    %c1_i32 = arith.constant 1 : i32
    %c0_29 = arith.constant 0 : index
    %c0_30 = arith.constant 0 : index
    %52 = vector.load %arg10[%c0_29, %c0_30] : memref<8x128xf32, #tpu.memory_space<vmem>>, vector<8x128xf32>
    %c0_31 = arith.constant 0 : index
    %c0_32 = arith.constant 0 : index
    %53 = vector.load %arg11[%c0_31, %c0_32] : memref<8x128xf32, #tpu.memory_space<vmem>>, vector<8x128xf32>
    %c8_i32_33 = arith.constant 8 : i32
    %54 = arith.muli %c1_i32, %c8_i32_33 : i32
    %55 = tpu.assume_multiple %54, 8 : i32
    %56 = arith.index_cast %55 : i32 to index
    %c0_34 = arith.constant 0 : index
    %57 = vector.load %arg9[%56, %c0_34] : memref<64x512xf32, #tpu.memory_space<vmem>>, vector<8x512xf32>
    %58 = arith.truncf %52 : vector<8x128xf32> to vector<8x128xbf16>
    %c0_35 = arith.constant 0 : index
    %c0_36 = arith.constant 0 : index
    %59 = vector.load %arg4[%c0_35, %c0_36] : memref<128x512xbf16, #tpu.memory_space<vmem>>, vector<128x512xbf16>
    %cst_37 = arith.constant dense<0.000000e+00> : vector<8x512xf32>
    %60 = tpu.matmul %58, %59, %cst_37 {dimension_numbers = #tpu.dot_dimension_numbers<[1], [0], [0], [1], [0, 0, 1, 1], [], []>} : vector<8x128xbf16>, vector<128x512xbf16>, vector<8x512xf32> -> vector<8x512xf32>
    %61 = arith.addf %57, %60 : vector<8x512xf32>
    %62 = vector.extract_strided_slice %61 {offsets = [0, 0], sizes = [8, 128], strides = [1, 1]} : vector<8x512xf32> to vector<8x128xf32>
    %63 = arith.negf %62 : vector<8x128xf32>
    %64 = math.exp %63 : vector<8x128xf32>
    %cst_38 = arith.constant 1.000000e+00 : f32
    %65 = vector.broadcast %cst_38 : f32 to vector<8x128xf32>
    %66 = arith.addf %65, %64 : vector<8x128xf32>
    %67 = arith.divf %65, %66 : vector<8x128xf32>
    %68 = vector.extract_strided_slice %61 {offsets = [0, 128], sizes = [8, 128], strides = [1, 1]} : vector<8x512xf32> to vector<8x128xf32>
    %69 = arith.negf %68 : vector<8x128xf32>
    %70 = math.exp %69 : vector<8x128xf32>
    %cst_39 = arith.constant 1.000000e+00 : f32
    %71 = vector.broadcast %cst_39 : f32 to vector<8x128xf32>
    %72 = arith.addf %71, %70 : vector<8x128xf32>
    %73 = arith.divf %71, %72 : vector<8x128xf32>
    %74 = vector.extract_strided_slice %61 {offsets = [0, 256], sizes = [8, 128], strides = [1, 1]} : vector<8x512xf32> to vector<8x128xf32>
    %75 = math.tanh %74 : vector<8x128xf32>
    %76 = vector.extract_strided_slice %61 {offsets = [0, 384], sizes = [8, 128], strides = [1, 1]} : vector<8x512xf32> to vector<8x128xf32>
    %77 = arith.negf %76 : vector<8x128xf32>
    %78 = math.exp %77 : vector<8x128xf32>
    %cst_40 = arith.constant 1.000000e+00 : f32
    %79 = vector.broadcast %cst_40 : f32 to vector<8x128xf32>
    %80 = arith.addf %79, %78 : vector<8x128xf32>
    %81 = arith.divf %79, %80 : vector<8x128xf32>
    %82 = arith.mulf %73, %53 : vector<8x128xf32>
    %83 = arith.mulf %67, %75 : vector<8x128xf32>
    %84 = arith.addf %82, %83 : vector<8x128xf32>
    %85 = math.tanh %84 : vector<8x128xf32>
    %86 = arith.mulf %81, %85 : vector<8x128xf32>
    %c0_41 = arith.constant 0 : index
    %c0_42 = arith.constant 0 : index
    %87 = vector.load %arg10[%c0_41, %c0_42] : memref<8x128xf32, #tpu.memory_space<vmem>>, vector<8x128xf32>
    tpu.vector_store %arg10[%c0_41, %c0_42], %86 {strides = array<i32>} : memref<8x128xf32, #tpu.memory_space<vmem>>, vector<8x128xf32>,
    %c0_43 = arith.constant 0 : index
    %c0_44 = arith.constant 0 : index
    %88 = vector.load %arg11[%c0_43, %c0_44] : memref<8x128xf32, #tpu.memory_space<vmem>>, vector<8x128xf32>
    tpu.vector_store %arg11[%c0_43, %c0_44], %84 {strides = array<i32>} : memref<8x128xf32, #tpu.memory_space<vmem>>, vector<8x128xf32>,
    %c0_45 = arith.constant 0 : index
    %c0_46 = arith.constant 0 : index
    %89 = vector.load %arg12[%c0_45, %c0_46] : memref<8x128xf32, #tpu.memory_space<vmem>>, vector<8x128xf32>
    %90 = arith.maximumf %89, %86 : vector<8x128xf32>
    %c0_47 = arith.constant 0 : index
    %c0_48 = arith.constant 0 : index
    %91 = vector.load %arg12[%c0_47, %c0_48] : memref<8x128xf32, #tpu.memory_space<vmem>>, vector<8x128xf32>
    tpu.vector_store %arg12[%c0_47, %c0_48], %90 {strides = array<i32>} : memref<8x128xf32, #tpu.memory_space<vmem>>, vector<8x128xf32>,
    %c2_i32 = arith.constant 2 : i32
    %c0_49 = arith.constant 0 : index
    %c0_50 = arith.constant 0 : index
    %92 = vector.load %arg10[%c0_49, %c0_50] : memref<8x128xf32, #tpu.memory_space<vmem>>, vector<8x128xf32>
    %c0_51 = arith.constant 0 : index
    %c0_52 = arith.constant 0 : index
    %93 = vector.load %arg11[%c0_51, %c0_52] : memref<8x128xf32, #tpu.memory_space<vmem>>, vector<8x128xf32>
    %c8_i32_53 = arith.constant 8 : i32
    %94 = arith.muli %c2_i32, %c8_i32_53 : i32
    %95 = tpu.assume_multiple %94, 8 : i32
    %96 = arith.index_cast %95 : i32 to index
    %c0_54 = arith.constant 0 : index
    %97 = vector.load %arg9[%96, %c0_54] : memref<64x512xf32, #tpu.memory_space<vmem>>, vector<8x512xf32>
    %98 = arith.truncf %92 : vector<8x128xf32> to vector<8x128xbf16>
    %c0_55 = arith.constant 0 : index
    %c0_56 = arith.constant 0 : index
    %99 = vector.load %arg4[%c0_55, %c0_56] : memref<128x512xbf16, #tpu.memory_space<vmem>>, vector<128x512xbf16>
    %cst_57 = arith.constant dense<0.000000e+00> : vector<8x512xf32>
    %100 = tpu.matmul %98, %99, %cst_57 {dimension_numbers = #tpu.dot_dimension_numbers<[1], [0], [0], [1], [0, 0, 1, 1], [], []>} : vector<8x128xbf16>, vector<128x512xbf16>, vector<8x512xf32> -> vector<8x512xf32>
    %101 = arith.addf %97, %100 : vector<8x512xf32>
    %102 = vector.extract_strided_slice %101 {offsets = [0, 0], sizes = [8, 128], strides = [1, 1]} : vector<8x512xf32> to vector<8x128xf32>
    %103 = arith.negf %102 : vector<8x128xf32>
    %104 = math.exp %103 : vector<8x128xf32>
    %cst_58 = arith.constant 1.000000e+00 : f32
    %105 = vector.broadcast %cst_58 : f32 to vector<8x128xf32>
    %106 = arith.addf %105, %104 : vector<8x128xf32>
    %107 = arith.divf %105, %106 : vector<8x128xf32>
    %108 = vector.extract_strided_slice %101 {offsets = [0, 128], sizes = [8, 128], strides = [1, 1]} : vector<8x512xf32> to vector<8x128xf32>
    %109 = arith.negf %108 : vector<8x128xf32>
    %110 = math.exp %109 : vector<8x128xf32>
    %cst_59 = arith.constant 1.000000e+00 : f32
    %111 = vector.broadcast %cst_59 : f32 to vector<8x128xf32>
    %112 = arith.addf %111, %110 : vector<8x128xf32>
    %113 = arith.divf %111, %112 : vector<8x128xf32>
    %114 = vector.extract_strided_slice %101 {offsets = [0, 256], sizes = [8, 128], strides = [1, 1]} : vector<8x512xf32> to vector<8x128xf32>
    %115 = math.tanh %114 : vector<8x128xf32>
    %116 = vector.extract_strided_slice %101 {offsets = [0, 384], sizes = [8, 128], strides = [1, 1]} : vector<8x512xf32> to vector<8x128xf32>
    %117 = arith.negf %116 : vector<8x128xf32>
    %118 = math.exp %117 : vector<8x128xf32>
    %cst_60 = arith.constant 1.000000e+00 : f32
    %119 = vector.broadcast %cst_60 : f32 to vector<8x128xf32>
    %120 = arith.addf %119, %118 : vector<8x128xf32>
    %121 = arith.divf %119, %120 : vector<8x128xf32>
    %122 = arith.mulf %113, %93 : vector<8x128xf32>
    %123 = arith.mulf %107, %115 : vector<8x128xf32>
    %124 = arith.addf %122, %123 : vector<8x128xf32>
    %125 = math.tanh %124 : vector<8x128xf32>
    %126 = arith.mulf %121, %125 : vector<8x128xf32>
    %c0_61 = arith.constant 0 : index
    %c0_62 = arith.constant 0 : index
    %127 = vector.load %arg10[%c0_61, %c0_62] : memref<8x128xf32, #tpu.memory_space<vmem>>, vector<8x128xf32>
    tpu.vector_store %arg10[%c0_61, %c0_62], %126 {strides = array<i32>} : memref<8x128xf32, #tpu.memory_space<vmem>>, vector<8x128xf32>,
    %c0_63 = arith.constant 0 : index
    %c0_64 = arith.constant 0 : index
    %128 = vector.load %arg11[%c0_63, %c0_64] : memref<8x128xf32, #tpu.memory_space<vmem>>, vector<8x128xf32>
    tpu.vector_store %arg11[%c0_63, %c0_64], %124 {strides = array<i32>} : memref<8x128xf32, #tpu.memory_space<vmem>>, vector<8x128xf32>,
    %c0_65 = arith.constant 0 : index
    %c0_66 = arith.constant 0 : index
    %129 = vector.load %arg12[%c0_65, %c0_66] : memref<8x128xf32, #tpu.memory_space<vmem>>, vector<8x128xf32>
    %130 = arith.maximumf %129, %126 : vector<8x128xf32>
    %c0_67 = arith.constant 0 : index
    %c0_68 = arith.constant 0 : index
    %131 = vector.load %arg12[%c0_67, %c0_68] : memref<8x128xf32, #tpu.memory_space<vmem>>, vector<8x128xf32>
    tpu.vector_store %arg12[%c0_67, %c0_68], %130 {strides = array<i32>} : memref<8x128xf32, #tpu.memory_space<vmem>>, vector<8x128xf32>,
    %c3_i32 = arith.constant 3 : i32
    %c0_69 = arith.constant 0 : index
    %c0_70 = arith.constant 0 : index
    %132 = vector.load %arg10[%c0_69, %c0_70] : memref<8x128xf32, #tpu.memory_space<vmem>>, vector<8x128xf32>
    %c0_71 = arith.constant 0 : index
    %c0_72 = arith.constant 0 : index
    %133 = vector.load %arg11[%c0_71, %c0_72] : memref<8x128xf32, #tpu.memory_space<vmem>>, vector<8x128xf32>
    %c8_i32_73 = arith.constant 8 : i32
    %134 = arith.muli %c3_i32, %c8_i32_73 : i32
    %135 = tpu.assume_multiple %134, 8 : i32
    %136 = arith.index_cast %135 : i32 to index
    %c0_74 = arith.constant 0 : index
    %137 = vector.load %arg9[%136, %c0_74] : memref<64x512xf32, #tpu.memory_space<vmem>>, vector<8x512xf32>
    %138 = arith.truncf %132 : vector<8x128xf32> to vector<8x128xbf16>
    %c0_75 = arith.constant 0 : index
    %c0_76 = arith.constant 0 : index
    %139 = vector.load %arg4[%c0_75, %c0_76] : memref<128x512xbf16, #tpu.memory_space<vmem>>, vector<128x512xbf16>
    %cst_77 = arith.constant dense<0.000000e+00> : vector<8x512xf32>
    %140 = tpu.matmul %138, %139, %cst_77 {dimension_numbers = #tpu.dot_dimension_numbers<[1], [0], [0], [1], [0, 0, 1, 1], [], []>} : vector<8x128xbf16>, vector<128x512xbf16>, vector<8x512xf32> -> vector<8x512xf32>
    %141 = arith.addf %137, %140 : vector<8x512xf32>
    %142 = vector.extract_strided_slice %141 {offsets = [0, 0], sizes = [8, 128], strides = [1, 1]} : vector<8x512xf32> to vector<8x128xf32>
    %143 = arith.negf %142 : vector<8x128xf32>
    %144 = math.exp %143 : vector<8x128xf32>
    %cst_78 = arith.constant 1.000000e+00 : f32
    %145 = vector.broadcast %cst_78 : f32 to vector<8x128xf32>
    %146 = arith.addf %145, %144 : vector<8x128xf32>
    %147 = arith.divf %145, %146 : vector<8x128xf32>
    %148 = vector.extract_strided_slice %141 {offsets = [0, 128], sizes = [8, 128], strides = [1, 1]} : vector<8x512xf32> to vector<8x128xf32>
    %149 = arith.negf %148 : vector<8x128xf32>
    %150 = math.exp %149 : vector<8x128xf32>
    %cst_79 = arith.constant 1.000000e+00 : f32
    %151 = vector.broadcast %cst_79 : f32 to vector<8x128xf32>
    %152 = arith.addf %151, %150 : vector<8x128xf32>
    %153 = arith.divf %151, %152 : vector<8x128xf32>
    %154 = vector.extract_strided_slice %141 {offsets = [0, 256], sizes = [8, 128], strides = [1, 1]} : vector<8x512xf32> to vector<8x128xf32>
    %155 = math.tanh %154 : vector<8x128xf32>
    %156 = vector.extract_strided_slice %141 {offsets = [0, 384], sizes = [8, 128], strides = [1, 1]} : vector<8x512xf32> to vector<8x128xf32>
    %157 = arith.negf %156 : vector<8x128xf32>
    %158 = math.exp %157 : vector<8x128xf32>
    %cst_80 = arith.constant 1.000000e+00 : f32
    %159 = vector.broadcast %cst_80 : f32 to vector<8x128xf32>
    %160 = arith.addf %159, %158 : vector<8x128xf32>
    %161 = arith.divf %159, %160 : vector<8x128xf32>
    %162 = arith.mulf %153, %133 : vector<8x128xf32>
    %163 = arith.mulf %147, %155 : vector<8x128xf32>
    %164 = arith.addf %162, %163 : vector<8x128xf32>
    %165 = math.tanh %164 : vector<8x128xf32>
    %166 = arith.mulf %161, %165 : vector<8x128xf32>
    %c0_81 = arith.constant 0 : index
    %c0_82 = arith.constant 0 : index
    %167 = vector.load %arg10[%c0_81, %c0_82] : memref<8x128xf32, #tpu.memory_space<vmem>>, vector<8x128xf32>
    tpu.vector_store %arg10[%c0_81, %c0_82], %166 {strides = array<i32>} : memref<8x128xf32, #tpu.memory_space<vmem>>, vector<8x128xf32>,
    %c0_83 = arith.constant 0 : index
    %c0_84 = arith.constant 0 : index
    %168 = vector.load %arg11[%c0_83, %c0_84] : memref<8x128xf32, #tpu.memory_space<vmem>>, vector<8x128xf32>
    tpu.vector_store %arg11[%c0_83, %c0_84], %164 {strides = array<i32>} : memref<8x128xf32, #tpu.memory_space<vmem>>, vector<8x128xf32>,
    %c0_85 = arith.constant 0 : index
    %c0_86 = arith.constant 0 : index
    %169 = vector.load %arg12[%c0_85, %c0_86] : memref<8x128xf32, #tpu.memory_space<vmem>>, vector<8x128xf32>
    %170 = arith.maximumf %169, %166 : vector<8x128xf32>
    %c0_87 = arith.constant 0 : index
    %c0_88 = arith.constant 0 : index
    %171 = vector.load %arg12[%c0_87, %c0_88] : memref<8x128xf32, #tpu.memory_space<vmem>>, vector<8x128xf32>
    tpu.vector_store %arg12[%c0_87, %c0_88], %170 {strides = array<i32>} : memref<8x128xf32, #tpu.memory_space<vmem>>, vector<8x128xf32>,
    %c4_i32 = arith.constant 4 : i32
    %c0_89 = arith.constant 0 : index
    %c0_90 = arith.constant 0 : index
    %172 = vector.load %arg10[%c0_89, %c0_90] : memref<8x128xf32, #tpu.memory_space<vmem>>, vector<8x128xf32>
    %c0_91 = arith.constant 0 : index
    %c0_92 = arith.constant 0 : index
    %173 = vector.load %arg11[%c0_91, %c0_92] : memref<8x128xf32, #tpu.memory_space<vmem>>, vector<8x128xf32>
    %c8_i32_93 = arith.constant 8 : i32
    %174 = arith.muli %c4_i32, %c8_i32_93 : i32
    %175 = tpu.assume_multiple %174, 8 : i32
    %176 = arith.index_cast %175 : i32 to index
    %c0_94 = arith.constant 0 : index
    %177 = vector.load %arg9[%176, %c0_94] : memref<64x512xf32, #tpu.memory_space<vmem>>, vector<8x512xf32>
    %178 = arith.truncf %172 : vector<8x128xf32> to vector<8x128xbf16>
    %c0_95 = arith.constant 0 : index
    %c0_96 = arith.constant 0 : index
    %179 = vector.load %arg4[%c0_95, %c0_96] : memref<128x512xbf16, #tpu.memory_space<vmem>>, vector<128x512xbf16>
    %cst_97 = arith.constant dense<0.000000e+00> : vector<8x512xf32>
    %180 = tpu.matmul %178, %179, %cst_97 {dimension_numbers = #tpu.dot_dimension_numbers<[1], [0], [0], [1], [0, 0, 1, 1], [], []>} : vector<8x128xbf16>, vector<128x512xbf16>, vector<8x512xf32> -> vector<8x512xf32>
    %181 = arith.addf %177, %180 : vector<8x512xf32>
    %182 = vector.extract_strided_slice %181 {offsets = [0, 0], sizes = [8, 128], strides = [1, 1]} : vector<8x512xf32> to vector<8x128xf32>
    %183 = arith.negf %182 : vector<8x128xf32>
    %184 = math.exp %183 : vector<8x128xf32>
    %cst_98 = arith.constant 1.000000e+00 : f32
    %185 = vector.broadcast %cst_98 : f32 to vector<8x128xf32>
    %186 = arith.addf %185, %184 : vector<8x128xf32>
    %187 = arith.divf %185, %186 : vector<8x128xf32>
    %188 = vector.extract_strided_slice %181 {offsets = [0, 128], sizes = [8, 128], strides = [1, 1]} : vector<8x512xf32> to vector<8x128xf32>
    %189 = arith.negf %188 : vector<8x128xf32>
    %190 = math.exp %189 : vector<8x128xf32>
    %cst_99 = arith.constant 1.000000e+00 : f32
    %191 = vector.broadcast %cst_99 : f32 to vector<8x128xf32>
    %192 = arith.addf %191, %190 : vector<8x128xf32>
    %193 = arith.divf %191, %192 : vector<8x128xf32>
    %194 = vector.extract_strided_slice %181 {offsets = [0, 256], sizes = [8, 128], strides = [1, 1]} : vector<8x512xf32> to vector<8x128xf32>
    %195 = math.tanh %194 : vector<8x128xf32>
    %196 = vector.extract_strided_slice %181 {offsets = [0, 384], sizes = [8, 128], strides = [1, 1]} : vector<8x512xf32> to vector<8x128xf32>
    %197 = arith.negf %196 : vector<8x128xf32>
    %198 = math.exp %197 : vector<8x128xf32>
    %cst_100 = arith.constant 1.000000e+00 : f32
    %199 = vector.broadcast %cst_100 : f32 to vector<8x128xf32>
    %200 = arith.addf %199, %198 : vector<8x128xf32>
    %201 = arith.divf %199, %200 : vector<8x128xf32>
    %202 = arith.mulf %193, %173 : vector<8x128xf32>
    %203 = arith.mulf %187, %195 : vector<8x128xf32>
    %204 = arith.addf %202, %203 : vector<8x128xf32>
    %205 = math.tanh %204 : vector<8x128xf32>
    %206 = arith.mulf %201, %205 : vector<8x128xf32>
    %c0_101 = arith.constant 0 : index
    %c0_102 = arith.constant 0 : index
    %207 = vector.load %arg10[%c0_101, %c0_102] : memref<8x128xf32, #tpu.memory_space<vmem>>, vector<8x128xf32>
    tpu.vector_store %arg10[%c0_101, %c0_102], %206 {strides = array<i32>} : memref<8x128xf32, #tpu.memory_space<vmem>>, vector<8x128xf32>,
    %c0_103 = arith.constant 0 : index
    %c0_104 = arith.constant 0 : index
    %208 = vector.load %arg11[%c0_103, %c0_104] : memref<8x128xf32, #tpu.memory_space<vmem>>, vector<8x128xf32>
    tpu.vector_store %arg11[%c0_103, %c0_104], %204 {strides = array<i32>} : memref<8x128xf32, #tpu.memory_space<vmem>>, vector<8x128xf32>,
    %c0_105 = arith.constant 0 : index
    %c0_106 = arith.constant 0 : index
    %209 = vector.load %arg12[%c0_105, %c0_106] : memref<8x128xf32, #tpu.memory_space<vmem>>, vector<8x128xf32>
    %210 = arith.maximumf %209, %206 : vector<8x128xf32>
    %c0_107 = arith.constant 0 : index
    %c0_108 = arith.constant 0 : index
    %211 = vector.load %arg12[%c0_107, %c0_108] : memref<8x128xf32, #tpu.memory_space<vmem>>, vector<8x128xf32>
    tpu.vector_store %arg12[%c0_107, %c0_108], %210 {strides = array<i32>} : memref<8x128xf32, #tpu.memory_space<vmem>>, vector<8x128xf32>,
    %c5_i32 = arith.constant 5 : i32
    %c0_109 = arith.constant 0 : index
    %c0_110 = arith.constant 0 : index
    %212 = vector.load %arg10[%c0_109, %c0_110] : memref<8x128xf32, #tpu.memory_space<vmem>>, vector<8x128xf32>
    %c0_111 = arith.constant 0 : index
    %c0_112 = arith.constant 0 : index
    %213 = vector.load %arg11[%c0_111, %c0_112] : memref<8x128xf32, #tpu.memory_space<vmem>>, vector<8x128xf32>
    %c8_i32_113 = arith.constant 8 : i32
    %214 = arith.muli %c5_i32, %c8_i32_113 : i32
    %215 = tpu.assume_multiple %214, 8 : i32
    %216 = arith.index_cast %215 : i32 to index
    %c0_114 = arith.constant 0 : index
    %217 = vector.load %arg9[%216, %c0_114] : memref<64x512xf32, #tpu.memory_space<vmem>>, vector<8x512xf32>
    %218 = arith.truncf %212 : vector<8x128xf32> to vector<8x128xbf16>
    %c0_115 = arith.constant 0 : index
    %c0_116 = arith.constant 0 : index
    %219 = vector.load %arg4[%c0_115, %c0_116] : memref<128x512xbf16, #tpu.memory_space<vmem>>, vector<128x512xbf16>
    %cst_117 = arith.constant dense<0.000000e+00> : vector<8x512xf32>
    %220 = tpu.matmul %218, %219, %cst_117 {dimension_numbers = #tpu.dot_dimension_numbers<[1], [0], [0], [1], [0, 0, 1, 1], [], []>} : vector<8x128xbf16>, vector<128x512xbf16>, vector<8x512xf32> -> vector<8x512xf32>
    %221 = arith.addf %217, %220 : vector<8x512xf32>
    %222 = vector.extract_strided_slice %221 {offsets = [0, 0], sizes = [8, 128], strides = [1, 1]} : vector<8x512xf32> to vector<8x128xf32>
    %223 = arith.negf %222 : vector<8x128xf32>
    %224 = math.exp %223 : vector<8x128xf32>
    %cst_118 = arith.constant 1.000000e+00 : f32
    %225 = vector.broadcast %cst_118 : f32 to vector<8x128xf32>
    %226 = arith.addf %225, %224 : vector<8x128xf32>
    %227 = arith.divf %225, %226 : vector<8x128xf32>
    %228 = vector.extract_strided_slice %221 {offsets = [0, 128], sizes = [8, 128], strides = [1, 1]} : vector<8x512xf32> to vector<8x128xf32>
    %229 = arith.negf %228 : vector<8x128xf32>
    %230 = math.exp %229 : vector<8x128xf32>
    %cst_119 = arith.constant 1.000000e+00 : f32
    %231 = vector.broadcast %cst_119 : f32 to vector<8x128xf32>
    %232 = arith.addf %231, %230 : vector<8x128xf32>
    %233 = arith.divf %231, %232 : vector<8x128xf32>
    %234 = vector.extract_strided_slice %221 {offsets = [0, 256], sizes = [8, 128], strides = [1, 1]} : vector<8x512xf32> to vector<8x128xf32>
    %235 = math.tanh %234 : vector<8x128xf32>
    %236 = vector.extract_strided_slice %221 {offsets = [0, 384], sizes = [8, 128], strides = [1, 1]} : vector<8x512xf32> to vector<8x128xf32>
    %237 = arith.negf %236 : vector<8x128xf32>
    %238 = math.exp %237 : vector<8x128xf32>
    %cst_120 = arith.constant 1.000000e+00 : f32
    %239 = vector.broadcast %cst_120 : f32 to vector<8x128xf32>
    %240 = arith.addf %239, %238 : vector<8x128xf32>
    %241 = arith.divf %239, %240 : vector<8x128xf32>
    %242 = arith.mulf %233, %213 : vector<8x128xf32>
    %243 = arith.mulf %227, %235 : vector<8x128xf32>
    %244 = arith.addf %242, %243 : vector<8x128xf32>
    %245 = math.tanh %244 : vector<8x128xf32>
    %246 = arith.mulf %241, %245 : vector<8x128xf32>
    %c0_121 = arith.constant 0 : index
    %c0_122 = arith.constant 0 : index
    %247 = vector.load %arg10[%c0_121, %c0_122] : memref<8x128xf32, #tpu.memory_space<vmem>>, vector<8x128xf32>
    tpu.vector_store %arg10[%c0_121, %c0_122], %246 {strides = array<i32>} : memref<8x128xf32, #tpu.memory_space<vmem>>, vector<8x128xf32>,
    %c0_123 = arith.constant 0 : index
    %c0_124 = arith.constant 0 : index
    %248 = vector.load %arg11[%c0_123, %c0_124] : memref<8x128xf32, #tpu.memory_space<vmem>>, vector<8x128xf32>
    tpu.vector_store %arg11[%c0_123, %c0_124], %244 {strides = array<i32>} : memref<8x128xf32, #tpu.memory_space<vmem>>, vector<8x128xf32>,
    %c0_125 = arith.constant 0 : index
    %c0_126 = arith.constant 0 : index
    %249 = vector.load %arg12[%c0_125, %c0_126] : memref<8x128xf32, #tpu.memory_space<vmem>>, vector<8x128xf32>
    %250 = arith.maximumf %249, %246 : vector<8x128xf32>
    %c0_127 = arith.constant 0 : index
    %c0_128 = arith.constant 0 : index
    %251 = vector.load %arg12[%c0_127, %c0_128] : memref<8x128xf32, #tpu.memory_space<vmem>>, vector<8x128xf32>
    tpu.vector_store %arg12[%c0_127, %c0_128], %250 {strides = array<i32>} : memref<8x128xf32, #tpu.memory_space<vmem>>, vector<8x128xf32>,
    %c6_i32 = arith.constant 6 : i32
    %c0_129 = arith.constant 0 : index
    %c0_130 = arith.constant 0 : index
    %252 = vector.load %arg10[%c0_129, %c0_130] : memref<8x128xf32, #tpu.memory_space<vmem>>, vector<8x128xf32>
    %c0_131 = arith.constant 0 : index
    %c0_132 = arith.constant 0 : index
    %253 = vector.load %arg11[%c0_131, %c0_132] : memref<8x128xf32, #tpu.memory_space<vmem>>, vector<8x128xf32>
    %c8_i32_133 = arith.constant 8 : i32
    %254 = arith.muli %c6_i32, %c8_i32_133 : i32
    %255 = tpu.assume_multiple %254, 8 : i32
    %256 = arith.index_cast %255 : i32 to index
    %c0_134 = arith.constant 0 : index
    %257 = vector.load %arg9[%256, %c0_134] : memref<64x512xf32, #tpu.memory_space<vmem>>, vector<8x512xf32>
    %258 = arith.truncf %252 : vector<8x128xf32> to vector<8x128xbf16>
    %c0_135 = arith.constant 0 : index
    %c0_136 = arith.constant 0 : index
    %259 = vector.load %arg4[%c0_135, %c0_136] : memref<128x512xbf16, #tpu.memory_space<vmem>>, vector<128x512xbf16>
    %cst_137 = arith.constant dense<0.000000e+00> : vector<8x512xf32>
    %260 = tpu.matmul %258, %259, %cst_137 {dimension_numbers = #tpu.dot_dimension_numbers<[1], [0], [0], [1], [0, 0, 1, 1], [], []>} : vector<8x128xbf16>, vector<128x512xbf16>, vector<8x512xf32> -> vector<8x512xf32>
    %261 = arith.addf %257, %260 : vector<8x512xf32>
    %262 = vector.extract_strided_slice %261 {offsets = [0, 0], sizes = [8, 128], strides = [1, 1]} : vector<8x512xf32> to vector<8x128xf32>
    %263 = arith.negf %262 : vector<8x128xf32>
    %264 = math.exp %263 : vector<8x128xf32>
    %cst_138 = arith.constant 1.000000e+00 : f32
    %265 = vector.broadcast %cst_138 : f32 to vector<8x128xf32>
    %266 = arith.addf %265, %264 : vector<8x128xf32>
    %267 = arith.divf %265, %266 : vector<8x128xf32>
    %268 = vector.extract_strided_slice %261 {offsets = [0, 128], sizes = [8, 128], strides = [1, 1]} : vector<8x512xf32> to vector<8x128xf32>
    %269 = arith.negf %268 : vector<8x128xf32>
    %270 = math.exp %269 : vector<8x128xf32>
    %cst_139 = arith.constant 1.000000e+00 : f32
    %271 = vector.broadcast %cst_139 : f32 to vector<8x128xf32>
    %272 = arith.addf %271, %270 : vector<8x128xf32>
    %273 = arith.divf %271, %272 : vector<8x128xf32>
    %274 = vector.extract_strided_slice %261 {offsets = [0, 256], sizes = [8, 128], strides = [1, 1]} : vector<8x512xf32> to vector<8x128xf32>
    %275 = math.tanh %274 : vector<8x128xf32>
    %276 = vector.extract_strided_slice %261 {offsets = [0, 384], sizes = [8, 128], strides = [1, 1]} : vector<8x512xf32> to vector<8x128xf32>
    %277 = arith.negf %276 : vector<8x128xf32>
    %278 = math.exp %277 : vector<8x128xf32>
    %cst_140 = arith.constant 1.000000e+00 : f32
    %279 = vector.broadcast %cst_140 : f32 to vector<8x128xf32>
    %280 = arith.addf %279, %278 : vector<8x128xf32>
    %281 = arith.divf %279, %280 : vector<8x128xf32>
    %282 = arith.mulf %273, %253 : vector<8x128xf32>
    %283 = arith.mulf %267, %275 : vector<8x128xf32>
    %284 = arith.addf %282, %283 : vector<8x128xf32>
    %285 = math.tanh %284 : vector<8x128xf32>
    %286 = arith.mulf %281, %285 : vector<8x128xf32>
    %c0_141 = arith.constant 0 : index
    %c0_142 = arith.constant 0 : index
    %287 = vector.load %arg10[%c0_141, %c0_142] : memref<8x128xf32, #tpu.memory_space<vmem>>, vector<8x128xf32>
    tpu.vector_store %arg10[%c0_141, %c0_142], %286 {strides = array<i32>} : memref<8x128xf32, #tpu.memory_space<vmem>>, vector<8x128xf32>,
    %c0_143 = arith.constant 0 : index
    %c0_144 = arith.constant 0 : index
    %288 = vector.load %arg11[%c0_143, %c0_144] : memref<8x128xf32, #tpu.memory_space<vmem>>, vector<8x128xf32>
    tpu.vector_store %arg11[%c0_143, %c0_144], %284 {strides = array<i32>} : memref<8x128xf32, #tpu.memory_space<vmem>>, vector<8x128xf32>,
    %c0_145 = arith.constant 0 : index
    %c0_146 = arith.constant 0 : index
    %289 = vector.load %arg12[%c0_145, %c0_146] : memref<8x128xf32, #tpu.memory_space<vmem>>, vector<8x128xf32>
    %290 = arith.maximumf %289, %286 : vector<8x128xf32>
    %c0_147 = arith.constant 0 : index
    %c0_148 = arith.constant 0 : index
    %291 = vector.load %arg12[%c0_147, %c0_148] : memref<8x128xf32, #tpu.memory_space<vmem>>, vector<8x128xf32>
    tpu.vector_store %arg12[%c0_147, %c0_148], %290 {strides = array<i32>} : memref<8x128xf32, #tpu.memory_space<vmem>>, vector<8x128xf32>,
    %c7_i32 = arith.constant 7 : i32
    %c0_149 = arith.constant 0 : index
    %c0_150 = arith.constant 0 : index
    %292 = vector.load %arg10[%c0_149, %c0_150] : memref<8x128xf32, #tpu.memory_space<vmem>>, vector<8x128xf32>
    %c0_151 = arith.constant 0 : index
    %c0_152 = arith.constant 0 : index
    %293 = vector.load %arg11[%c0_151, %c0_152] : memref<8x128xf32, #tpu.memory_space<vmem>>, vector<8x128xf32>
    %c8_i32_153 = arith.constant 8 : i32
    %294 = arith.muli %c7_i32, %c8_i32_153 : i32
    %295 = tpu.assume_multiple %294, 8 : i32
    %296 = arith.index_cast %295 : i32 to index
    %c0_154 = arith.constant 0 : index
    %297 = vector.load %arg9[%296, %c0_154] : memref<64x512xf32, #tpu.memory_space<vmem>>, vector<8x512xf32>
    %298 = arith.truncf %292 : vector<8x128xf32> to vector<8x128xbf16>
    %c0_155 = arith.constant 0 : index
    %c0_156 = arith.constant 0 : index
    %299 = vector.load %arg4[%c0_155, %c0_156] : memref<128x512xbf16, #tpu.memory_space<vmem>>, vector<128x512xbf16>
    %cst_157 = arith.constant dense<0.000000e+00> : vector<8x512xf32>
    %300 = tpu.matmul %298, %299, %cst_157 {dimension_numbers = #tpu.dot_dimension_numbers<[1], [0], [0], [1], [0, 0, 1, 1], [], []>} : vector<8x128xbf16>, vector<128x512xbf16>, vector<8x512xf32> -> vector<8x512xf32>
    %301 = arith.addf %297, %300 : vector<8x512xf32>
    %302 = vector.extract_strided_slice %301 {offsets = [0, 0], sizes = [8, 128], strides = [1, 1]} : vector<8x512xf32> to vector<8x128xf32>
    %303 = arith.negf %302 : vector<8x128xf32>
    %304 = math.exp %303 : vector<8x128xf32>
    %cst_158 = arith.constant 1.000000e+00 : f32
    %305 = vector.broadcast %cst_158 : f32 to vector<8x128xf32>
    %306 = arith.addf %305, %304 : vector<8x128xf32>
    %307 = arith.divf %305, %306 : vector<8x128xf32>
    %308 = vector.extract_strided_slice %301 {offsets = [0, 128], sizes = [8, 128], strides = [1, 1]} : vector<8x512xf32> to vector<8x128xf32>
    %309 = arith.negf %308 : vector<8x128xf32>
    %310 = math.exp %309 : vector<8x128xf32>
    %cst_159 = arith.constant 1.000000e+00 : f32
    %311 = vector.broadcast %cst_159 : f32 to vector<8x128xf32>
    %312 = arith.addf %311, %310 : vector<8x128xf32>
    %313 = arith.divf %311, %312 : vector<8x128xf32>
    %314 = vector.extract_strided_slice %301 {offsets = [0, 256], sizes = [8, 128], strides = [1, 1]} : vector<8x512xf32> to vector<8x128xf32>
    %315 = math.tanh %314 : vector<8x128xf32>
    %316 = vector.extract_strided_slice %301 {offsets = [0, 384], sizes = [8, 128], strides = [1, 1]} : vector<8x512xf32> to vector<8x128xf32>
    %317 = arith.negf %316 : vector<8x128xf32>
    %318 = math.exp %317 : vector<8x128xf32>
    %cst_160 = arith.constant 1.000000e+00 : f32
    %319 = vector.broadcast %cst_160 : f32 to vector<8x128xf32>
    %320 = arith.addf %319, %318 : vector<8x128xf32>
    %321 = arith.divf %319, %320 : vector<8x128xf32>
    %322 = arith.mulf %313, %293 : vector<8x128xf32>
    %323 = arith.mulf %307, %315 : vector<8x128xf32>
    %324 = arith.addf %322, %323 : vector<8x128xf32>
    %325 = math.tanh %324 : vector<8x128xf32>
    %326 = arith.mulf %321, %325 : vector<8x128xf32>
    %c0_161 = arith.constant 0 : index
    %c0_162 = arith.constant 0 : index
    %327 = vector.load %arg10[%c0_161, %c0_162] : memref<8x128xf32, #tpu.memory_space<vmem>>, vector<8x128xf32>
    tpu.vector_store %arg10[%c0_161, %c0_162], %326 {strides = array<i32>} : memref<8x128xf32, #tpu.memory_space<vmem>>, vector<8x128xf32>,
    %c0_163 = arith.constant 0 : index
    %c0_164 = arith.constant 0 : index
    %328 = vector.load %arg11[%c0_163, %c0_164] : memref<8x128xf32, #tpu.memory_space<vmem>>, vector<8x128xf32>
    tpu.vector_store %arg11[%c0_163, %c0_164], %324 {strides = array<i32>} : memref<8x128xf32, #tpu.memory_space<vmem>>, vector<8x128xf32>,
    %c0_165 = arith.constant 0 : index
    %c0_166 = arith.constant 0 : index
    %329 = vector.load %arg12[%c0_165, %c0_166] : memref<8x128xf32, #tpu.memory_space<vmem>>, vector<8x128xf32>
    %330 = arith.maximumf %329, %326 : vector<8x128xf32>
    %c0_167 = arith.constant 0 : index
    %c0_168 = arith.constant 0 : index
    %331 = vector.load %arg12[%c0_167, %c0_168] : memref<8x128xf32, #tpu.memory_space<vmem>>, vector<8x128xf32>
    tpu.vector_store %arg12[%c0_167, %c0_168], %330 {strides = array<i32>} : memref<8x128xf32, #tpu.memory_space<vmem>>, vector<8x128xf32>,
    %c8_i32_169 = arith.constant 8 : i32
    %c0_i32_170 = arith.constant 0 : i32
    %332 = arith.cmpi eq, %arg1, %c0_i32_170 : i32
    %333 = arith.extui %332 : i1 to i32
    %c0_i32_171 = arith.constant 0 : i32
    %334 = arith.cmpi ne, %333, %c0_i32_171 : i32
    scf.if %334 {
      %c0_172 = arith.constant 0 : index
      %c0_173 = arith.constant 0 : index
      %335 = vector.load %arg12[%c0_172, %c0_173] : memref<8x128xf32, #tpu.memory_space<vmem>>, vector<8x128xf32>
      %336 = arith.truncf %335 : vector<8x128xf32> to vector<8x128xbf16>
      %c0_174 = arith.constant 0 : index
      %c0_175 = arith.constant 0 : index
      %337 = vector.load %arg6[%c0_174, %c0_175] : memref<128x128xbf16, #tpu.memory_space<vmem>>, vector<128x128xbf16>
      %cst_176 = arith.constant dense<0.000000e+00> : vector<8x128xf32>
      %338 = tpu.matmul %336, %337, %cst_176 {dimension_numbers = #tpu.dot_dimension_numbers<[1], [0], [0], [1], [0, 0, 1, 1], [], []>} : vector<8x128xbf16>, vector<128x128xbf16>, vector<8x128xf32> -> vector<8x128xf32>
      %c0_177 = arith.constant 0 : index
      %c0_178 = arith.constant 0 : index
      %339 = vector.load %arg7[%c0_177, %c0_178] : memref<1x128xf32, #tpu.memory_space<vmem>>, vector<1x128xf32>
      %340 = vector.broadcast %339 : vector<1x128xf32> to vector<8x128xf32>
      %341 = arith.addf %338, %340 : vector<8x128xf32>
      %cst_179 = arith.constant dense<0xFF800000> : vector<8xf32>
      %342 = vector.multi_reduction <maximumf>, %341, %cst_179 [1] : vector<8x128xf32> to vector<8xf32>
      %343 = vector.shape_cast %342 : vector<8xf32> to vector<8x1xf32>
      %344 = vector.broadcast %343 : vector<8x1xf32> to vector<8x128xf32>
      %345 = arith.subf %341, %344 : vector<8x128xf32>
      %346 = math.exp %345 : vector<8x128xf32>
      %cst_180 = arith.constant dense<0.000000e+00> : vector<8xf32>
      %347 = vector.multi_reduction <add>, %346, %cst_180 [1] : vector<8x128xf32> to vector<8xf32>
      %348 = vector.shape_cast %347 : vector<8xf32> to vector<8x1xf32>
      %349 = tpu.reciprocal %348 {approx = true} : vector<8x1xf32> -> vector<8x1xf32>
      %350 = arith.mulf %348, %349 : vector<8x1xf32>
      %cst_181 = arith.constant 2.000000e+00 : f32
      %351 = vector.broadcast %cst_181 : f32 to vector<8x1xf32>
      %352 = arith.subf %351, %350 : vector<8x1xf32>
      %353 = arith.mulf %349, %352 : vector<8x1xf32>
      %354 = vector.broadcast %353 : vector<8x1xf32> to vector<8x128xf32>
      %355 = arith.mulf %346, %354 : vector<8x128xf32>
      %c0_182 = arith.constant 0 : index
      %c0_183 = arith.constant 0 : index
      %356 = vector.load %arg8[%c0_182, %c0_183] : memref<8x128xf32, #tpu.memory_space<vmem>>, vector<8x128xf32>
      tpu.vector_store %arg8[%c0_182, %c0_183], %355 {strides = array<i32>} : memref<8x128xf32, #tpu.memory_space<vmem>>, vector<8x128xf32>,
    } else {
    }
    return
  }
  func.func @transform_0(%arg0: i32, %arg1: i32) -> (i32, i32, i32) {
    %c0_i32 = arith.constant 0 : i32
    %c0_i32_0 = arith.constant 0 : i32
    return %arg1, %arg0, %c0_i32 : i32, i32, i32
  }
  func.func @transform_1(%arg0: i32, %arg1: i32) -> (i32, i32) {
    %c0_i32 = arith.constant 0 : i32
    %c0_i32_0 = arith.constant 0 : i32
    %c0_i32_1 = arith.constant 0 : i32
    return %c0_i32, %c0_i32_0 : i32, i32
  }
  func.func @transform_2(%arg0: i32, %arg1: i32) -> (i32, i32) {
    %c0_i32 = arith.constant 0 : i32
    %c0_i32_0 = arith.constant 0 : i32
    %c0_i32_1 = arith.constant 0 : i32
    return %c0_i32, %c0_i32_0 : i32, i32
  }
  func.func @transform_3(%arg0: i32, %arg1: i32) -> (i32, i32) {
    %c0_i32 = arith.constant 0 : i32
    %c0_i32_0 = arith.constant 0 : i32
    %c0_i32_1 = arith.constant 0 : i32
    return %c0_i32, %c0_i32_0 : i32, i32
  }
  func.func @transform_4(%arg0: i32, %arg1: i32) -> (i32, i32) {
    %c0_i32 = arith.constant 0 : i32
    %c0_i32_0 = arith.constant 0 : i32
    %c0_i32_1 = arith.constant 0 : i32
    return %c0_i32, %c0_i32_0 : i32, i32
  }
  func.func @transform_5(%arg0: i32, %arg1: i32) -> (i32, i32) {
    %c0_i32 = arith.constant 0 : i32
    %c0_i32_0 = arith.constant 0 : i32
    %c0_i32_1 = arith.constant 0 : i32
    return %c0_i32, %c0_i32_0 : i32, i32
  }
  func.func @transform_6(%arg0: i32, %arg1: i32) -> (i32, i32) {
    %c0_i32 = arith.constant 0 : i32
    %c0_i32_0 = arith.constant 0 : i32
    return %arg0, %c0_i32 : i32, i32
  }
}

module attributes {stable_mosaic.version = 11 : i64} {
  func.func @_lstm_layer_kernel(%arg0: i32, %arg1: i32, %arg2: memref<8x8x128xf32, #tpu.memory_space<vmem>>, %arg3: memref<128x512xbf16, #tpu.memory_space<vmem>>, %arg4: memref<128x512xbf16, #tpu.memory_space<vmem>>, %arg5: memref<1x512xf32, #tpu.memory_space<vmem>>, %arg6: memref<8x8x128xf32, #tpu.memory_space<vmem>>, %arg7: memref<64x512xf32, #tpu.memory_space<vmem>>, %arg8: memref<8x128xf32, #tpu.memory_space<vmem>>, %arg9: memref<8x128xf32, #tpu.memory_space<vmem>>) attributes {dimension_semantics = [#tpu.dimension_semantics<parallel>, #tpu.dimension_semantics<arbitrary>], iteration_bounds = array<i64: 1, 1>, scalar_prefetch = 0 : i64, scratch_operands = 3 : i64, tpu.core_type = #tpu.core_type<tc>, window_params = [{transform_indices = @transform_0, window_bounds = array<i64: 8, 8, 128>}, {pipeline_mode = #tpu.pipeline_mode<synchronous>, transform_indices = @transform_1, window_bounds = array<i64: 128, 512>}, {pipeline_mode = #tpu.pipeline_mode<synchronous>, transform_indices = @transform_2, window_bounds = array<i64: 128, 512>}, {pipeline_mode = #tpu.pipeline_mode<synchronous>, transform_indices = @transform_3, window_bounds = array<i64: 1, 512>}, {transform_indices = @transform_4, window_bounds = array<i64: 8, 8, 128>}]} {
    %c0_i32 = arith.constant 0 : i32
    %0 = arith.cmpi eq, %arg1, %c0_i32 : i32
    %1 = arith.extui %0 : i1 to i32
    %c0_i32_0 = arith.constant 0 : i32
    %2 = arith.cmpi ne, %1, %c0_i32_0 : i32
    scf.if %2 {
      %cst_154 = arith.constant 0.000000e+00 : f32
      %340 = vector.broadcast %cst_154 : f32 to vector<8x128xf32>
      %c0_155 = arith.constant 0 : index
      %c0_156 = arith.constant 0 : index
      %341 = vector.load %arg8[%c0_155, %c0_156] : memref<8x128xf32, #tpu.memory_space<vmem>>, vector<8x128xf32>
      tpu.vector_store %arg8[%c0_155, %c0_156], %340 {strides = array<i32>} : memref<8x128xf32, #tpu.memory_space<vmem>>, vector<8x128xf32>,
      %cst_157 = arith.constant 0.000000e+00 : f32
      %342 = vector.broadcast %cst_157 : f32 to vector<8x128xf32>
      %c0_158 = arith.constant 0 : index
      %c0_159 = arith.constant 0 : index
      %343 = vector.load %arg9[%c0_158, %c0_159] : memref<8x128xf32, #tpu.memory_space<vmem>>, vector<8x128xf32>
      tpu.vector_store %arg9[%c0_158, %c0_159], %342 {strides = array<i32>} : memref<8x128xf32, #tpu.memory_space<vmem>>, vector<8x128xf32>,
    } else {
    }
    %c0 = arith.constant 0 : index
    %c0_1 = arith.constant 0 : index
    %c0_2 = arith.constant 0 : index
    %3 = vector.load %arg2[%c0, %c0_1, %c0_2] : memref<8x8x128xf32, #tpu.memory_space<vmem>>, vector<8x8x128xf32>
    %4 = vector.shape_cast %3 : vector<8x8x128xf32> to vector<64x128xf32>
    %5 = arith.truncf %4 : vector<64x128xf32> to vector<64x128xbf16>
    %c0_3 = arith.constant 0 : index
    %c0_4 = arith.constant 0 : index
    %6 = vector.load %arg3[%c0_3, %c0_4] : memref<128x512xbf16, #tpu.memory_space<vmem>>, vector<128x512xbf16>
    %cst = arith.constant dense<0.000000e+00> : vector<64x512xf32>
    %7 = tpu.matmul %5, %6, %cst {dimension_numbers = #tpu.dot_dimension_numbers<[1], [0], [0], [1], [0, 0, 1, 1], [], []>} : vector<64x128xbf16>, vector<128x512xbf16>, vector<64x512xf32> -> vector<64x512xf32>
    %c0_5 = arith.constant 0 : index
    %c0_6 = arith.constant 0 : index
    %8 = vector.load %arg5[%c0_5, %c0_6] : memref<1x512xf32, #tpu.memory_space<vmem>>, vector<1x512xf32>
    %9 = vector.broadcast %8 : vector<1x512xf32> to vector<64x512xf32>
    %10 = arith.addf %7, %9 : vector<64x512xf32>
    %c0_7 = arith.constant 0 : index
    %c0_8 = arith.constant 0 : index
    %11 = vector.load %arg7[%c0_7, %c0_8] : memref<64x512xf32, #tpu.memory_space<vmem>>, vector<64x512xf32>
    tpu.vector_store %arg7[%c0_7, %c0_8], %10 {strides = array<i32>} : memref<64x512xf32, #tpu.memory_space<vmem>>, vector<64x512xf32>,
    %c0_i32_9 = arith.constant 0 : i32
    %c0_10 = arith.constant 0 : index
    %c0_11 = arith.constant 0 : index
    %12 = vector.load %arg8[%c0_10, %c0_11] : memref<8x128xf32, #tpu.memory_space<vmem>>, vector<8x128xf32>
    %c0_12 = arith.constant 0 : index
    %c0_13 = arith.constant 0 : index
    %13 = vector.load %arg9[%c0_12, %c0_13] : memref<8x128xf32, #tpu.memory_space<vmem>>, vector<8x128xf32>
    %c8_i32 = arith.constant 8 : i32
    %14 = arith.muli %c0_i32_9, %c8_i32 : i32
    %15 = tpu.assume_multiple %14, 8 : i32
    %16 = arith.index_cast %15 : i32 to index
    %c0_14 = arith.constant 0 : index
    %17 = vector.load %arg7[%16, %c0_14] : memref<64x512xf32, #tpu.memory_space<vmem>>, vector<8x512xf32>
    %18 = arith.truncf %12 : vector<8x128xf32> to vector<8x128xbf16>
    %c0_15 = arith.constant 0 : index
    %c0_16 = arith.constant 0 : index
    %19 = vector.load %arg4[%c0_15, %c0_16] : memref<128x512xbf16, #tpu.memory_space<vmem>>, vector<128x512xbf16>
    %cst_17 = arith.constant dense<0.000000e+00> : vector<8x512xf32>
    %20 = tpu.matmul %18, %19, %cst_17 {dimension_numbers = #tpu.dot_dimension_numbers<[1], [0], [0], [1], [0, 0, 1, 1], [], []>} : vector<8x128xbf16>, vector<128x512xbf16>, vector<8x512xf32> -> vector<8x512xf32>
    %21 = arith.addf %17, %20 : vector<8x512xf32>
    %22 = vector.extract_strided_slice %21 {offsets = [0, 0], sizes = [8, 128], strides = [1, 1]} : vector<8x512xf32> to vector<8x128xf32>
    %23 = arith.negf %22 : vector<8x128xf32>
    %24 = math.exp %23 : vector<8x128xf32>
    %cst_18 = arith.constant 1.000000e+00 : f32
    %25 = vector.broadcast %cst_18 : f32 to vector<8x128xf32>
    %26 = arith.addf %25, %24 : vector<8x128xf32>
    %27 = arith.divf %25, %26 : vector<8x128xf32>
    %28 = vector.extract_strided_slice %21 {offsets = [0, 128], sizes = [8, 128], strides = [1, 1]} : vector<8x512xf32> to vector<8x128xf32>
    %29 = arith.negf %28 : vector<8x128xf32>
    %30 = math.exp %29 : vector<8x128xf32>
    %cst_19 = arith.constant 1.000000e+00 : f32
    %31 = vector.broadcast %cst_19 : f32 to vector<8x128xf32>
    %32 = arith.addf %31, %30 : vector<8x128xf32>
    %33 = arith.divf %31, %32 : vector<8x128xf32>
    %34 = vector.extract_strided_slice %21 {offsets = [0, 256], sizes = [8, 128], strides = [1, 1]} : vector<8x512xf32> to vector<8x128xf32>
    %35 = math.tanh %34 : vector<8x128xf32>
    %36 = vector.extract_strided_slice %21 {offsets = [0, 384], sizes = [8, 128], strides = [1, 1]} : vector<8x512xf32> to vector<8x128xf32>
    %37 = arith.negf %36 : vector<8x128xf32>
    %38 = math.exp %37 : vector<8x128xf32>
    %cst_20 = arith.constant 1.000000e+00 : f32
    %39 = vector.broadcast %cst_20 : f32 to vector<8x128xf32>
    %40 = arith.addf %39, %38 : vector<8x128xf32>
    %41 = arith.divf %39, %40 : vector<8x128xf32>
    %42 = arith.mulf %33, %13 : vector<8x128xf32>
    %43 = arith.mulf %27, %35 : vector<8x128xf32>
    %44 = arith.addf %42, %43 : vector<8x128xf32>
    %45 = math.tanh %44 : vector<8x128xf32>
    %46 = arith.mulf %41, %45 : vector<8x128xf32>
    %c0_21 = arith.constant 0 : index
    %c0_22 = arith.constant 0 : index
    %47 = vector.load %arg8[%c0_21, %c0_22] : memref<8x128xf32, #tpu.memory_space<vmem>>, vector<8x128xf32>
    tpu.vector_store %arg8[%c0_21, %c0_22], %46 {strides = array<i32>} : memref<8x128xf32, #tpu.memory_space<vmem>>, vector<8x128xf32>,
    %c0_23 = arith.constant 0 : index
    %c0_24 = arith.constant 0 : index
    %48 = vector.load %arg9[%c0_23, %c0_24] : memref<8x128xf32, #tpu.memory_space<vmem>>, vector<8x128xf32>
    tpu.vector_store %arg9[%c0_23, %c0_24], %44 {strides = array<i32>} : memref<8x128xf32, #tpu.memory_space<vmem>>, vector<8x128xf32>,
    %49 = arith.index_cast %c0_i32_9 : i32 to index
    %c0_25 = arith.constant 0 : index
    %c0_26 = arith.constant 0 : index
    %50 = vector.load %arg6[%49, %c0_25, %c0_26] : memref<8x8x128xf32, #tpu.memory_space<vmem>>, vector<1x8x128xf32>
    %51 = vector.shape_cast %50 : vector<1x8x128xf32> to vector<8x128xf32>
    %52 = vector.shape_cast %46 : vector<8x128xf32> to vector<1x8x128xf32>
    tpu.vector_store %arg6[%49, %c0_25, %c0_26], %52 {strides = array<i32>} : memref<8x8x128xf32, #tpu.memory_space<vmem>>, vector<1x8x128xf32>,
    %c1_i32 = arith.constant 1 : i32
    %c0_27 = arith.constant 0 : index
    %c0_28 = arith.constant 0 : index
    %53 = vector.load %arg8[%c0_27, %c0_28] : memref<8x128xf32, #tpu.memory_space<vmem>>, vector<8x128xf32>
    %c0_29 = arith.constant 0 : index
    %c0_30 = arith.constant 0 : index
    %54 = vector.load %arg9[%c0_29, %c0_30] : memref<8x128xf32, #tpu.memory_space<vmem>>, vector<8x128xf32>
    %c8_i32_31 = arith.constant 8 : i32
    %55 = arith.muli %c1_i32, %c8_i32_31 : i32
    %56 = tpu.assume_multiple %55, 8 : i32
    %57 = arith.index_cast %56 : i32 to index
    %c0_32 = arith.constant 0 : index
    %58 = vector.load %arg7[%57, %c0_32] : memref<64x512xf32, #tpu.memory_space<vmem>>, vector<8x512xf32>
    %59 = arith.truncf %53 : vector<8x128xf32> to vector<8x128xbf16>
    %c0_33 = arith.constant 0 : index
    %c0_34 = arith.constant 0 : index
    %60 = vector.load %arg4[%c0_33, %c0_34] : memref<128x512xbf16, #tpu.memory_space<vmem>>, vector<128x512xbf16>
    %cst_35 = arith.constant dense<0.000000e+00> : vector<8x512xf32>
    %61 = tpu.matmul %59, %60, %cst_35 {dimension_numbers = #tpu.dot_dimension_numbers<[1], [0], [0], [1], [0, 0, 1, 1], [], []>} : vector<8x128xbf16>, vector<128x512xbf16>, vector<8x512xf32> -> vector<8x512xf32>
    %62 = arith.addf %58, %61 : vector<8x512xf32>
    %63 = vector.extract_strided_slice %62 {offsets = [0, 0], sizes = [8, 128], strides = [1, 1]} : vector<8x512xf32> to vector<8x128xf32>
    %64 = arith.negf %63 : vector<8x128xf32>
    %65 = math.exp %64 : vector<8x128xf32>
    %cst_36 = arith.constant 1.000000e+00 : f32
    %66 = vector.broadcast %cst_36 : f32 to vector<8x128xf32>
    %67 = arith.addf %66, %65 : vector<8x128xf32>
    %68 = arith.divf %66, %67 : vector<8x128xf32>
    %69 = vector.extract_strided_slice %62 {offsets = [0, 128], sizes = [8, 128], strides = [1, 1]} : vector<8x512xf32> to vector<8x128xf32>
    %70 = arith.negf %69 : vector<8x128xf32>
    %71 = math.exp %70 : vector<8x128xf32>
    %cst_37 = arith.constant 1.000000e+00 : f32
    %72 = vector.broadcast %cst_37 : f32 to vector<8x128xf32>
    %73 = arith.addf %72, %71 : vector<8x128xf32>
    %74 = arith.divf %72, %73 : vector<8x128xf32>
    %75 = vector.extract_strided_slice %62 {offsets = [0, 256], sizes = [8, 128], strides = [1, 1]} : vector<8x512xf32> to vector<8x128xf32>
    %76 = math.tanh %75 : vector<8x128xf32>
    %77 = vector.extract_strided_slice %62 {offsets = [0, 384], sizes = [8, 128], strides = [1, 1]} : vector<8x512xf32> to vector<8x128xf32>
    %78 = arith.negf %77 : vector<8x128xf32>
    %79 = math.exp %78 : vector<8x128xf32>
    %cst_38 = arith.constant 1.000000e+00 : f32
    %80 = vector.broadcast %cst_38 : f32 to vector<8x128xf32>
    %81 = arith.addf %80, %79 : vector<8x128xf32>
    %82 = arith.divf %80, %81 : vector<8x128xf32>
    %83 = arith.mulf %74, %54 : vector<8x128xf32>
    %84 = arith.mulf %68, %76 : vector<8x128xf32>
    %85 = arith.addf %83, %84 : vector<8x128xf32>
    %86 = math.tanh %85 : vector<8x128xf32>
    %87 = arith.mulf %82, %86 : vector<8x128xf32>
    %c0_39 = arith.constant 0 : index
    %c0_40 = arith.constant 0 : index
    %88 = vector.load %arg8[%c0_39, %c0_40] : memref<8x128xf32, #tpu.memory_space<vmem>>, vector<8x128xf32>
    tpu.vector_store %arg8[%c0_39, %c0_40], %87 {strides = array<i32>} : memref<8x128xf32, #tpu.memory_space<vmem>>, vector<8x128xf32>,
    %c0_41 = arith.constant 0 : index
    %c0_42 = arith.constant 0 : index
    %89 = vector.load %arg9[%c0_41, %c0_42] : memref<8x128xf32, #tpu.memory_space<vmem>>, vector<8x128xf32>
    tpu.vector_store %arg9[%c0_41, %c0_42], %85 {strides = array<i32>} : memref<8x128xf32, #tpu.memory_space<vmem>>, vector<8x128xf32>,
    %90 = arith.index_cast %c1_i32 : i32 to index
    %c0_43 = arith.constant 0 : index
    %c0_44 = arith.constant 0 : index
    %91 = vector.load %arg6[%90, %c0_43, %c0_44] : memref<8x8x128xf32, #tpu.memory_space<vmem>>, vector<1x8x128xf32>
    %92 = vector.shape_cast %91 : vector<1x8x128xf32> to vector<8x128xf32>
    %93 = vector.shape_cast %87 : vector<8x128xf32> to vector<1x8x128xf32>
    tpu.vector_store %arg6[%90, %c0_43, %c0_44], %93 {strides = array<i32>} : memref<8x8x128xf32, #tpu.memory_space<vmem>>, vector<1x8x128xf32>,
    %c2_i32 = arith.constant 2 : i32
    %c0_45 = arith.constant 0 : index
    %c0_46 = arith.constant 0 : index
    %94 = vector.load %arg8[%c0_45, %c0_46] : memref<8x128xf32, #tpu.memory_space<vmem>>, vector<8x128xf32>
    %c0_47 = arith.constant 0 : index
    %c0_48 = arith.constant 0 : index
    %95 = vector.load %arg9[%c0_47, %c0_48] : memref<8x128xf32, #tpu.memory_space<vmem>>, vector<8x128xf32>
    %c8_i32_49 = arith.constant 8 : i32
    %96 = arith.muli %c2_i32, %c8_i32_49 : i32
    %97 = tpu.assume_multiple %96, 8 : i32
    %98 = arith.index_cast %97 : i32 to index
    %c0_50 = arith.constant 0 : index
    %99 = vector.load %arg7[%98, %c0_50] : memref<64x512xf32, #tpu.memory_space<vmem>>, vector<8x512xf32>
    %100 = arith.truncf %94 : vector<8x128xf32> to vector<8x128xbf16>
    %c0_51 = arith.constant 0 : index
    %c0_52 = arith.constant 0 : index
    %101 = vector.load %arg4[%c0_51, %c0_52] : memref<128x512xbf16, #tpu.memory_space<vmem>>, vector<128x512xbf16>
    %cst_53 = arith.constant dense<0.000000e+00> : vector<8x512xf32>
    %102 = tpu.matmul %100, %101, %cst_53 {dimension_numbers = #tpu.dot_dimension_numbers<[1], [0], [0], [1], [0, 0, 1, 1], [], []>} : vector<8x128xbf16>, vector<128x512xbf16>, vector<8x512xf32> -> vector<8x512xf32>
    %103 = arith.addf %99, %102 : vector<8x512xf32>
    %104 = vector.extract_strided_slice %103 {offsets = [0, 0], sizes = [8, 128], strides = [1, 1]} : vector<8x512xf32> to vector<8x128xf32>
    %105 = arith.negf %104 : vector<8x128xf32>
    %106 = math.exp %105 : vector<8x128xf32>
    %cst_54 = arith.constant 1.000000e+00 : f32
    %107 = vector.broadcast %cst_54 : f32 to vector<8x128xf32>
    %108 = arith.addf %107, %106 : vector<8x128xf32>
    %109 = arith.divf %107, %108 : vector<8x128xf32>
    %110 = vector.extract_strided_slice %103 {offsets = [0, 128], sizes = [8, 128], strides = [1, 1]} : vector<8x512xf32> to vector<8x128xf32>
    %111 = arith.negf %110 : vector<8x128xf32>
    %112 = math.exp %111 : vector<8x128xf32>
    %cst_55 = arith.constant 1.000000e+00 : f32
    %113 = vector.broadcast %cst_55 : f32 to vector<8x128xf32>
    %114 = arith.addf %113, %112 : vector<8x128xf32>
    %115 = arith.divf %113, %114 : vector<8x128xf32>
    %116 = vector.extract_strided_slice %103 {offsets = [0, 256], sizes = [8, 128], strides = [1, 1]} : vector<8x512xf32> to vector<8x128xf32>
    %117 = math.tanh %116 : vector<8x128xf32>
    %118 = vector.extract_strided_slice %103 {offsets = [0, 384], sizes = [8, 128], strides = [1, 1]} : vector<8x512xf32> to vector<8x128xf32>
    %119 = arith.negf %118 : vector<8x128xf32>
    %120 = math.exp %119 : vector<8x128xf32>
    %cst_56 = arith.constant 1.000000e+00 : f32
    %121 = vector.broadcast %cst_56 : f32 to vector<8x128xf32>
    %122 = arith.addf %121, %120 : vector<8x128xf32>
    %123 = arith.divf %121, %122 : vector<8x128xf32>
    %124 = arith.mulf %115, %95 : vector<8x128xf32>
    %125 = arith.mulf %109, %117 : vector<8x128xf32>
    %126 = arith.addf %124, %125 : vector<8x128xf32>
    %127 = math.tanh %126 : vector<8x128xf32>
    %128 = arith.mulf %123, %127 : vector<8x128xf32>
    %c0_57 = arith.constant 0 : index
    %c0_58 = arith.constant 0 : index
    %129 = vector.load %arg8[%c0_57, %c0_58] : memref<8x128xf32, #tpu.memory_space<vmem>>, vector<8x128xf32>
    tpu.vector_store %arg8[%c0_57, %c0_58], %128 {strides = array<i32>} : memref<8x128xf32, #tpu.memory_space<vmem>>, vector<8x128xf32>,
    %c0_59 = arith.constant 0 : index
    %c0_60 = arith.constant 0 : index
    %130 = vector.load %arg9[%c0_59, %c0_60] : memref<8x128xf32, #tpu.memory_space<vmem>>, vector<8x128xf32>
    tpu.vector_store %arg9[%c0_59, %c0_60], %126 {strides = array<i32>} : memref<8x128xf32, #tpu.memory_space<vmem>>, vector<8x128xf32>,
    %131 = arith.index_cast %c2_i32 : i32 to index
    %c0_61 = arith.constant 0 : index
    %c0_62 = arith.constant 0 : index
    %132 = vector.load %arg6[%131, %c0_61, %c0_62] : memref<8x8x128xf32, #tpu.memory_space<vmem>>, vector<1x8x128xf32>
    %133 = vector.shape_cast %132 : vector<1x8x128xf32> to vector<8x128xf32>
    %134 = vector.shape_cast %128 : vector<8x128xf32> to vector<1x8x128xf32>
    tpu.vector_store %arg6[%131, %c0_61, %c0_62], %134 {strides = array<i32>} : memref<8x8x128xf32, #tpu.memory_space<vmem>>, vector<1x8x128xf32>,
    %c3_i32 = arith.constant 3 : i32
    %c0_63 = arith.constant 0 : index
    %c0_64 = arith.constant 0 : index
    %135 = vector.load %arg8[%c0_63, %c0_64] : memref<8x128xf32, #tpu.memory_space<vmem>>, vector<8x128xf32>
    %c0_65 = arith.constant 0 : index
    %c0_66 = arith.constant 0 : index
    %136 = vector.load %arg9[%c0_65, %c0_66] : memref<8x128xf32, #tpu.memory_space<vmem>>, vector<8x128xf32>
    %c8_i32_67 = arith.constant 8 : i32
    %137 = arith.muli %c3_i32, %c8_i32_67 : i32
    %138 = tpu.assume_multiple %137, 8 : i32
    %139 = arith.index_cast %138 : i32 to index
    %c0_68 = arith.constant 0 : index
    %140 = vector.load %arg7[%139, %c0_68] : memref<64x512xf32, #tpu.memory_space<vmem>>, vector<8x512xf32>
    %141 = arith.truncf %135 : vector<8x128xf32> to vector<8x128xbf16>
    %c0_69 = arith.constant 0 : index
    %c0_70 = arith.constant 0 : index
    %142 = vector.load %arg4[%c0_69, %c0_70] : memref<128x512xbf16, #tpu.memory_space<vmem>>, vector<128x512xbf16>
    %cst_71 = arith.constant dense<0.000000e+00> : vector<8x512xf32>
    %143 = tpu.matmul %141, %142, %cst_71 {dimension_numbers = #tpu.dot_dimension_numbers<[1], [0], [0], [1], [0, 0, 1, 1], [], []>} : vector<8x128xbf16>, vector<128x512xbf16>, vector<8x512xf32> -> vector<8x512xf32>
    %144 = arith.addf %140, %143 : vector<8x512xf32>
    %145 = vector.extract_strided_slice %144 {offsets = [0, 0], sizes = [8, 128], strides = [1, 1]} : vector<8x512xf32> to vector<8x128xf32>
    %146 = arith.negf %145 : vector<8x128xf32>
    %147 = math.exp %146 : vector<8x128xf32>
    %cst_72 = arith.constant 1.000000e+00 : f32
    %148 = vector.broadcast %cst_72 : f32 to vector<8x128xf32>
    %149 = arith.addf %148, %147 : vector<8x128xf32>
    %150 = arith.divf %148, %149 : vector<8x128xf32>
    %151 = vector.extract_strided_slice %144 {offsets = [0, 128], sizes = [8, 128], strides = [1, 1]} : vector<8x512xf32> to vector<8x128xf32>
    %152 = arith.negf %151 : vector<8x128xf32>
    %153 = math.exp %152 : vector<8x128xf32>
    %cst_73 = arith.constant 1.000000e+00 : f32
    %154 = vector.broadcast %cst_73 : f32 to vector<8x128xf32>
    %155 = arith.addf %154, %153 : vector<8x128xf32>
    %156 = arith.divf %154, %155 : vector<8x128xf32>
    %157 = vector.extract_strided_slice %144 {offsets = [0, 256], sizes = [8, 128], strides = [1, 1]} : vector<8x512xf32> to vector<8x128xf32>
    %158 = math.tanh %157 : vector<8x128xf32>
    %159 = vector.extract_strided_slice %144 {offsets = [0, 384], sizes = [8, 128], strides = [1, 1]} : vector<8x512xf32> to vector<8x128xf32>
    %160 = arith.negf %159 : vector<8x128xf32>
    %161 = math.exp %160 : vector<8x128xf32>
    %cst_74 = arith.constant 1.000000e+00 : f32
    %162 = vector.broadcast %cst_74 : f32 to vector<8x128xf32>
    %163 = arith.addf %162, %161 : vector<8x128xf32>
    %164 = arith.divf %162, %163 : vector<8x128xf32>
    %165 = arith.mulf %156, %136 : vector<8x128xf32>
    %166 = arith.mulf %150, %158 : vector<8x128xf32>
    %167 = arith.addf %165, %166 : vector<8x128xf32>
    %168 = math.tanh %167 : vector<8x128xf32>
    %169 = arith.mulf %164, %168 : vector<8x128xf32>
    %c0_75 = arith.constant 0 : index
    %c0_76 = arith.constant 0 : index
    %170 = vector.load %arg8[%c0_75, %c0_76] : memref<8x128xf32, #tpu.memory_space<vmem>>, vector<8x128xf32>
    tpu.vector_store %arg8[%c0_75, %c0_76], %169 {strides = array<i32>} : memref<8x128xf32, #tpu.memory_space<vmem>>, vector<8x128xf32>,
    %c0_77 = arith.constant 0 : index
    %c0_78 = arith.constant 0 : index
    %171 = vector.load %arg9[%c0_77, %c0_78] : memref<8x128xf32, #tpu.memory_space<vmem>>, vector<8x128xf32>
    tpu.vector_store %arg9[%c0_77, %c0_78], %167 {strides = array<i32>} : memref<8x128xf32, #tpu.memory_space<vmem>>, vector<8x128xf32>,
    %172 = arith.index_cast %c3_i32 : i32 to index
    %c0_79 = arith.constant 0 : index
    %c0_80 = arith.constant 0 : index
    %173 = vector.load %arg6[%172, %c0_79, %c0_80] : memref<8x8x128xf32, #tpu.memory_space<vmem>>, vector<1x8x128xf32>
    %174 = vector.shape_cast %173 : vector<1x8x128xf32> to vector<8x128xf32>
    %175 = vector.shape_cast %169 : vector<8x128xf32> to vector<1x8x128xf32>
    tpu.vector_store %arg6[%172, %c0_79, %c0_80], %175 {strides = array<i32>} : memref<8x8x128xf32, #tpu.memory_space<vmem>>, vector<1x8x128xf32>,
    %c4_i32 = arith.constant 4 : i32
    %c0_81 = arith.constant 0 : index
    %c0_82 = arith.constant 0 : index
    %176 = vector.load %arg8[%c0_81, %c0_82] : memref<8x128xf32, #tpu.memory_space<vmem>>, vector<8x128xf32>
    %c0_83 = arith.constant 0 : index
    %c0_84 = arith.constant 0 : index
    %177 = vector.load %arg9[%c0_83, %c0_84] : memref<8x128xf32, #tpu.memory_space<vmem>>, vector<8x128xf32>
    %c8_i32_85 = arith.constant 8 : i32
    %178 = arith.muli %c4_i32, %c8_i32_85 : i32
    %179 = tpu.assume_multiple %178, 8 : i32
    %180 = arith.index_cast %179 : i32 to index
    %c0_86 = arith.constant 0 : index
    %181 = vector.load %arg7[%180, %c0_86] : memref<64x512xf32, #tpu.memory_space<vmem>>, vector<8x512xf32>
    %182 = arith.truncf %176 : vector<8x128xf32> to vector<8x128xbf16>
    %c0_87 = arith.constant 0 : index
    %c0_88 = arith.constant 0 : index
    %183 = vector.load %arg4[%c0_87, %c0_88] : memref<128x512xbf16, #tpu.memory_space<vmem>>, vector<128x512xbf16>
    %cst_89 = arith.constant dense<0.000000e+00> : vector<8x512xf32>
    %184 = tpu.matmul %182, %183, %cst_89 {dimension_numbers = #tpu.dot_dimension_numbers<[1], [0], [0], [1], [0, 0, 1, 1], [], []>} : vector<8x128xbf16>, vector<128x512xbf16>, vector<8x512xf32> -> vector<8x512xf32>
    %185 = arith.addf %181, %184 : vector<8x512xf32>
    %186 = vector.extract_strided_slice %185 {offsets = [0, 0], sizes = [8, 128], strides = [1, 1]} : vector<8x512xf32> to vector<8x128xf32>
    %187 = arith.negf %186 : vector<8x128xf32>
    %188 = math.exp %187 : vector<8x128xf32>
    %cst_90 = arith.constant 1.000000e+00 : f32
    %189 = vector.broadcast %cst_90 : f32 to vector<8x128xf32>
    %190 = arith.addf %189, %188 : vector<8x128xf32>
    %191 = arith.divf %189, %190 : vector<8x128xf32>
    %192 = vector.extract_strided_slice %185 {offsets = [0, 128], sizes = [8, 128], strides = [1, 1]} : vector<8x512xf32> to vector<8x128xf32>
    %193 = arith.negf %192 : vector<8x128xf32>
    %194 = math.exp %193 : vector<8x128xf32>
    %cst_91 = arith.constant 1.000000e+00 : f32
    %195 = vector.broadcast %cst_91 : f32 to vector<8x128xf32>
    %196 = arith.addf %195, %194 : vector<8x128xf32>
    %197 = arith.divf %195, %196 : vector<8x128xf32>
    %198 = vector.extract_strided_slice %185 {offsets = [0, 256], sizes = [8, 128], strides = [1, 1]} : vector<8x512xf32> to vector<8x128xf32>
    %199 = math.tanh %198 : vector<8x128xf32>
    %200 = vector.extract_strided_slice %185 {offsets = [0, 384], sizes = [8, 128], strides = [1, 1]} : vector<8x512xf32> to vector<8x128xf32>
    %201 = arith.negf %200 : vector<8x128xf32>
    %202 = math.exp %201 : vector<8x128xf32>
    %cst_92 = arith.constant 1.000000e+00 : f32
    %203 = vector.broadcast %cst_92 : f32 to vector<8x128xf32>
    %204 = arith.addf %203, %202 : vector<8x128xf32>
    %205 = arith.divf %203, %204 : vector<8x128xf32>
    %206 = arith.mulf %197, %177 : vector<8x128xf32>
    %207 = arith.mulf %191, %199 : vector<8x128xf32>
    %208 = arith.addf %206, %207 : vector<8x128xf32>
    %209 = math.tanh %208 : vector<8x128xf32>
    %210 = arith.mulf %205, %209 : vector<8x128xf32>
    %c0_93 = arith.constant 0 : index
    %c0_94 = arith.constant 0 : index
    %211 = vector.load %arg8[%c0_93, %c0_94] : memref<8x128xf32, #tpu.memory_space<vmem>>, vector<8x128xf32>
    tpu.vector_store %arg8[%c0_93, %c0_94], %210 {strides = array<i32>} : memref<8x128xf32, #tpu.memory_space<vmem>>, vector<8x128xf32>,
    %c0_95 = arith.constant 0 : index
    %c0_96 = arith.constant 0 : index
    %212 = vector.load %arg9[%c0_95, %c0_96] : memref<8x128xf32, #tpu.memory_space<vmem>>, vector<8x128xf32>
    tpu.vector_store %arg9[%c0_95, %c0_96], %208 {strides = array<i32>} : memref<8x128xf32, #tpu.memory_space<vmem>>, vector<8x128xf32>,
    %213 = arith.index_cast %c4_i32 : i32 to index
    %c0_97 = arith.constant 0 : index
    %c0_98 = arith.constant 0 : index
    %214 = vector.load %arg6[%213, %c0_97, %c0_98] : memref<8x8x128xf32, #tpu.memory_space<vmem>>, vector<1x8x128xf32>
    %215 = vector.shape_cast %214 : vector<1x8x128xf32> to vector<8x128xf32>
    %216 = vector.shape_cast %210 : vector<8x128xf32> to vector<1x8x128xf32>
    tpu.vector_store %arg6[%213, %c0_97, %c0_98], %216 {strides = array<i32>} : memref<8x8x128xf32, #tpu.memory_space<vmem>>, vector<1x8x128xf32>,
    %c5_i32 = arith.constant 5 : i32
    %c0_99 = arith.constant 0 : index
    %c0_100 = arith.constant 0 : index
    %217 = vector.load %arg8[%c0_99, %c0_100] : memref<8x128xf32, #tpu.memory_space<vmem>>, vector<8x128xf32>
    %c0_101 = arith.constant 0 : index
    %c0_102 = arith.constant 0 : index
    %218 = vector.load %arg9[%c0_101, %c0_102] : memref<8x128xf32, #tpu.memory_space<vmem>>, vector<8x128xf32>
    %c8_i32_103 = arith.constant 8 : i32
    %219 = arith.muli %c5_i32, %c8_i32_103 : i32
    %220 = tpu.assume_multiple %219, 8 : i32
    %221 = arith.index_cast %220 : i32 to index
    %c0_104 = arith.constant 0 : index
    %222 = vector.load %arg7[%221, %c0_104] : memref<64x512xf32, #tpu.memory_space<vmem>>, vector<8x512xf32>
    %223 = arith.truncf %217 : vector<8x128xf32> to vector<8x128xbf16>
    %c0_105 = arith.constant 0 : index
    %c0_106 = arith.constant 0 : index
    %224 = vector.load %arg4[%c0_105, %c0_106] : memref<128x512xbf16, #tpu.memory_space<vmem>>, vector<128x512xbf16>
    %cst_107 = arith.constant dense<0.000000e+00> : vector<8x512xf32>
    %225 = tpu.matmul %223, %224, %cst_107 {dimension_numbers = #tpu.dot_dimension_numbers<[1], [0], [0], [1], [0, 0, 1, 1], [], []>} : vector<8x128xbf16>, vector<128x512xbf16>, vector<8x512xf32> -> vector<8x512xf32>
    %226 = arith.addf %222, %225 : vector<8x512xf32>
    %227 = vector.extract_strided_slice %226 {offsets = [0, 0], sizes = [8, 128], strides = [1, 1]} : vector<8x512xf32> to vector<8x128xf32>
    %228 = arith.negf %227 : vector<8x128xf32>
    %229 = math.exp %228 : vector<8x128xf32>
    %cst_108 = arith.constant 1.000000e+00 : f32
    %230 = vector.broadcast %cst_108 : f32 to vector<8x128xf32>
    %231 = arith.addf %230, %229 : vector<8x128xf32>
    %232 = arith.divf %230, %231 : vector<8x128xf32>
    %233 = vector.extract_strided_slice %226 {offsets = [0, 128], sizes = [8, 128], strides = [1, 1]} : vector<8x512xf32> to vector<8x128xf32>
    %234 = arith.negf %233 : vector<8x128xf32>
    %235 = math.exp %234 : vector<8x128xf32>
    %cst_109 = arith.constant 1.000000e+00 : f32
    %236 = vector.broadcast %cst_109 : f32 to vector<8x128xf32>
    %237 = arith.addf %236, %235 : vector<8x128xf32>
    %238 = arith.divf %236, %237 : vector<8x128xf32>
    %239 = vector.extract_strided_slice %226 {offsets = [0, 256], sizes = [8, 128], strides = [1, 1]} : vector<8x512xf32> to vector<8x128xf32>
    %240 = math.tanh %239 : vector<8x128xf32>
    %241 = vector.extract_strided_slice %226 {offsets = [0, 384], sizes = [8, 128], strides = [1, 1]} : vector<8x512xf32> to vector<8x128xf32>
    %242 = arith.negf %241 : vector<8x128xf32>
    %243 = math.exp %242 : vector<8x128xf32>
    %cst_110 = arith.constant 1.000000e+00 : f32
    %244 = vector.broadcast %cst_110 : f32 to vector<8x128xf32>
    %245 = arith.addf %244, %243 : vector<8x128xf32>
    %246 = arith.divf %244, %245 : vector<8x128xf32>
    %247 = arith.mulf %238, %218 : vector<8x128xf32>
    %248 = arith.mulf %232, %240 : vector<8x128xf32>
    %249 = arith.addf %247, %248 : vector<8x128xf32>
    %250 = math.tanh %249 : vector<8x128xf32>
    %251 = arith.mulf %246, %250 : vector<8x128xf32>
    %c0_111 = arith.constant 0 : index
    %c0_112 = arith.constant 0 : index
    %252 = vector.load %arg8[%c0_111, %c0_112] : memref<8x128xf32, #tpu.memory_space<vmem>>, vector<8x128xf32>
    tpu.vector_store %arg8[%c0_111, %c0_112], %251 {strides = array<i32>} : memref<8x128xf32, #tpu.memory_space<vmem>>, vector<8x128xf32>,
    %c0_113 = arith.constant 0 : index
    %c0_114 = arith.constant 0 : index
    %253 = vector.load %arg9[%c0_113, %c0_114] : memref<8x128xf32, #tpu.memory_space<vmem>>, vector<8x128xf32>
    tpu.vector_store %arg9[%c0_113, %c0_114], %249 {strides = array<i32>} : memref<8x128xf32, #tpu.memory_space<vmem>>, vector<8x128xf32>,
    %254 = arith.index_cast %c5_i32 : i32 to index
    %c0_115 = arith.constant 0 : index
    %c0_116 = arith.constant 0 : index
    %255 = vector.load %arg6[%254, %c0_115, %c0_116] : memref<8x8x128xf32, #tpu.memory_space<vmem>>, vector<1x8x128xf32>
    %256 = vector.shape_cast %255 : vector<1x8x128xf32> to vector<8x128xf32>
    %257 = vector.shape_cast %251 : vector<8x128xf32> to vector<1x8x128xf32>
    tpu.vector_store %arg6[%254, %c0_115, %c0_116], %257 {strides = array<i32>} : memref<8x8x128xf32, #tpu.memory_space<vmem>>, vector<1x8x128xf32>,
    %c6_i32 = arith.constant 6 : i32
    %c0_117 = arith.constant 0 : index
    %c0_118 = arith.constant 0 : index
    %258 = vector.load %arg8[%c0_117, %c0_118] : memref<8x128xf32, #tpu.memory_space<vmem>>, vector<8x128xf32>
    %c0_119 = arith.constant 0 : index
    %c0_120 = arith.constant 0 : index
    %259 = vector.load %arg9[%c0_119, %c0_120] : memref<8x128xf32, #tpu.memory_space<vmem>>, vector<8x128xf32>
    %c8_i32_121 = arith.constant 8 : i32
    %260 = arith.muli %c6_i32, %c8_i32_121 : i32
    %261 = tpu.assume_multiple %260, 8 : i32
    %262 = arith.index_cast %261 : i32 to index
    %c0_122 = arith.constant 0 : index
    %263 = vector.load %arg7[%262, %c0_122] : memref<64x512xf32, #tpu.memory_space<vmem>>, vector<8x512xf32>
    %264 = arith.truncf %258 : vector<8x128xf32> to vector<8x128xbf16>
    %c0_123 = arith.constant 0 : index
    %c0_124 = arith.constant 0 : index
    %265 = vector.load %arg4[%c0_123, %c0_124] : memref<128x512xbf16, #tpu.memory_space<vmem>>, vector<128x512xbf16>
    %cst_125 = arith.constant dense<0.000000e+00> : vector<8x512xf32>
    %266 = tpu.matmul %264, %265, %cst_125 {dimension_numbers = #tpu.dot_dimension_numbers<[1], [0], [0], [1], [0, 0, 1, 1], [], []>} : vector<8x128xbf16>, vector<128x512xbf16>, vector<8x512xf32> -> vector<8x512xf32>
    %267 = arith.addf %263, %266 : vector<8x512xf32>
    %268 = vector.extract_strided_slice %267 {offsets = [0, 0], sizes = [8, 128], strides = [1, 1]} : vector<8x512xf32> to vector<8x128xf32>
    %269 = arith.negf %268 : vector<8x128xf32>
    %270 = math.exp %269 : vector<8x128xf32>
    %cst_126 = arith.constant 1.000000e+00 : f32
    %271 = vector.broadcast %cst_126 : f32 to vector<8x128xf32>
    %272 = arith.addf %271, %270 : vector<8x128xf32>
    %273 = arith.divf %271, %272 : vector<8x128xf32>
    %274 = vector.extract_strided_slice %267 {offsets = [0, 128], sizes = [8, 128], strides = [1, 1]} : vector<8x512xf32> to vector<8x128xf32>
    %275 = arith.negf %274 : vector<8x128xf32>
    %276 = math.exp %275 : vector<8x128xf32>
    %cst_127 = arith.constant 1.000000e+00 : f32
    %277 = vector.broadcast %cst_127 : f32 to vector<8x128xf32>
    %278 = arith.addf %277, %276 : vector<8x128xf32>
    %279 = arith.divf %277, %278 : vector<8x128xf32>
    %280 = vector.extract_strided_slice %267 {offsets = [0, 256], sizes = [8, 128], strides = [1, 1]} : vector<8x512xf32> to vector<8x128xf32>
    %281 = math.tanh %280 : vector<8x128xf32>
    %282 = vector.extract_strided_slice %267 {offsets = [0, 384], sizes = [8, 128], strides = [1, 1]} : vector<8x512xf32> to vector<8x128xf32>
    %283 = arith.negf %282 : vector<8x128xf32>
    %284 = math.exp %283 : vector<8x128xf32>
    %cst_128 = arith.constant 1.000000e+00 : f32
    %285 = vector.broadcast %cst_128 : f32 to vector<8x128xf32>
    %286 = arith.addf %285, %284 : vector<8x128xf32>
    %287 = arith.divf %285, %286 : vector<8x128xf32>
    %288 = arith.mulf %279, %259 : vector<8x128xf32>
    %289 = arith.mulf %273, %281 : vector<8x128xf32>
    %290 = arith.addf %288, %289 : vector<8x128xf32>
    %291 = math.tanh %290 : vector<8x128xf32>
    %292 = arith.mulf %287, %291 : vector<8x128xf32>
    %c0_129 = arith.constant 0 : index
    %c0_130 = arith.constant 0 : index
    %293 = vector.load %arg8[%c0_129, %c0_130] : memref<8x128xf32, #tpu.memory_space<vmem>>, vector<8x128xf32>
    tpu.vector_store %arg8[%c0_129, %c0_130], %292 {strides = array<i32>} : memref<8x128xf32, #tpu.memory_space<vmem>>, vector<8x128xf32>,
    %c0_131 = arith.constant 0 : index
    %c0_132 = arith.constant 0 : index
    %294 = vector.load %arg9[%c0_131, %c0_132] : memref<8x128xf32, #tpu.memory_space<vmem>>, vector<8x128xf32>
    tpu.vector_store %arg9[%c0_131, %c0_132], %290 {strides = array<i32>} : memref<8x128xf32, #tpu.memory_space<vmem>>, vector<8x128xf32>,
    %295 = arith.index_cast %c6_i32 : i32 to index
    %c0_133 = arith.constant 0 : index
    %c0_134 = arith.constant 0 : index
    %296 = vector.load %arg6[%295, %c0_133, %c0_134] : memref<8x8x128xf32, #tpu.memory_space<vmem>>, vector<1x8x128xf32>
    %297 = vector.shape_cast %296 : vector<1x8x128xf32> to vector<8x128xf32>
    %298 = vector.shape_cast %292 : vector<8x128xf32> to vector<1x8x128xf32>
    tpu.vector_store %arg6[%295, %c0_133, %c0_134], %298 {strides = array<i32>} : memref<8x8x128xf32, #tpu.memory_space<vmem>>, vector<1x8x128xf32>,
    %c7_i32 = arith.constant 7 : i32
    %c0_135 = arith.constant 0 : index
    %c0_136 = arith.constant 0 : index
    %299 = vector.load %arg8[%c0_135, %c0_136] : memref<8x128xf32, #tpu.memory_space<vmem>>, vector<8x128xf32>
    %c0_137 = arith.constant 0 : index
    %c0_138 = arith.constant 0 : index
    %300 = vector.load %arg9[%c0_137, %c0_138] : memref<8x128xf32, #tpu.memory_space<vmem>>, vector<8x128xf32>
    %c8_i32_139 = arith.constant 8 : i32
    %301 = arith.muli %c7_i32, %c8_i32_139 : i32
    %302 = tpu.assume_multiple %301, 8 : i32
    %303 = arith.index_cast %302 : i32 to index
    %c0_140 = arith.constant 0 : index
    %304 = vector.load %arg7[%303, %c0_140] : memref<64x512xf32, #tpu.memory_space<vmem>>, vector<8x512xf32>
    %305 = arith.truncf %299 : vector<8x128xf32> to vector<8x128xbf16>
    %c0_141 = arith.constant 0 : index
    %c0_142 = arith.constant 0 : index
    %306 = vector.load %arg4[%c0_141, %c0_142] : memref<128x512xbf16, #tpu.memory_space<vmem>>, vector<128x512xbf16>
    %cst_143 = arith.constant dense<0.000000e+00> : vector<8x512xf32>
    %307 = tpu.matmul %305, %306, %cst_143 {dimension_numbers = #tpu.dot_dimension_numbers<[1], [0], [0], [1], [0, 0, 1, 1], [], []>} : vector<8x128xbf16>, vector<128x512xbf16>, vector<8x512xf32> -> vector<8x512xf32>
    %308 = arith.addf %304, %307 : vector<8x512xf32>
    %309 = vector.extract_strided_slice %308 {offsets = [0, 0], sizes = [8, 128], strides = [1, 1]} : vector<8x512xf32> to vector<8x128xf32>
    %310 = arith.negf %309 : vector<8x128xf32>
    %311 = math.exp %310 : vector<8x128xf32>
    %cst_144 = arith.constant 1.000000e+00 : f32
    %312 = vector.broadcast %cst_144 : f32 to vector<8x128xf32>
    %313 = arith.addf %312, %311 : vector<8x128xf32>
    %314 = arith.divf %312, %313 : vector<8x128xf32>
    %315 = vector.extract_strided_slice %308 {offsets = [0, 128], sizes = [8, 128], strides = [1, 1]} : vector<8x512xf32> to vector<8x128xf32>
    %316 = arith.negf %315 : vector<8x128xf32>
    %317 = math.exp %316 : vector<8x128xf32>
    %cst_145 = arith.constant 1.000000e+00 : f32
    %318 = vector.broadcast %cst_145 : f32 to vector<8x128xf32>
    %319 = arith.addf %318, %317 : vector<8x128xf32>
    %320 = arith.divf %318, %319 : vector<8x128xf32>
    %321 = vector.extract_strided_slice %308 {offsets = [0, 256], sizes = [8, 128], strides = [1, 1]} : vector<8x512xf32> to vector<8x128xf32>
    %322 = math.tanh %321 : vector<8x128xf32>
    %323 = vector.extract_strided_slice %308 {offsets = [0, 384], sizes = [8, 128], strides = [1, 1]} : vector<8x512xf32> to vector<8x128xf32>
    %324 = arith.negf %323 : vector<8x128xf32>
    %325 = math.exp %324 : vector<8x128xf32>
    %cst_146 = arith.constant 1.000000e+00 : f32
    %326 = vector.broadcast %cst_146 : f32 to vector<8x128xf32>
    %327 = arith.addf %326, %325 : vector<8x128xf32>
    %328 = arith.divf %326, %327 : vector<8x128xf32>
    %329 = arith.mulf %320, %300 : vector<8x128xf32>
    %330 = arith.mulf %314, %322 : vector<8x128xf32>
    %331 = arith.addf %329, %330 : vector<8x128xf32>
    %332 = math.tanh %331 : vector<8x128xf32>
    %333 = arith.mulf %328, %332 : vector<8x128xf32>
    %c0_147 = arith.constant 0 : index
    %c0_148 = arith.constant 0 : index
    %334 = vector.load %arg8[%c0_147, %c0_148] : memref<8x128xf32, #tpu.memory_space<vmem>>, vector<8x128xf32>
    tpu.vector_store %arg8[%c0_147, %c0_148], %333 {strides = array<i32>} : memref<8x128xf32, #tpu.memory_space<vmem>>, vector<8x128xf32>,
    %c0_149 = arith.constant 0 : index
    %c0_150 = arith.constant 0 : index
    %335 = vector.load %arg9[%c0_149, %c0_150] : memref<8x128xf32, #tpu.memory_space<vmem>>, vector<8x128xf32>
    tpu.vector_store %arg9[%c0_149, %c0_150], %331 {strides = array<i32>} : memref<8x128xf32, #tpu.memory_space<vmem>>, vector<8x128xf32>,
    %336 = arith.index_cast %c7_i32 : i32 to index
    %c0_151 = arith.constant 0 : index
    %c0_152 = arith.constant 0 : index
    %337 = vector.load %arg6[%336, %c0_151, %c0_152] : memref<8x8x128xf32, #tpu.memory_space<vmem>>, vector<1x8x128xf32>
    %338 = vector.shape_cast %337 : vector<1x8x128xf32> to vector<8x128xf32>
    %339 = vector.shape_cast %333 : vector<8x128xf32> to vector<1x8x128xf32>
    tpu.vector_store %arg6[%336, %c0_151, %c0_152], %339 {strides = array<i32>} : memref<8x8x128xf32, #tpu.memory_space<vmem>>, vector<1x8x128xf32>,
    %c8_i32_153 = arith.constant 8 : i32
    return
  }
  func.func @transform_0(%arg0: i32, %arg1: i32) -> (i32, i32, i32) {
    %c0_i32 = arith.constant 0 : i32
    %c0_i32_0 = arith.constant 0 : i32
    return %arg1, %arg0, %c0_i32 : i32, i32, i32
  }
  func.func @transform_1(%arg0: i32, %arg1: i32) -> (i32, i32) {
    %c0_i32 = arith.constant 0 : i32
    %c0_i32_0 = arith.constant 0 : i32
    %c0_i32_1 = arith.constant 0 : i32
    return %c0_i32, %c0_i32_0 : i32, i32
  }
  func.func @transform_2(%arg0: i32, %arg1: i32) -> (i32, i32) {
    %c0_i32 = arith.constant 0 : i32
    %c0_i32_0 = arith.constant 0 : i32
    %c0_i32_1 = arith.constant 0 : i32
    return %c0_i32, %c0_i32_0 : i32, i32
  }
  func.func @transform_3(%arg0: i32, %arg1: i32) -> (i32, i32) {
    %c0_i32 = arith.constant 0 : i32
    %c0_i32_0 = arith.constant 0 : i32
    %c0_i32_1 = arith.constant 0 : i32
    return %c0_i32, %c0_i32_0 : i32, i32
  }
  func.func @transform_4(%arg0: i32, %arg1: i32) -> (i32, i32, i32) {
    %c0_i32 = arith.constant 0 : i32
    %c0_i32_0 = arith.constant 0 : i32
    return %arg1, %arg0, %c0_i32 : i32, i32, i32
  }
}

</mosaic_0001>

<bundles_post_ra>
// kernel: lstm_model_forward.3
= control target key start
LH: loop header
LB: loop body
LE: loop exit
PB: predicated region body
PF: predicated region fallthrough
CT: control target
= control target key end

     0   :  { %v4724_v1 = vmov 0   ;;  %vm3752_vm0 = vmmov 0   ;;  %s4717_s1 = inlined_call_operand.vmem [shape: bf16[128,512], index: 1, kind: input, shape index: {}]   ;;  %s4718_s2 = inlined_call_operand.vmem [shape: bf16[128,512], index: 2, kind: input, shape index: {}]   ;;  %s4719_s0 = inlined_call_operand.vmem [shape: f32[8,8,128], index: 0, kind: input, shape index: {}]   ;;  %s4720_s3 = inlined_call_operand.vmem [shape: f32[1,512], index: 3, kind: input, shape index: {}]   ;;  %s4721_s4 = inlined_call_operand.vmem [shape: bf16[128,128], index: 4, kind: input, shape index: {}]   ;;  %s4722_s5 = inlined_call_operand.vmem [shape: f32[1,128], index: 5, kind: input, shape index: {}]   ;;  %s4723_s6 = inlined_call_operand.vmem [shape: f32[8,128], index: 6, kind: output, shape index: {}]  }
   0x1   :  { %v3465_v0 = vld [vmem:[%s4717_s1 + $0x4] ss:$16 sps:$4 sm:$0xff]   ;;  %289 = vmatprep.mubr.bf16.mxu0 %v4724_v1  ;;  %362 = vmatprep.mubr.bf16.mxu1 %v4724_v1  ;;  %v3467_v2 = vld [vmem:[%s4717_s1 + $0xc] ss:$16 sps:$4 sm:$0xff]   ;;  %v3469_v3 = vld [vmem:[%s4717_s1] ss:$16 sps:$4 sm:$0xff]  }
   0x2   :  { %257 = vmatprep.subr.bf16.mxu0 %v3465_v0  ;;  %v3470_v4 = vld [vmem:[%s4717_s1 + $0x8] ss:$16 sps:$4 sm:$0xff]   ;;  %330 = vmatprep.subr.bf16.mxu1 %v3467_v2  ;;  %v3471_v5 = vld [vmem:[%s4717_s1 + $0x24] ss:$16 sps:$4 sm:$0xff]   ;;  %v3473_v6 = vld [vmem:[%s4717_s1 + $0x2c] ss:$16 sps:$4 sm:$0xff]  }
   0x3   :  { %258 = vmatpush1.bf16.msra.mxu0 %v3469_v3  ;;  %331 = vmatpush1.bf16.msra.mxu1 %v3470_v4  ;;  %v3475_v7 = vld [vmem:[%s4717_s1 + $0x20] ss:$16 sps:$4 sm:$0xff]   ;;  %v3476_v8 = vld [vmem:[%s4717_s1 + $0x28] ss:$16 sps:$4 sm:$0xff]   ;;  %v3477_v9 = vld [vmem:[%s4717_s1 + $0x44] ss:$16 sps:$4 sm:$0xff]  }
   0x4   :  { %259 = vmatprep.subr.bf16.mxu0 %v3471_v5  ;;  %332 = vmatprep.subr.bf16.mxu1 %v3473_v6  ;;  %v3479_v10 = vld [vmem:[%s4717_s1 + $0x4c] ss:$16 sps:$4 sm:$0xff]   ;;  %v3481_v11 = vld [vmem:[%s4717_s1 + $0x40] ss:$16 sps:$4 sm:$0xff]   ;;  %v3482_v12 = vld [vmem:[%s4717_s1 + $0x48] ss:$16 sps:$4 sm:$0xff]  }
   0x5   :  { %v3483_v13 = vld [vmem:[%s4717_s1 + $0x64] ss:$16 sps:$4 sm:$0xff]   ;;  %v3485_v14 = vld [vmem:[%s4717_s1 + $0x6c] ss:$16 sps:$4 sm:$0xff]   ;;  %v3487_v15 = vld [vmem:[%s4717_s1 + $0x60] ss:$16 sps:$4 sm:$0xff]  }
   0x6   :  { %v3488_v16 = vld [vmem:[%s4717_s1 + $0x68] ss:$16 sps:$4 sm:$0xff]   ;;  %v3489_v17 = vld [vmem:[%s4717_s1 + $0x84] ss:$16 sps:$4 sm:$0xff]   ;;  %v3491_v18 = vld [vmem:[%s4717_s1 + $0x8c] ss:$16 sps:$4 sm:$0xff]  }
   0x7   :  { %260 = vmatpush1.bf16.msra.mxu0 %v3475_v7  ;;  %333 = vmatpush1.bf16.msra.mxu1 %v3476_v8  ;;  %v3493_v19 = vld [vmem:[%s4717_s1 + $0x80] ss:$16 sps:$4 sm:$0xff]   ;;  %v3494_v20 = vld [vmem:[%s4717_s1 + $0x88] ss:$16 sps:$4 sm:$0xff]   ;;  %v3495_v21 = vld [vmem:[%s4717_s1 + $0xa4] ss:$16 sps:$4 sm:$0xff]  }
   0x8   :  { %261 = vmatprep.subr.bf16.mxu0 %v3477_v9  ;;  %334 = vmatprep.subr.bf16.mxu1 %v3479_v10  ;;  %v3497_v22 = vld [vmem:[%s4717_s1 + $0xac] ss:$16 sps:$4 sm:$0xff]   ;;  %v3499_v23 = vld [vmem:[%s4717_s1 + $0xa0] ss:$16 sps:$4 sm:$0xff]   ;;  %v3500_v24 = vld [vmem:[%s4717_s1 + $0xa8] ss:$16 sps:$4 sm:$0xff]  }
   0x9   :  { %v3501_v25 = vld [vmem:[%s4717_s1 + $0xc4] ss:$16 sps:$4 sm:$0xff]   ;;  %v3503_v26 = vld [vmem:[%s4717_s1 + $0xcc] ss:$16 sps:$4 sm:$0xff]   ;;  %v3505_v27 = vld [vmem:[%s4717_s1 + $0xc0] ss:$16 sps:$4 sm:$0xff]  }
   0xa   :  { %v3506_v28 = vld [vmem:[%s4717_s1 + $0xc8] ss:$16 sps:$4 sm:$0xff]   ;;  %v3507_v29 = vld [vmem:[%s4717_s1 + $0xe4] ss:$16 sps:$4 sm:$0xff]   ;;  %v3509_v30 = vld [vmem:[%s4717_s1 + $0xec] ss:$16 sps:$4 sm:$0xff]  }
   0xb   :  { %262 = vmatpush1.bf16.msra.mxu0 %v3481_v11  ;;  %335 = vmatpush1.bf16.msra.mxu1 %v3482_v12  ;;  %v3511_v31 = vld [vmem:[%s4717_s1 + $0xe0] ss:$16 sps:$4 sm:$0xff]   ;;  %v3512_v32 = vld [vmem:[%s4717_s1 + $0xe8] ss:$16 sps:$4 sm:$0xff]   ;;  %v3895_v35 = vld [vmem:[%s4718_s2 + $0x4] ss:$16 sps:$4 sm:$0xff]  }
   0xc   :  { %263 = vmatprep.subr.bf16.mxu0 %v3483_v13  ;;  %336 = vmatprep.subr.bf16.mxu1 %v3485_v14  ;;  %v31_v33 = vld [vmem:[%s4719_s0] sm:$0xff]  ;;  %v32_v34 = vld [vmem:[%s4719_s0 + $0x8] sm:$0xff]  ;;  %v33_v44 = vld [vmem:[%s4719_s0 + $0x10] sm:$0xff]  ;;  %v3750_v14 = vmov 0.0|0.0  }
   0xd   :  { %v3900_v36 = vld [vmem:[%s4718_s2 + $0xc] ss:$16 sps:$4 sm:$0xff]   ;;  %v39_v37 = vpack.c.bf16 %v32_v34, %v31_v33  ;;  %v3905_v38 = vld [vmem:[%s4718_s2] ss:$16 sps:$4 sm:$0xff]   ;;  %v3910_v39 = vld [vmem:[%s4718_s2 + $0x8] ss:$16 sps:$4 sm:$0xff]  }
   0xe   :  { %v3917_v40 = vld [vmem:[%s4718_s2 + $0x24] ss:$16 sps:$4 sm:$0xff]   ;;  %v3922_v41 = vld [vmem:[%s4718_s2 + $0x2c] ss:$16 sps:$4 sm:$0xff]   ;;  %v3927_v42 = vld [vmem:[%s4718_s2 + $0x20] ss:$16 sps:$4 sm:$0xff]  }
   0xf   :  { %264 = vmatpush1.bf16.msra.mxu0 %v3487_v15  ;;  %337 = vmatpush1.bf16.msra.mxu1 %v3488_v16  ;;  %v3932_v43 = vld [vmem:[%s4718_s2 + $0x28] ss:$16 sps:$4 sm:$0xff]   ;;  %v3947_v46 = vld [vmem:[%s4718_s2 + $0x44] ss:$16 sps:$4 sm:$0xff]   ;;  %v3952_v47 = vld [vmem:[%s4718_s2 + $0x4c] ss:$16 sps:$4 sm:$0xff]   ;;  %v77_v15 = vlaneseq }
  0x10   :  { %265 = vmatprep.subr.bf16.mxu0 %v3489_v17  ;;  %338 = vmatprep.subr.bf16.mxu1 %v3491_v18  ;;  %v34_v45 = vld [vmem:[%s4719_s0 + $0x18] sm:$0xff]  ;;  %v3959_v49 = vld [vmem:[%s4718_s2 + $0x40] ss:$16 sps:$4 sm:$0xff]   ;;  %v3971_v51 = vld [vmem:[%s4718_s2 + $0x64] ss:$16 sps:$4 sm:$0xff]  }
  0x11   :  { %v40_v48 = vpack.c.bf16 %v34_v45, %v33_v44  ;;  %v3964_v50 = vld [vmem:[%s4718_s2 + $0x48] ss:$16 sps:$4 sm:$0xff]   ;;  %v3978_v52 = vld [vmem:[%s4718_s2 + $0x6c] ss:$16 sps:$4 sm:$0xff]   ;;  %v3983_v53 = vld [vmem:[%s4718_s2 + $0x60] ss:$16 sps:$4 sm:$0xff]  }
  0x12   :  { %v3988_v54 = vld [vmem:[%s4718_s2 + $0x68] ss:$16 sps:$4 sm:$0xff]   ;;  %v35_v55 = vld [vmem:[%s4719_s0 + $0x20] sm:$0xff]  ;;  %v4008_v58 = vld [vmem:[%s4718_s2 + $0x8c] ss:$16 sps:$4 sm:$0xff]   ;;  %v78_v16 = vshrl.u32 %v77_v15, 7 }
  0x13   :  { %266 = vmatpush1.bf16.msra.mxu0 %v3493_v19  ;;  %339 = vmatpush1.bf16.msra.mxu1 %v3494_v20  ;;  %v36_v56 = vld [vmem:[%s4719_s0 + $0x28] sm:$0xff]  ;;  %v4003_v57 = vld [vmem:[%s4718_s2 + $0x84] ss:$16 sps:$4 sm:$0xff]   ;;  %v4015_v59 = vld [vmem:[%s4718_s2 + $0x80] ss:$16 sps:$4 sm:$0xff]  }
  0x14   :  { %267 = vmatprep.subr.bf16.mxu0 %v3495_v21  ;;  %340 = vmatprep.subr.bf16.mxu1 %v3497_v22  ;;  %v4020_v60 = vld [vmem:[%s4718_s2 + $0x88] ss:$16 sps:$4 sm:$0xff]   ;;  %v41_v61 = vpack.c.bf16 %v36_v56, %v35_v55  ;;  %v4025_v62 = vld [vmem:[%s4718_s2 + $0xa4] ss:$16 sps:$4 sm:$0xff]   ;;  %v4030_v63 = vld [vmem:[%s4718_s2 + $0xac] ss:$16 sps:$4 sm:$0xff]  }
  0x15   :  { %v4039_v0 = vld [vmem:[%s4718_s2 + $0xa0] ss:$16 sps:$4 sm:$0xff]   ;;  %v4044_v2 = vld [vmem:[%s4718_s2 + $0xa8] ss:$16 sps:$4 sm:$0xff]   ;;  %v4055_v5 = vld [vmem:[%s4718_s2 + $0xc4] ss:$16 sps:$4 sm:$0xff]  }
  0x16   :  { %v37_v3 = vld [vmem:[%s4719_s0 + $0x30] sm:$0xff]  ;;  %v38_v4 = vld [vmem:[%s4719_s0 + $0x38] sm:$0xff]  ;;  %v87_v17 = vsub.s32 2, %v78_v16  ;;  %v91_v18 = vsub.s32 3, %v78_v16  ;;  %v79_v19 = vsub.s32 0, %v78_v16  ;;  %v83_v21 = vsub.s32 1, %v78_v16 }
  0x17   :  { %268 = vmatpush1.bf16.msra.mxu0 %v3499_v23  ;;  %341 = vmatpush1.bf16.msra.mxu1 %v3500_v24  ;;  %v4060_v6 = vld [vmem:[%s4718_s2 + $0xcc] ss:$16 sps:$4 sm:$0xff]   ;;  %v42_v7 = vpack.c.bf16 %v38_v4, %v37_v3  ;;  %v4073_v8 = vld [vmem:[%s4718_s2 + $0xc0] ss:$16 sps:$4 sm:$0xff]   ;;  %v4078_v9 = vld [vmem:[%s4718_s2 + $0xc8] ss:$16 sps:$4 sm:$0xff]  }
  0x18   :  { %269 = vmatprep.subr.bf16.mxu0 %v3501_v25  ;;  %342 = vmatprep.subr.bf16.mxu1 %v3503_v26  ;;  %v4085_v10 = vld [vmem:[%s4718_s2 + $0xe4] ss:$16 sps:$4 sm:$0xff]   ;;  %v4090_v11 = vld [vmem:[%s4718_s2 + $0xec] ss:$16 sps:$4 sm:$0xff]   ;;  %v4097_v12 = vld [vmem:[%s4718_s2 + $0xe0] ss:$16 sps:$4 sm:$0xff]  }
  0x19   :  { %v4102_v13 = vld [vmem:[%s4718_s2 + $0xe8] ss:$16 sps:$4 sm:$0xff]   ;;  %v75_v20 = vld [vmem:[%s4720_s3] sm:$0xf] }
  0x1a   :  { %v4149_v22 = vrot.slane %v75_v20, %v87_v17  ;;  %v4155_v25 = vrot.slane %v75_v20, %v91_v18  ;;  %v80_v26 = vrot.slane %v75_v20, %v79_v19 }
  0x1b   :  { %270 = vmatpush1.bf16.msra.mxu0 %v3505_v27  ;;  %343 = vmatpush1.bf16.msra.mxu1 %v3506_v28 }
  0x1c   :  { %271 = vmatprep.subr.bf16.mxu0 %v3507_v29  ;;  %344 = vmatprep.subr.bf16.mxu1 %v3509_v30  ;;  %v84_v29 = vrot.slane %v75_v20, %v83_v21 }
  0x1f   :  { %272 = vmatpush1.bf16.msra.mxu0 %v3511_v31  ;;  %345 = vmatpush1.bf16.msra.mxu1 %v3512_v32 }
  0x20   :  { %637 = vmatprep.subr.bf16.mxu0 %v3895_v35  ;;  %678 = vmatprep.subr.bf16.mxu1 %v3900_v36 }
  0x22   :  { %290 = vmatmul.mubr.bf16.vlgmr.msra.gmra.mrb[0].mxu0 %v39_v37  ;;  %363 = vmatmul.mubr.bf16.vlgmr.msra.gmra.mrb[0].mxu1 %v39_v37 }
  0x23   :  { %638 = vmatpush1.bf16.msra.mxu0 %v3905_v38  ;;  %679 = vmatpush1.bf16.msra.mxu1 %v3910_v39 }
  0x24   :  { %639 = vmatprep.subr.bf16.mxu0 %v3917_v40  ;;  %680 = vmatprep.subr.bf16.mxu1 %v3922_v41 }
  0x25   :  { %299 = vmatprep.mubr.bf16.mxu0 %v4724_v1  ;;  %372 = vmatprep.mubr.bf16.mxu1 %v4724_v1 }
  0x27   :  { %640 = vmatpush1.bf16.msra.mxu0 %v3927_v42  ;;  %681 = vmatpush1.bf16.msra.mxu1 %v3932_v43 }
  0x28   :  { %641 = vmatprep.subr.bf16.mxu0 %v3947_v46  ;;  %682 = vmatprep.subr.bf16.mxu1 %v3952_v47 }
  0x2a   :  { %300 = vmatmul.mubr.bf16.gmra.mrb[4].mxu0 %v40_v48  ;;  %373 = vmatmul.mubr.bf16.gmra.mrb[4].mxu1 %v40_v48 }
  0x2b   :  { %642 = vmatpush1.bf16.msra.mxu0 %v3959_v49  ;;  %683 = vmatpush1.bf16.msra.mxu1 %v3964_v50 }
  0x2c   :  { %643 = vmatprep.subr.bf16.mxu0 %v3971_v51  ;;  %684 = vmatprep.subr.bf16.mxu1 %v3978_v52 }
  0x2d   :  { %309 = vmatprep.mubr.bf16.mxu0 %v4724_v1  ;;  %382 = vmatprep.mubr.bf16.mxu1 %v4724_v1 }
  0x2f   :  { %644 = vmatpush1.bf16.msra.mxu0 %v3983_v53  ;;  %685 = vmatpush1.bf16.msra.mxu1 %v3988_v54 }
  0x30   :  { %645 = vmatprep.subr.bf16.mxu0 %v4003_v57  ;;  %686 = vmatprep.subr.bf16.mxu1 %v4008_v58 }
  0x32   :  { %310 = vmatmul.mubr.bf16.gmra.mrb[8].mxu0 %v41_v61  ;;  %383 = vmatmul.mubr.bf16.gmra.mrb[8].mxu1 %v41_v61 }
  0x33   :  { %646 = vmatpush1.bf16.msra.mxu0 %v4015_v59  ;;  %687 = vmatpush1.bf16.msra.mxu1 %v4020_v60 }
  0x34   :  { %647 = vmatprep.subr.bf16.mxu0 %v4025_v62  ;;  %688 = vmatprep.subr.bf16.mxu1 %v4030_v63 }
  0x35   :  { %319 = vmatprep.mubr.bf16.mxu0 %v4724_v1  ;;  %392 = vmatprep.mubr.bf16.mxu1 %v4724_v1 }
  0x37   :  { %648 = vmatpush1.bf16.msra.mxu0 %v4039_v0  ;;  %689 = vmatpush1.bf16.msra.mxu1 %v4044_v2 }
  0x38   :  { %649 = vmatprep.subr.bf16.mxu0 %v4055_v5  ;;  %690 = vmatprep.subr.bf16.mxu1 %v4060_v6 }
  0x3a   :  { %320 = vmatmul.mubr.bf16.gmra.mrb[12].mxu0 %v42_v7  ;;  %393 = vmatmul.mubr.bf16.gmra.mrb[12].mxu1 %v42_v7 }
  0x3b   :  { %650 = vmatpush1.bf16.msra.mxu0 %v4073_v8  ;;  %691 = vmatpush1.bf16.msra.mxu1 %v4078_v9 }
  0x3c   :  { %651 = vmatprep.subr.bf16.mxu0 %v4085_v10  ;;  %692 = vmatprep.subr.bf16.mxu1 %v4090_v11 }
  0x3d   :  { %669 = vmatprep.mubr.bf16.mxu0 %v4724_v1  ;;  %710 = vmatprep.mubr.bf16.mxu1 %v4724_v1 }
  0x3f   :  { %652 = vmatpush1.bf16.msra.mxu0 %v4097_v12  ;;  %693 = vmatpush1.bf16.msra.mxu1 %v4102_v13 }
  0x40   :  { %954 = vmatprep.subr.bf16.mxu0 %v3895_v35  ;;  %995 = vmatprep.subr.bf16.mxu1 %v3900_v36 }
  0x42   :  { %670 = vmatmul.mubr.bf16.vlgmr.msra.gmra.mrb[16].mxu0 %v3750_v14  ;;  %711 = vmatmul.mubr.bf16.vlgmr.msra.gmra.mrb[16].mxu1 %v3750_v14 }
  0x43   :  { %955 = vmatpush1.bf16.msra.mxu0 %v3905_v38  ;;  %996 = vmatpush1.bf16.msra.mxu1 %v3910_v39 }
  0x44   :  { %956 = vmatprep.subr.bf16.mxu0 %v3917_v40  ;;  %997 = vmatprep.subr.bf16.mxu1 %v3922_v41 }
  0x45   :  { %986 = vmatprep.mubr.bf16.mxu0 %v4724_v1  ;;  %1027 = vmatprep.mubr.bf16.mxu1 %v4724_v1 }
  0x47   :  { %957 = vmatpush1.bf16.msra.mxu0 %v3927_v42  ;;  %998 = vmatpush1.bf16.msra.mxu1 %v3932_v43 }
  0x48   :  { %958 = vmatprep.subr.bf16.mxu0 %v3947_v46  ;;  %999 = vmatprep.subr.bf16.mxu1 %v3952_v47 }
  0x4b   :  { %959 = vmatpush1.bf16.msra.mxu0 %v3959_v49  ;;  %1000 = vmatpush1.bf16.msra.mxu1 %v3964_v50 }
  0x4c   :  { %960 = vmatprep.subr.bf16.mxu0 %v3971_v51  ;;  %1001 = vmatprep.subr.bf16.mxu1 %v3978_v52 }
  0x4f   :  { %961 = vmatpush1.bf16.msra.mxu0 %v3983_v53  ;;  %1002 = vmatpush1.bf16.msra.mxu1 %v3988_v54 }
  0x50   :  { %962 = vmatprep.subr.bf16.mxu0 %v4003_v57  ;;  %1003 = vmatprep.subr.bf16.mxu1 %v4008_v58 }
  0x53   :  { %963 = vmatpush1.bf16.msra.mxu0 %v4015_v59  ;;  %1004 = vmatpush1.bf16.msra.mxu1 %v4020_v60 }
  0x54   :  { %964 = vmatprep.subr.bf16.mxu0 %v4025_v62  ;;  %1005 = vmatprep.subr.bf16.mxu1 %v4030_v63 }
  0x57   :  { %965 = vmatpush1.bf16.msra.mxu0 %v4039_v0  ;;  %1006 = vmatpush1.bf16.msra.mxu1 %v4044_v2 }
  0x58   :  { %966 = vmatprep.subr.bf16.mxu0 %v4055_v5  ;;  %1007 = vmatprep.subr.bf16.mxu1 %v4060_v6 }
  0x5b   :  { %967 = vmatpush1.bf16.msra.mxu0 %v4073_v8  ;;  %1008 = vmatpush1.bf16.msra.mxu1 %v4078_v9 }
  0x5c   :  { %968 = vmatprep.subr.bf16.mxu0 %v4085_v10  ;;  %1009 = vmatprep.subr.bf16.mxu1 %v4090_v11 }
  0x5f   :  { %969 = vmatpush1.bf16.msra.mxu0 %v4097_v12  ;;  %1010 = vmatpush1.bf16.msra.mxu1 %v4102_v13 }
  0x60   :  { %1271 = vmatprep.subr.bf16.mxu0 %v3895_v35  ;;  %1312 = vmatprep.subr.bf16.mxu1 %v3900_v36 }
  0xf5   :  { %v4151_v23 = vpop.f32.mrb[0].mxu0  ;;  %v4153_v24 = vpop.f32.mrb[0].mxu1 }
  0xf6   :  { %v293_v27 = vpop.f32.mrb[1].mxu0  ;;  %v366_v28 = vpop.f32.mrb[1].mxu1 }
  0xf7   :  { %v295_v30 = vpop.f32.mrb[2].mxu0  ;;  %v368_v31 = vpop.f32.mrb[2].mxu1 }
  0xf8   :  { %v4157_v32 = vadd.f32 %v295_v30, %v80_v26  ;;  %v297_v33 = vpop.f32.mrb[3].mxu0  ;;  %v4160_v34 = vadd.f32 %v368_v31, %v4149_v22  ;;  %v370_v37 = vpop.f32.mrb[3].mxu1 }
  0xf9   :  { %v4162_v44 = vadd.f32 %v297_v33, %v84_v29  ;;  %v4165_v45 = vadd.f32 %v370_v37, %v4155_v25 }
  0xfd   :  { %v301_v48 = vpop.f32.mrb[4].mxu0  ;;  %v374_v55 = vpop.f32.mrb[4].mxu1 }
  0xfe   :  { %v4167_v56 = vadd.f32 %v301_v48, %v80_v26  ;;  %v303_v61 = vpop.f32.mrb[5].mxu0  ;;  %v4170_v3 = vadd.f32 %v374_v55, %v4149_v22  ;;  %v376_v4 = vpop.f32.mrb[5].mxu1 }
  0xff   :  { %v4172_v7 = vadd.f32 %v303_v61, %v84_v29  ;;  %v305_v14 = vpop.f32.mrb[6].mxu0  ;;  %v4175_v15 = vadd.f32 %v376_v4, %v4155_v25  ;;  %v378_v16 = vpop.f32.mrb[6].mxu1 }
 0x100   :  { %v4177_v17 = vadd.f32 %v305_v14, %v80_v26  ;;  %v307_v18 = vpop.f32.mrb[7].mxu0  ;;  %v4180_v19 = vadd.f32 %v378_v16, %v4149_v22  ;;  %v380_v20 = vpop.f32.mrb[7].mxu1 }
 0x101   :  { %4726 = vst [vmem:[#allocation6_spill] sm:$0xff] %v4175_v15  ;;  %v4182_v21 = vadd.f32 %v307_v18, %v84_v29  ;;  %v4185_v30 = vadd.f32 %v380_v20, %v4155_v25 }
 0x102   :  { %4727 = vst [vmem:[#allocation7_spill] sm:$0xff] %v4177_v17  ;;  %4728 = vst [vmem:[#allocation8_spill] sm:$0xff] %v4180_v19 }
 0x103   :  { %4729 = vst [vmem:[#allocation9_spill] sm:$0xff] %v4182_v21  ;;  %4730 = vst [vmem:[#allocation10_spill] sm:$0xff] %v4185_v30 }
 0x105   :  { %v311_v31 = vpop.f32.mrb[8].mxu0  ;;  %v384_v33 = vpop.f32.mrb[8].mxu1 }
 0x106   :  { %v4187_v37 = vadd.f32 %v311_v31, %v80_v26  ;;  %v313_v48 = vpop.f32.mrb[9].mxu0  ;;  %v4190_v55 = vadd.f32 %v384_v33, %v4149_v22  ;;  %v386_v61 = vpop.f32.mrb[9].mxu1 }
 0x107   :  { %v4192_v4 = vadd.f32 %v313_v48, %v84_v29  ;;  %v315_v14 = vpop.f32.mrb[10].mxu0  ;;  %v4195_v16 = vadd.f32 %v386_v61, %v4155_v25  ;;  %v388_v18 = vpop.f32.mrb[10].mxu1 }
 0x108   :  { %4731 = vst [vmem:[#allocation11_spill] sm:$0xff] %v4187_v37  ;;  %4732 = vst [vmem:[#allocation12_spill] sm:$0xff] %v4190_v55  ;;  %v4197_v1 = vadd.f32 %v315_v14, %v80_v26  ;;  %v317_v20 = vpop.f32.mrb[11].mxu0  ;;  %v4200_v30 = vadd.f32 %v388_v18, %v4149_v22  ;;  %v390_v31 = vpop.f32.mrb[11].mxu1 }
 0x109   :  { %4733 = vst [vmem:[#allocation13_spill] sm:$0xff] %v4192_v4  ;;  %4734 = vst [vmem:[#allocation14_spill] sm:$0xff] %v4195_v16  ;;  %v4202_v37 = vadd.f32 %v317_v20, %v84_v29  ;;  %v4205_v33 = vadd.f32 %v390_v31, %v4155_v25 }
 0x10a   :  { %4735 = vst [vmem:[#allocation15_spill] sm:$0xff] %v4197_v1  ;;  %4736 = vst [vmem:[#allocation16_spill] sm:$0xff] %v4200_v30 }
 0x10b   :  { %4737 = vst [vmem:[#allocation17_spill] sm:$0xff] %v4202_v37  ;;  %4738 = vst [vmem:[#allocation18_spill] sm:$0xff] %v4205_v33 }
 0x10d   :  { %v321_v55 = vpop.f32.mrb[12].mxu0  ;;  %v394_v48 = vpop.f32.mrb[12].mxu1 }
 0x10e   :  { %v4207_v4 = vadd.f32 %v321_v55, %v80_v26  ;;  %v323_v21 = vpop.f32.mrb[13].mxu0  ;;  %v4210_v61 = vadd.f32 %v394_v48, %v4149_v22  ;;  %v396_v14 = vpop.f32.mrb[13].mxu1 }
 0x10f   :  { %v4212_v1 = vadd.f32 %v323_v21, %v84_v29  ;;  %v325_v16 = vpop.f32.mrb[14].mxu0  ;;  %v4215_v18 = vadd.f32 %v396_v14, %v4155_v25  ;;  %v398_v20 = vpop.f32.mrb[14].mxu1  ;;  %v292_v21 = vadd.f32 %v4151_v23, %v80_v26  ;;  %v294_v14 = vadd.f32 %v293_v27, %v84_v29 }
 0x110   :  { %4739 = vst [vmem:[#allocation19_spill] sm:$0xff] %v4207_v4  ;;  %4740 = vst [vmem:[#allocation20_spill] sm:$0xff] %v4210_v61  ;;  %v4217_v37 = vadd.f32 %v325_v16, %v80_v26  ;;  %v327_v31 = vpop.f32.mrb[15].mxu0  ;;  %v4220_v33 = vadd.f32 %v398_v20, %v4149_v22  ;;  %v400_v55 = vpop.f32.mrb[15].mxu1 }
 0x111   :  { %4741 = vst [vmem:[#allocation21_spill] sm:$0xff] %v4212_v1  ;;  %4742 = vst [vmem:[#allocation22_spill] sm:$0xff] %v4215_v18  ;;  %v4222_v4 = vadd.f32 %v327_v31, %v84_v29  ;;  %v4225_v48 = vadd.f32 %v400_v55, %v4155_v25  ;;  %v365_v1 = vadd.f32 %v4153_v24, %v4149_v22 }
 0x112   :  { %4743 = vst [vmem:[#allocation23_spill] sm:$0xff] %v4217_v37  ;;  %4744 = vst [vmem:[#allocation24_spill] sm:$0xff] %v4220_v33  ;;  %v367_v18 = vadd.f32 %v366_v28, %v4155_v25 }
 0x113   :  { %4745 = vst [vmem:[#allocation25_spill] sm:$0xff] %v4222_v4  ;;  %4746 = vst [vmem:[#allocation26_spill] sm:$0xff] %v4225_v48 }
 0x115   :  { %v671_v16 = vpop.f32.mrb[16].mxu0  ;;  %v712_v37 = vpop.f32.mrb[16].mxu1 }
 0x116   :  { %v719_v61 = vadd.f32 %v671_v16, %v292_v21  ;;  %v721_v30 = vadd.f32 %v712_v37, %v365_v1  ;;  %v673_v20 = vpop.f32.mrb[17].mxu0  ;;  %v714_v33 = vpop.f32.mrb[17].mxu1 }
 0x117   :  { %v720_v19 = vadd.f32 %v673_v20, %v294_v14  ;;  %v722_v31 = vadd.f32 %v714_v33, %v367_v18  ;;  %v675_v4 = vpop.f32.mrb[18].mxu0  ;;  %v716_v17 = vpop.f32.mrb[18].mxu1 }
 0x118   :  { %v3175_v55 = vmul.f32 -1.442695, %v719_v61  ;;  %v676_v48 = vpop.f32.mrb[19].mxu0  ;;  %v717_v15 = vpop.f32.mrb[19].mxu1 }
 0x119   :  { %v3176_v23 = vmul.f32 -1.442695, %v720_v19  ;;  %v3177_v22 = vmul.f32 -1.442695, %v722_v31  ;;  %v4747_v48 = vmov 0  }
 0x11a   :  { %3617 = vpow2.f32 %v3175_v55 }
 0x11b   :  { %3619 = vpow2.f32 %v3176_v23 }
 0x11c   :  { %3621 = vpow2.f32 %v3177_v22 }
 0x11d   :  { %3623 = vtanh.f32 %v721_v30 }
 0x124   :  { %v3618_v24 = vpop.eup %3617 }
 0x125   :  { %v3620_v26 = vpop.eup %3619  ;;  %v726_v25 = vadd.f32 1.0, %v3618_v24 }
 0x126   :  { %v732_v27 = vadd.f32 1.0, %v3620_v26  ;;  %v3622_v1 = vpop.eup %3621 }
 0x127   :  { %3625 = vrcp.f32 %v726_v25  ;;  %v3624_v28 = vpop.eup %3623  ;;  %v739_v4 = vadd.f32 1.0, %v3622_v1 }
 0x128   :  { %3627 = vrcp.f32 %v732_v27 }
 0x129   :  { %3629 = vrcp.f32 %v739_v4 }
 0x131   :  { %v3626_v29 = vpop.eup %3625 }
 0x132   :  { %v3628_v37 = vpop.eup %3627  ;;  %v743_v17 = vmul.f32 %v3626_v29, %v3624_v28 }
 0x133   :  { %v742_v33 = vmul.f32 0.0, %v3628_v37  ;;  %v3630_v19 = vpop.eup %3629 }
 0x135   :  { %v4231_v15 = vadd.f32 %v743_v17, %v742_v33 }
 0x137   :  { %3631 = vtanh.f32 %v4231_v15 }
 0x141   :  { %v3632_v61 = vpop.eup %3631 }
 0x142   :  { %v4234_v18 = vmul.f32 %v3632_v61, %v3630_v19 }
 0x144   :  { %v761_v30 = vpack.c.bf16 %v4234_v18, %v4234_v18 }
 0x146   :  { %987 = vmatmul.mubr.bf16.vlgmr.msra.gmra.mrb[20].mxu0 %v761_v30  ;;  %1028 = vmatmul.mubr.bf16.vlgmr.msra.gmra.mrb[20].mxu1 %v761_v30 }
 0x147   :  { %1272 = vmatpush1.bf16.msra.mxu0 %v3905_v38  ;;  %1313 = vmatpush1.bf16.msra.mxu1 %v3910_v39 }
 0x148   :  { %1273 = vmatprep.subr.bf16.mxu0 %v3917_v40  ;;  %1314 = vmatprep.subr.bf16.mxu1 %v3922_v41 }
 0x149   :  { %1303 = vmatprep.mubr.bf16.mxu0 %v4747_v48  ;;  %1344 = vmatprep.mubr.bf16.mxu1 %v4747_v48 }
 0x14b   :  { %1274 = vmatpush1.bf16.msra.mxu0 %v3927_v42  ;;  %1315 = vmatpush1.bf16.msra.mxu1 %v3932_v43 }
 0x14c   :  { %1275 = vmatprep.subr.bf16.mxu0 %v3947_v46  ;;  %1316 = vmatprep.subr.bf16.mxu1 %v3952_v47 }
 0x14f   :  { %1276 = vmatpush1.bf16.msra.mxu0 %v3959_v49  ;;  %1317 = vmatpush1.bf16.msra.mxu1 %v3964_v50 }
 0x150   :  { %1277 = vmatprep.subr.bf16.mxu0 %v3971_v51  ;;  %1318 = vmatprep.subr.bf16.mxu1 %v3978_v52 }
 0x153   :  { %1278 = vmatpush1.bf16.msra.mxu0 %v3983_v53  ;;  %1319 = vmatpush1.bf16.msra.mxu1 %v3988_v54 }
 0x154   :  { %1279 = vmatprep.subr.bf16.mxu0 %v4003_v57  ;;  %1320 = vmatprep.subr.bf16.mxu1 %v4008_v58 }
 0x157   :  { %1280 = vmatpush1.bf16.msra.mxu0 %v4015_v59  ;;  %1321 = vmatpush1.bf16.msra.mxu1 %v4020_v60 }
 0x158   :  { %1281 = vmatprep.subr.bf16.mxu0 %v4025_v62  ;;  %1322 = vmatprep.subr.bf16.mxu1 %v4030_v63 }
 0x15b   :  { %1282 = vmatpush1.bf16.msra.mxu0 %v4039_v0  ;;  %1323 = vmatpush1.bf16.msra.mxu1 %v4044_v2 }
 0x15c   :  { %1283 = vmatprep.subr.bf16.mxu0 %v4055_v5  ;;  %1324 = vmatprep.subr.bf16.mxu1 %v4060_v6 }
 0x15f   :  { %1284 = vmatpush1.bf16.msra.mxu0 %v4073_v8  ;;  %1325 = vmatpush1.bf16.msra.mxu1 %v4078_v9 }
 0x160   :  { %1285 = vmatprep.subr.bf16.mxu0 %v4085_v10  ;;  %1326 = vmatprep.subr.bf16.mxu1 %v4090_v11 }
 0x163   :  { %1286 = vmatpush1.bf16.msra.mxu0 %v4097_v12  ;;  %1327 = vmatpush1.bf16.msra.mxu1 %v4102_v13 }
 0x164   :  { %1588 = vmatprep.subr.bf16.mxu0 %v3895_v35  ;;  %1629 = vmatprep.subr.bf16.mxu1 %v3900_v36 }
 0x219   :  { %v988_v21 = vpop.f32.mrb[20].mxu0  ;;  %v1029_v14 = vpop.f32.mrb[20].mxu1 }
 0x21a   :  { %v1036_v16 = vadd.f32 %v988_v21, %v4157_v32  ;;  %v1038_v20 = vadd.f32 %v1029_v14, %v4160_v34  ;;  %v990_v31 = vpop.f32.mrb[21].mxu0  ;;  %v1031_v55 = vpop.f32.mrb[21].mxu1  ;;  %v750_v14 = vmax.f32 %v4234_v18, -3.4028235e+38  ;;  %v4339_v18 = vld [vmem:[%s4718_s2 + $0xc] ss:$16 sps:$4 sm:$0xff]  }
 0x21b   :  { %v1037_v23 = vadd.f32 %v990_v31, %v4162_v44  ;;  %v1039_v22 = vadd.f32 %v1031_v55, %v4165_v45  ;;  %v992_v24 = vpop.f32.mrb[22].mxu0  ;;  %v1033_v26 = vpop.f32.mrb[22].mxu1  ;;  %v4344_v55 = vld [vmem:[%s4718_s2] ss:$16 sps:$4 sm:$0xff]  }
 0x21c   :  { %v3210_v25 = vmul.f32 -1.442695, %v1036_v16  ;;  %v993_v27 = vpop.f32.mrb[23].mxu0  ;;  %v1034_v1 = vpop.f32.mrb[23].mxu1  ;;  %v4363_v24 = vld [vmem:[%s4718_s2 + $0x2c] ss:$16 sps:$4 sm:$0xff]  }
 0x21d   :  { %v3211_v35 = vmul.f32 -1.442695, %v1037_v23  ;;  %v3212_v36 = vmul.f32 -1.442695, %v1039_v22  ;;  %v4349_v23 = vld [vmem:[%s4718_s2 + $0x8] ss:$16 sps:$4 sm:$0xff]  }
 0x21e   :  { %3633 = vpow2.f32 %v3210_v25  ;;  %v4358_v22 = vld [vmem:[%s4718_s2 + $0x24] ss:$16 sps:$4 sm:$0xff]   ;;  %v4368_v26 = vld [vmem:[%s4718_s2 + $0x20] ss:$16 sps:$4 sm:$0xff]   ;;  %v4373_v25 = vld [vmem:[%s4718_s2 + $0x28] ss:$16 sps:$4 sm:$0xff]  }
 0x21f   :  { %3635 = vpow2.f32 %v3211_v35  ;;  %v4382_v27 = vld [vmem:[%s4718_s2 + $0x44] ss:$16 sps:$4 sm:$0xff]   ;;  %v4387_v1 = vld [vmem:[%s4718_s2 + $0x4c] ss:$16 sps:$4 sm:$0xff]   ;;  %v4392_v35 = vld [vmem:[%s4718_s2 + $0x40] ss:$16 sps:$4 sm:$0xff]  }
 0x220   :  { %3637 = vpow2.f32 %v3212_v36  ;;  %v4397_v36 = vld [vmem:[%s4718_s2 + $0x48] ss:$16 sps:$4 sm:$0xff]  }
 0x221   :  { %3639 = vtanh.f32 %v1038_v20 }
 0x228   :  { %v3634_v28 = vpop.eup %3633 }
 0x229   :  { %v3636_v29 = vpop.eup %3635  ;;  %v1043_v32 = vadd.f32 1.0, %v3634_v28  ;;  %v4406_v28 = vld [vmem:[%s4718_s2 + $0x64] ss:$16 sps:$4 sm:$0xff]  }
 0x22a   :  { %v1049_v34 = vadd.f32 1.0, %v3636_v29  ;;  %v3638_v44 = vpop.eup %3637  ;;  %v4411_v29 = vld [vmem:[%s4718_s2 + $0x6c] ss:$16 sps:$4 sm:$0xff]  }
 0x22b   :  { %3641 = vrcp.f32 %v1043_v32  ;;  %v3640_v37 = vpop.eup %3639  ;;  %v1056_v33 = vadd.f32 1.0, %v3638_v44  ;;  %v4416_v32 = vld [vmem:[%s4718_s2 + $0x60] ss:$16 sps:$4 sm:$0xff]   ;;  %v4430_v44 = vld [vmem:[%s4718_s2 + $0x84] ss:$16 sps:$4 sm:$0xff]  }
 0x22c   :  { %3643 = vrcp.f32 %v1049_v34  ;;  %v4421_v34 = vld [vmem:[%s4718_s2 + $0x68] ss:$16 sps:$4 sm:$0xff]  }
 0x22d   :  { %3645 = vrcp.f32 %v1056_v33  ;;  %v4459_v33 = vld [vmem:[%s4718_s2 + $0xa0] ss:$16 sps:$4 sm:$0xff]  }
 0x235   :  { %v3642_v45 = vpop.eup %3641 }
 0x236   :  { %v3644_v17 = vpop.eup %3643  ;;  %v1060_v4 = vmul.f32 %v3642_v45, %v3640_v37  ;;  %v4435_v37 = vld [vmem:[%s4718_s2 + $0x8c] ss:$16 sps:$4 sm:$0xff]   ;;  %v4440_v45 = vld [vmem:[%s4718_s2 + $0x80] ss:$16 sps:$4 sm:$0xff]  }
 0x237   :  { %v1059_v19 = vmul.f32 %v3644_v17, %v4231_v15  ;;  %v3646_v30 = vpop.eup %3645  ;;  %v4334_v15 = vld [vmem:[%s4718_s2 + $0x4] ss:$16 sps:$4 sm:$0xff]   ;;  %v4445_v17 = vld [vmem:[%s4718_s2 + $0x88] ss:$16 sps:$4 sm:$0xff]  }
 0x239   :  { %v4277_v61 = vadd.f32 %v1060_v4, %v1059_v19  ;;  %v4452_v4 = vld [vmem:[%s4718_s2 + $0xa4] ss:$16 sps:$4 sm:$0xff]   ;;  %v4464_v19 = vld [vmem:[%s4718_s2 + $0xa8] ss:$16 sps:$4 sm:$0xff]  }
 0x23b   :  { %3647 = vtanh.f32 %v4277_v61 }
 0x245   :  { %v3648_v21 = vpop.eup %3647 }
 0x246   :  { %v1063_v16 = vmul.f32 %v3648_v21, %v3646_v30  ;;  %v4475_v30 = vld [vmem:[%s4718_s2 + $0xc4] ss:$16 sps:$4 sm:$0xff]   ;;  %v4480_v21 = vld [vmem:[%s4718_s2 + $0xcc] ss:$16 sps:$4 sm:$0xff]  }
 0x248   :  { %v4281_v20 = vmax.f32 %v750_v14, %v1063_v16  ;;  %v1078_v31 = vpack.c.bf16 %v1063_v16, %v1063_v16  ;;  %v4488_v14 = vld [vmem:[%s4718_s2 + $0xc0] ss:$16 sps:$4 sm:$0xff]   ;;  %v4493_v16 = vld [vmem:[%s4718_s2 + $0xc8] ss:$16 sps:$4 sm:$0xff]  }
 0x24a   :  { %1304 = vmatmul.mubr.bf16.vlgmr.msra.gmra.mrb[24].mxu0 %v1078_v31  ;;  %1345 = vmatmul.mubr.bf16.vlgmr.msra.gmra.mrb[24].mxu1 %v1078_v31  ;;  %v4500_v31 = vld [vmem:[%s4718_s2 + $0xe4] ss:$16 sps:$4 sm:$0xff]  }
 0x24b   :  { %1589 = vmatpush1.bf16.msra.mxu0 %v3905_v38  ;;  %1630 = vmatpush1.bf16.msra.mxu1 %v3910_v39 }
 0x24c   :  { %1590 = vmatprep.subr.bf16.mxu0 %v3917_v40  ;;  %1631 = vmatprep.subr.bf16.mxu1 %v3922_v41 }
 0x24d   :  { %1620 = vmatprep.mubr.bf16.mxu0 %v4747_v48  ;;  %1661 = vmatprep.mubr.bf16.mxu1 %v4747_v48 }
 0x24f   :  { %1591 = vmatpush1.bf16.msra.mxu0 %v3927_v42  ;;  %1632 = vmatpush1.bf16.msra.mxu1 %v3932_v43 }
 0x250   :  { %1592 = vmatprep.subr.bf16.mxu0 %v3947_v46  ;;  %1633 = vmatprep.subr.bf16.mxu1 %v3952_v47  ;;  %v4748_v47 = vld [vmem:[#allocation6_spill] sm:$0xff] }
 0x253   :  { %1593 = vmatpush1.bf16.msra.mxu0 %v3959_v49  ;;  %1634 = vmatpush1.bf16.msra.mxu1 %v3964_v50 }
 0x254   :  { %1594 = vmatprep.subr.bf16.mxu0 %v3971_v51  ;;  %1635 = vmatprep.subr.bf16.mxu1 %v3978_v52 }
 0x257   :  { %1595 = vmatpush1.bf16.msra.mxu0 %v3983_v53  ;;  %1636 = vmatpush1.bf16.msra.mxu1 %v3988_v54 }
 0x258   :  { %1596 = vmatprep.subr.bf16.mxu0 %v4003_v57  ;;  %1637 = vmatprep.subr.bf16.mxu1 %v4008_v58 }
 0x25b   :  { %1597 = vmatpush1.bf16.msra.mxu0 %v4015_v59  ;;  %1638 = vmatpush1.bf16.msra.mxu1 %v4020_v60 }
 0x25c   :  { %1598 = vmatprep.subr.bf16.mxu0 %v4025_v62  ;;  %1639 = vmatprep.subr.bf16.mxu1 %v4030_v63 }
 0x25f   :  { %1599 = vmatpush1.bf16.msra.mxu0 %v4039_v0  ;;  %1640 = vmatpush1.bf16.msra.mxu1 %v4044_v2 }
 0x260   :  { %1600 = vmatprep.subr.bf16.mxu0 %v4055_v5  ;;  %1641 = vmatprep.subr.bf16.mxu1 %v4060_v6 }
 0x263   :  { %1601 = vmatpush1.bf16.msra.mxu0 %v4073_v8  ;;  %1642 = vmatpush1.bf16.msra.mxu1 %v4078_v9 }
 0x264   :  { %1602 = vmatprep.subr.bf16.mxu0 %v4085_v10  ;;  %1643 = vmatprep.subr.bf16.mxu1 %v4090_v11 }
 0x267   :  { %1603 = vmatpush1.bf16.msra.mxu0 %v4097_v12  ;;  %1644 = vmatpush1.bf16.msra.mxu1 %v4102_v13 }
 0x268   :  { %1905 = vmatprep.subr.bf16.mxu0 %v4334_v15  ;;  %1946 = vmatprep.subr.bf16.mxu1 %v4339_v18 }
 0x31d   :  { %v1305_v38 = vpop.f32.mrb[24].mxu0  ;;  %v1346_v39 = vpop.f32.mrb[24].mxu1 }
 0x31e   :  { %v1353_v40 = vadd.f32 %v1305_v38, %v4167_v56  ;;  %v1355_v41 = vadd.f32 %v1346_v39, %v4170_v3  ;;  %v1307_v42 = vpop.f32.mrb[25].mxu0  ;;  %v1348_v43 = vpop.f32.mrb[25].mxu1  ;;  %v4505_v38 = vld [vmem:[%s4718_s2 + $0xec] ss:$16 sps:$4 sm:$0xff]   ;;  %v4512_v39 = vld [vmem:[%s4718_s2 + $0xe0] ss:$16 sps:$4 sm:$0xff]  }
 0x31f   :  { %v1354_v46 = vadd.f32 %v1307_v42, %v4172_v7  ;;  %v1356_v49 = vadd.f32 %v1348_v43, %v4748_v47  ;;  %v1309_v50 = vpop.f32.mrb[26].mxu0  ;;  %v1350_v51 = vpop.f32.mrb[26].mxu1  ;;  %v4749_v43 = vld [vmem:[#allocation7_spill] sm:$0xff]  ;;  %v4750_v47 = vld [vmem:[#allocation8_spill] sm:$0xff] }
 0x320   :  { %v3245_v52 = vmul.f32 -1.442695, %v1353_v40  ;;  %v1310_v53 = vpop.f32.mrb[27].mxu0  ;;  %v1351_v54 = vpop.f32.mrb[27].mxu1  ;;  %v4517_v40 = vld [vmem:[%s4718_s2 + $0xe8] ss:$16 sps:$4 sm:$0xff]  }
 0x321   :  { %v3246_v57 = vmul.f32 -1.442695, %v1354_v46  ;;  %v3247_v58 = vmul.f32 -1.442695, %v1356_v49  ;;  %v4752_v54 = vld [vmem:[#allocation10_spill] sm:$0xff] }
 0x322   :  { %3649 = vpow2.f32 %v3245_v52  ;;  %v4751_v52 = vld [vmem:[#allocation9_spill] sm:$0xff] }
 0x323   :  { %3651 = vpow2.f32 %v3246_v57 }
 0x324   :  { %3653 = vpow2.f32 %v3247_v58 }
 0x325   :  { %3655 = vtanh.f32 %v1355_v41 }
 0x32c   :  { %v3650_v59 = vpop.eup %3649 }
 0x32d   :  { %v3652_v60 = vpop.eup %3651  ;;  %v1360_v62 = vadd.f32 1.0, %v3650_v59 }
 0x32e   :  { %v1366_v63 = vadd.f32 1.0, %v3652_v60  ;;  %v3654_v0 = vpop.eup %3653 }
 0x32f   :  { %3657 = vrcp.f32 %v1360_v62  ;;  %v3656_v2 = vpop.eup %3655  ;;  %v1373_v9 = vadd.f32 1.0, %v3654_v0 }
 0x330   :  { %3659 = vrcp.f32 %v1366_v63 }
 0x331   :  { %3661 = vrcp.f32 %v1373_v9 }
 0x339   :  { %v3658_v5 = vpop.eup %3657 }
 0x33a   :  { %v3660_v6 = vpop.eup %3659  ;;  %v1377_v8 = vmul.f32 %v3658_v5, %v3656_v2 }
 0x33b   :  { %v1376_v10 = vmul.f32 %v3660_v6, %v4277_v61  ;;  %v3662_v12 = vpop.eup %3661  ;;  %v4469_v61 = vld [vmem:[%s4718_s2 + $0xac] ss:$16 sps:$4 sm:$0xff]  }
 0x33d   :  { %v4320_v11 = vadd.f32 %v1377_v8, %v1376_v10 }
 0x33f   :  { %3663 = vtanh.f32 %v4320_v11 }
 0x349   :  { %v3664_v13 = vpop.eup %3663 }
 0x34a   :  { %v4323_v56 = vmul.f32 %v3664_v13, %v3662_v12 }
 0x34c   :  { %v1384_v3 = vmax.f32 %v4281_v20, %v4323_v56  ;;  %v1395_v7 = vpack.c.bf16 %v4323_v56, %v4323_v56  ;;  %v4753_v56 = vld [vmem:[#allocation11_spill] sm:$0xff] }
 0x34e   :  { %1621 = vmatmul.mubr.bf16.vlgmr.msra.gmra.mrb[28].mxu0 %v1395_v7  ;;  %1662 = vmatmul.mubr.bf16.vlgmr.msra.gmra.mrb[28].mxu1 %v1395_v7 }
 0x34f   :  { %1937 = vmatprep.mubr.bf16.mxu0 %v4747_v48  ;;  %1978 = vmatprep.mubr.bf16.mxu1 %v4747_v48 }
 0x350   :  { %1906 = vmatpush1.bf16.msra.mxu0 %v4344_v55  ;;  %1947 = vmatpush1.bf16.msra.mxu1 %v4349_v23 }
 0x351   :  { %1907 = vmatprep.subr.bf16.mxu0 %v4358_v22  ;;  %1948 = vmatprep.subr.bf16.mxu1 %v4363_v24 }
 0x354   :  { %1908 = vmatpush1.bf16.msra.mxu0 %v4368_v26  ;;  %1949 = vmatpush1.bf16.msra.mxu1 %v4373_v25 }
 0x355   :  { %1909 = vmatprep.subr.bf16.mxu0 %v4382_v27  ;;  %1950 = vmatprep.subr.bf16.mxu1 %v4387_v1 }
 0x358   :  { %1910 = vmatpush1.bf16.msra.mxu0 %v4392_v35  ;;  %1951 = vmatpush1.bf16.msra.mxu1 %v4397_v36 }
 0x359   :  { %1911 = vmatprep.subr.bf16.mxu0 %v4406_v28  ;;  %1952 = vmatprep.subr.bf16.mxu1 %v4411_v29 }
 0x35c   :  { %1912 = vmatpush1.bf16.msra.mxu0 %v4416_v32  ;;  %1953 = vmatpush1.bf16.msra.mxu1 %v4421_v34 }
 0x35d   :  { %1913 = vmatprep.subr.bf16.mxu0 %v4430_v44  ;;  %1954 = vmatprep.subr.bf16.mxu1 %v4435_v37 }
 0x360   :  { %1914 = vmatpush1.bf16.msra.mxu0 %v4440_v45  ;;  %1955 = vmatpush1.bf16.msra.mxu1 %v4445_v17 }
 0x361   :  { %1915 = vmatprep.subr.bf16.mxu0 %v4452_v4  ;;  %1956 = vmatprep.subr.bf16.mxu1 %v4469_v61 }
 0x364   :  { %1916 = vmatpush1.bf16.msra.mxu0 %v4459_v33  ;;  %1957 = vmatpush1.bf16.msra.mxu1 %v4464_v19 }
 0x365   :  { %1917 = vmatprep.subr.bf16.mxu0 %v4475_v30  ;;  %1958 = vmatprep.subr.bf16.mxu1 %v4480_v21 }
 0x368   :  { %1918 = vmatpush1.bf16.msra.mxu0 %v4488_v14  ;;  %1959 = vmatpush1.bf16.msra.mxu1 %v4493_v16 }
 0x369   :  { %1919 = vmatprep.subr.bf16.mxu0 %v4500_v31  ;;  %1960 = vmatprep.subr.bf16.mxu1 %v4505_v38 }
 0x36c   :  { %1920 = vmatpush1.bf16.msra.mxu0 %v4512_v39  ;;  %1961 = vmatpush1.bf16.msra.mxu1 %v4517_v40 }
 0x36d   :  { %2222 = vmatprep.subr.bf16.mxu0 %v4334_v15  ;;  %2263 = vmatprep.subr.bf16.mxu1 %v4339_v18 }
 0x421   :  { %v1622_v41 = vpop.f32.mrb[28].mxu0  ;;  %v1663_v42 = vpop.f32.mrb[28].mxu1 }
 0x422   :  { %v1670_v46 = vadd.f32 %v1622_v41, %v4749_v43  ;;  %v1672_v49 = vadd.f32 %v1663_v42, %v4750_v47  ;;  %v1624_v50 = vpop.f32.mrb[29].mxu0  ;;  %v1665_v51 = vpop.f32.mrb[29].mxu1 }
 0x423   :  { %v1671_v53 = vadd.f32 %v1624_v50, %v4751_v52  ;;  %v1673_v57 = vadd.f32 %v1665_v51, %v4752_v54  ;;  %v1626_v58 = vpop.f32.mrb[30].mxu0  ;;  %v1667_v59 = vpop.f32.mrb[30].mxu1 }
 0x424   :  { %v3280_v60 = vmul.f32 -1.442695, %v1670_v46  ;;  %v1627_v62 = vpop.f32.mrb[31].mxu0  ;;  %v1668_v63 = vpop.f32.mrb[31].mxu1  ;;  %v4755_v59 = vld [vmem:[#allocation13_spill] sm:$0xff] }
 0x425   :  { %v3281_v0 = vmul.f32 -1.442695, %v1671_v53  ;;  %v3282_v2 = vmul.f32 -1.442695, %v1673_v57  ;;  %v4754_v53 = vld [vmem:[#allocation12_spill] sm:$0xff]  ;;  %v4756_v62 = vld [vmem:[#allocation14_spill] sm:$0xff] }
 0x426   :  { %3665 = vpow2.f32 %v3280_v60 }
 0x427   :  { %3667 = vpow2.f32 %v3281_v0 }
 0x428   :  { %3669 = vpow2.f32 %v3282_v2 }
 0x429   :  { %3671 = vtanh.f32 %v1672_v49 }
 0x430   :  { %v3666_v5 = vpop.eup %3665 }
 0x431   :  { %v3668_v6 = vpop.eup %3667  ;;  %v1677_v8 = vadd.f32 1.0, %v3666_v5 }
 0x432   :  { %v1683_v9 = vadd.f32 1.0, %v3668_v6  ;;  %v3670_v10 = vpop.eup %3669 }
 0x433   :  { %3673 = vrcp.f32 %v1677_v8  ;;  %v3672_v12 = vpop.eup %3671  ;;  %v1690_v42 = vadd.f32 1.0, %v3670_v10 }
 0x434   :  { %3675 = vrcp.f32 %v1683_v9 }
 0x435   :  { %3677 = vrcp.f32 %v1690_v42 }
 0x43d   :  { %v3674_v13 = vpop.eup %3673 }
 0x43e   :  { %v3676_v7 = vpop.eup %3675  ;;  %v1694_v41 = vmul.f32 %v3674_v13, %v3672_v12 }
 0x43f   :  { %v1693_v43 = vmul.f32 %v3676_v7, %v4320_v11  ;;  %v3678_v47 = vpop.eup %3677 }
 0x441   :  { %v4530_v46 = vadd.f32 %v1694_v41, %v1693_v43 }
 0x443   :  { %3679 = vtanh.f32 %v4530_v46 }
 0x44d   :  { %v3680_v50 = vpop.eup %3679 }
 0x44e   :  { %v1697_v51 = vmul.f32 %v3680_v50, %v3678_v47 }
 0x450   :  { %v4536_v49 = vmax.f32 %v1384_v3, %v1697_v51  ;;  %v1712_v52 = vpack.c.bf16 %v1697_v51, %v1697_v51 }
 0x452   :  { %1938 = vmatmul.mubr.bf16.vlgmr.msra.gmra.mrb[32].mxu0 %v1712_v52  ;;  %1979 = vmatmul.mubr.bf16.vlgmr.msra.gmra.mrb[32].mxu1 %v1712_v52 }
 0x453   :  { %2223 = vmatpush1.bf16.msra.mxu0 %v4344_v55  ;;  %2264 = vmatpush1.bf16.msra.mxu1 %v4349_v23 }
 0x454   :  { %2224 = vmatprep.subr.bf16.mxu0 %v4358_v22  ;;  %2265 = vmatprep.subr.bf16.mxu1 %v4363_v24 }
 0x455   :  { %2254 = vmatprep.mubr.bf16.mxu0 %v4747_v48  ;;  %2295 = vmatprep.mubr.bf16.mxu1 %v4747_v48 }
 0x457   :  { %2225 = vmatpush1.bf16.msra.mxu0 %v4368_v26  ;;  %2266 = vmatpush1.bf16.msra.mxu1 %v4373_v25 }
 0x458   :  { %2226 = vmatprep.subr.bf16.mxu0 %v4382_v27  ;;  %2267 = vmatprep.subr.bf16.mxu1 %v4387_v1 }
 0x45b   :  { %2227 = vmatpush1.bf16.msra.mxu0 %v4392_v35  ;;  %2268 = vmatpush1.bf16.msra.mxu1 %v4397_v36 }
 0x45c   :  { %2228 = vmatprep.subr.bf16.mxu0 %v4406_v28  ;;  %2269 = vmatprep.subr.bf16.mxu1 %v4411_v29 }
 0x45f   :  { %2229 = vmatpush1.bf16.msra.mxu0 %v4416_v32  ;;  %2270 = vmatpush1.bf16.msra.mxu1 %v4421_v34 }
 0x460   :  { %2230 = vmatprep.subr.bf16.mxu0 %v4430_v44  ;;  %2271 = vmatprep.subr.bf16.mxu1 %v4435_v37 }
 0x463   :  { %2231 = vmatpush1.bf16.msra.mxu0 %v4440_v45  ;;  %2272 = vmatpush1.bf16.msra.mxu1 %v4445_v17 }
 0x464   :  { %2232 = vmatprep.subr.bf16.mxu0 %v4452_v4  ;;  %2273 = vmatprep.subr.bf16.mxu1 %v4469_v61 }
 0x467   :  { %2233 = vmatpush1.bf16.msra.mxu0 %v4459_v33  ;;  %2274 = vmatpush1.bf16.msra.mxu1 %v4464_v19 }
 0x468   :  { %2234 = vmatprep.subr.bf16.mxu0 %v4475_v30  ;;  %2275 = vmatprep.subr.bf16.mxu1 %v4480_v21 }
 0x46b   :  { %2235 = vmatpush1.bf16.msra.mxu0 %v4488_v14  ;;  %2276 = vmatpush1.bf16.msra.mxu1 %v4493_v16 }
 0x46c   :  { %2236 = vmatprep.subr.bf16.mxu0 %v4500_v31  ;;  %2277 = vmatprep.subr.bf16.mxu1 %v4505_v38 }
 0x46f   :  { %2237 = vmatpush1.bf16.msra.mxu0 %v4512_v39  ;;  %2278 = vmatpush1.bf16.msra.mxu1 %v4517_v40 }
 0x470   :  { %2539 = vmatprep.subr.bf16.mxu0 %v4334_v15  ;;  %2580 = vmatprep.subr.bf16.mxu1 %v4339_v18 }
 0x525   :  { %v1939_v20 = vpop.f32.mrb[32].mxu0  ;;  %v1980_v11 = vpop.f32.mrb[32].mxu1 }
 0x526   :  { %v1987_v3 = vadd.f32 %v1939_v20, %v4753_v56  ;;  %v1989_v54 = vadd.f32 %v1980_v11, %v4754_v53  ;;  %v1941_v57 = vpop.f32.mrb[33].mxu0  ;;  %v1982_v58 = vpop.f32.mrb[33].mxu1 }
 0x527   :  { %v1988_v60 = vadd.f32 %v1941_v57, %v4755_v59  ;;  %v1990_v63 = vadd.f32 %v1982_v58, %v4756_v62  ;;  %v1943_v0 = vpop.f32.mrb[34].mxu0  ;;  %v1984_v2 = vpop.f32.mrb[34].mxu1  ;;  %v4757_v59 = vld [vmem:[#allocation15_spill] sm:$0xff]  ;;  %v4758_v62 = vld [vmem:[#allocation16_spill] sm:$0xff] }
 0x528   :  { %v3315_v5 = vmul.f32 -1.442695, %v1987_v3  ;;  %v1944_v6 = vpop.f32.mrb[35].mxu0  ;;  %v1985_v8 = vpop.f32.mrb[35].mxu1 }
 0x529   :  { %v3316_v9 = vmul.f32 -1.442695, %v1988_v60  ;;  %v3317_v10 = vmul.f32 -1.442695, %v1990_v63  ;;  %v4760_v8 = vld [vmem:[#allocation18_spill] sm:$0xff] }
 0x52a   :  { %3681 = vpow2.f32 %v3315_v5  ;;  %v4759_v5 = vld [vmem:[#allocation17_spill] sm:$0xff] }
 0x52b   :  { %3683 = vpow2.f32 %v3316_v9 }
 0x52c   :  { %3685 = vpow2.f32 %v3317_v10 }
 0x52d   :  { %3687 = vtanh.f32 %v1989_v54 }
 0x534   :  { %v3682_v12 = vpop.eup %3681 }
 0x535   :  { %v3684_v13 = vpop.eup %3683  ;;  %v1994_v7 = vadd.f32 1.0, %v3682_v12 }
 0x536   :  { %v2000_v41 = vadd.f32 1.0, %v3684_v13  ;;  %v3686_v42 = vpop.eup %3685 }
 0x537   :  { %3689 = vrcp.f32 %v1994_v7  ;;  %v3688_v43 = vpop.eup %3687  ;;  %v2007_v52 = vadd.f32 1.0, %v3686_v42 }
 0x538   :  { %3691 = vrcp.f32 %v2000_v41 }
 0x539   :  { %3693 = vrcp.f32 %v2007_v52 }
 0x541   :  { %v3690_v47 = vpop.eup %3689 }
 0x542   :  { %v3692_v50 = vpop.eup %3691  ;;  %v2011_v51 = vmul.f32 %v3690_v47, %v3688_v43 }
 0x543   :  { %v2010_v20 = vmul.f32 %v3692_v50, %v4530_v46  ;;  %v3694_v56 = vpop.eup %3693 }
 0x545   :  { %v4577_v11 = vadd.f32 %v2011_v51, %v2010_v20 }
 0x547   :  { %3695 = vtanh.f32 %v4577_v11 }
 0x551   :  { %v3696_v3 = vpop.eup %3695 }
 0x552   :  { %v4580_v53 = vmul.f32 %v3696_v3, %v3694_v56 }
 0x554   :  { %v2018_v54 = vmax.f32 %v4536_v49, %v4580_v53  ;;  %v2029_v57 = vpack.c.bf16 %v4580_v53, %v4580_v53 }
 0x556   :  { %2255 = vmatmul.mubr.bf16.vlgmr.msra.gmra.mrb[36].mxu0 %v2029_v57  ;;  %2296 = vmatmul.mubr.bf16.vlgmr.msra.gmra.mrb[36].mxu1 %v2029_v57 }
 0x557   :  { %2540 = vmatpush1.bf16.msra.mxu0 %v4344_v55  ;;  %2581 = vmatpush1.bf16.msra.mxu1 %v4349_v23 }
 0x558   :  { %2541 = vmatprep.subr.bf16.mxu0 %v4358_v22  ;;  %2582 = vmatprep.subr.bf16.mxu1 %v4363_v24 }
 0x559   :  { %2571 = vmatprep.mubr.bf16.mxu0 %v4747_v48  ;;  %2612 = vmatprep.mubr.bf16.mxu1 %v4747_v48 }
 0x55b   :  { %2542 = vmatpush1.bf16.msra.mxu0 %v4368_v26  ;;  %2583 = vmatpush1.bf16.msra.mxu1 %v4373_v25 }
 0x55c   :  { %2543 = vmatprep.subr.bf16.mxu0 %v4382_v27  ;;  %2584 = vmatprep.subr.bf16.mxu1 %v4387_v1 }
 0x55f   :  { %2544 = vmatpush1.bf16.msra.mxu0 %v4392_v35  ;;  %2585 = vmatpush1.bf16.msra.mxu1 %v4397_v36 }
 0x560   :  { %2545 = vmatprep.subr.bf16.mxu0 %v4406_v28  ;;  %2586 = vmatprep.subr.bf16.mxu1 %v4411_v29 }
 0x563   :  { %2546 = vmatpush1.bf16.msra.mxu0 %v4416_v32  ;;  %2587 = vmatpush1.bf16.msra.mxu1 %v4421_v34 }
 0x564   :  { %2547 = vmatprep.subr.bf16.mxu0 %v4430_v44  ;;  %2588 = vmatprep.subr.bf16.mxu1 %v4435_v37 }
 0x567   :  { %2548 = vmatpush1.bf16.msra.mxu0 %v4440_v45  ;;  %2589 = vmatpush1.bf16.msra.mxu1 %v4445_v17 }
 0x568   :  { %2549 = vmatprep.subr.bf16.mxu0 %v4452_v4  ;;  %2590 = vmatprep.subr.bf16.mxu1 %v4469_v61 }
 0x56b   :  { %2550 = vmatpush1.bf16.msra.mxu0 %v4459_v33  ;;  %2591 = vmatpush1.bf16.msra.mxu1 %v4464_v19 }
 0x56c   :  { %2551 = vmatprep.subr.bf16.mxu0 %v4475_v30  ;;  %2592 = vmatprep.subr.bf16.mxu1 %v4480_v21 }
 0x56f   :  { %2552 = vmatpush1.bf16.msra.mxu0 %v4488_v14  ;;  %2593 = vmatpush1.bf16.msra.mxu1 %v4493_v16 }
 0x570   :  { %2553 = vmatprep.subr.bf16.mxu0 %v4500_v31  ;;  %2594 = vmatprep.subr.bf16.mxu1 %v4505_v38 }
 0x573   :  { %2554 = vmatpush1.bf16.msra.mxu0 %v4512_v39  ;;  %2595 = vmatpush1.bf16.msra.mxu1 %v4517_v40 }
 0x574   :  { %2856 = vmatprep.subr.bf16.mxu0 %v4334_v15  ;;  %2897 = vmatprep.subr.bf16.mxu1 %v4339_v18 }
 0x629   :  { %v2256_v46 = vpop.f32.mrb[36].mxu0  ;;  %v2297_v58 = vpop.f32.mrb[36].mxu1 }
 0x62a   :  { %v2304_v60 = vadd.f32 %v2256_v46, %v4757_v59  ;;  %v2306_v63 = vadd.f32 %v2297_v58, %v4758_v62  ;;  %v2258_v0 = vpop.f32.mrb[37].mxu0  ;;  %v2299_v2 = vpop.f32.mrb[37].mxu1 }
 0x62b   :  { %v2305_v6 = vadd.f32 %v2258_v0, %v4759_v5  ;;  %v2307_v9 = vadd.f32 %v2299_v2, %v4760_v8  ;;  %v2260_v10 = vpop.f32.mrb[38].mxu0  ;;  %v2301_v12 = vpop.f32.mrb[38].mxu1  ;;  %v3609_v5 = vld [vmem:[%s4721_s4] sm:$0xff]   ;;  %v3610_v8 = vld [vmem:[%s4721_s4 + $0x8] sm:$0xff]  }
 0x62c   :  { %v3350_v13 = vmul.f32 -1.442695, %v2304_v60  ;;  %v2261_v7 = vpop.f32.mrb[39].mxu0  ;;  %v2302_v41 = vpop.f32.mrb[39].mxu1  ;;  %v3612_v10 = vld [vmem:[%s4721_s4 + $0x18] sm:$0xff]   ;;  %v3613_v12 = vld [vmem:[%s4721_s4 + $0x20] sm:$0xff]  }
 0x62d   :  { %v3351_v15 = vmul.f32 -1.442695, %v2305_v6  ;;  %v3352_v18 = vmul.f32 -1.442695, %v2307_v9  ;;  %v3751_v6 = vmov 0.0   ;;  %v3611_v9 = vld [vmem:[%s4721_s4 + $0x10] sm:$0xff]  }
 0x62e   :  { %3697 = vpow2.f32 %v3350_v13  ;;  %v3614_v13 = vld [vmem:[%s4721_s4 + $0x28] sm:$0xff]   ;;  %v3615_v7 = vld [vmem:[%s4721_s4 + $0x30] sm:$0xff]   ;;  %v3616_v41 = vld [vmem:[%s4721_s4 + $0x38] sm:$0xff]  }
 0x62f   :  { %3699 = vpow2.f32 %v3351_v15 }
 0x630   :  { %3701 = vpow2.f32 %v3352_v18 }
 0x631   :  { %3703 = vtanh.f32 %v2306_v63 }
 0x638   :  { %v3698_v42 = vpop.eup %3697 }
 0x639   :  { %v3700_v43 = vpop.eup %3699  ;;  %v2311_v47 = vadd.f32 1.0, %v3698_v42  ;;  %v4765_v42 = vld [vmem:[#allocation23_spill] sm:$0xff] }
 0x63a   :  { %v2317_v50 = vadd.f32 1.0, %v3700_v43  ;;  %v3702_v51 = vpop.eup %3701 }
 0x63b   :  { %3705 = vrcp.f32 %v2311_v47  ;;  %v3704_v52 = vpop.eup %3703  ;;  %v2324_v57 = vadd.f32 1.0, %v3702_v51  ;;  %v4766_v47 = vld [vmem:[#allocation24_spill] sm:$0xff] }
 0x63c   :  { %3707 = vrcp.f32 %v2317_v50 }
 0x63d   :  { %3709 = vrcp.f32 %v2324_v57 }
 0x645   :  { %v3706_v20 = vpop.eup %3705 }
 0x646   :  { %v3708_v56 = vpop.eup %3707  ;;  %v2328_v3 = vmul.f32 %v3706_v20, %v3704_v52  ;;  %v4767_v20 = vld [vmem:[#allocation25_spill] sm:$0xff] }
 0x647   :  { %v2327_v46 = vmul.f32 %v3708_v56, %v4577_v11  ;;  %v3710_v59 = vpop.eup %3709 }
 0x649   :  { %v4625_v58 = vadd.f32 %v2328_v3, %v2327_v46  ;;  %v4768_v3 = vld [vmem:[#allocation26_spill] sm:$0xff] }
 0x64b   :  { %3711 = vtanh.f32 %v4625_v58 }
 0x655   :  { %v3712_v60 = vpop.eup %3711 }
 0x656   :  { %v2331_v62 = vmul.f32 %v3712_v60, %v3710_v59 }
 0x658   :  { %v4631_v63 = vmax.f32 %v2018_v54, %v2331_v62  ;;  %v2346_v0 = vpack.c.bf16 %v2331_v62, %v2331_v62 }
 0x65a   :  { %2572 = vmatmul.mubr.bf16.vlgmr.msra.gmra.mrb[40].mxu0 %v2346_v0  ;;  %2613 = vmatmul.mubr.bf16.vlgmr.msra.gmra.mrb[40].mxu1 %v2346_v0 }
 0x65b   :  { %2857 = vmatpush1.bf16.msra.mxu0 %v4344_v55  ;;  %2898 = vmatpush1.bf16.msra.mxu1 %v4349_v23  ;;  %v4761_v23 = vld [vmem:[#allocation19_spill] sm:$0xff] }
 0x65c   :  { %2858 = vmatprep.subr.bf16.mxu0 %v4358_v22  ;;  %2899 = vmatprep.subr.bf16.mxu1 %v4363_v24  ;;  %v4762_v24 = vld [vmem:[#allocation20_spill] sm:$0xff] }
 0x65d   :  { %2888 = vmatprep.mubr.bf16.mxu0 %v4747_v48  ;;  %2929 = vmatprep.mubr.bf16.mxu1 %v4747_v48 }
 0x65f   :  { %2859 = vmatpush1.bf16.msra.mxu0 %v4368_v26  ;;  %2900 = vmatpush1.bf16.msra.mxu1 %v4373_v25 }
 0x660   :  { %2860 = vmatprep.subr.bf16.mxu0 %v4382_v27  ;;  %2901 = vmatprep.subr.bf16.mxu1 %v4387_v1  ;;  %v4763_v1 = vld [vmem:[#allocation21_spill] sm:$0xff] }
 0x663   :  { %2861 = vmatpush1.bf16.msra.mxu0 %v4392_v35  ;;  %2902 = vmatpush1.bf16.msra.mxu1 %v4397_v36  ;;  %v4764_v36 = vld [vmem:[#allocation22_spill] sm:$0xff] }
 0x664   :  { %2862 = vmatprep.subr.bf16.mxu0 %v4406_v28  ;;  %2903 = vmatprep.subr.bf16.mxu1 %v4411_v29 }
 0x667   :  { %2863 = vmatpush1.bf16.msra.mxu0 %v4416_v32  ;;  %2904 = vmatpush1.bf16.msra.mxu1 %v4421_v34 }
 0x668   :  { %2864 = vmatprep.subr.bf16.mxu0 %v4430_v44  ;;  %2905 = vmatprep.subr.bf16.mxu1 %v4435_v37 }
 0x66b   :  { %2865 = vmatpush1.bf16.msra.mxu0 %v4440_v45  ;;  %2906 = vmatpush1.bf16.msra.mxu1 %v4445_v17 }
 0x66c   :  { %2866 = vmatprep.subr.bf16.mxu0 %v4452_v4  ;;  %2907 = vmatprep.subr.bf16.mxu1 %v4469_v61 }
 0x66f   :  { %2867 = vmatpush1.bf16.msra.mxu0 %v4459_v33  ;;  %2908 = vmatpush1.bf16.msra.mxu1 %v4464_v19 }
 0x670   :  { %2868 = vmatprep.subr.bf16.mxu0 %v4475_v30  ;;  %2909 = vmatprep.subr.bf16.mxu1 %v4480_v21 }
 0x673   :  { %2869 = vmatpush1.bf16.msra.mxu0 %v4488_v14  ;;  %2910 = vmatpush1.bf16.msra.mxu1 %v4493_v16 }
 0x674   :  { %2870 = vmatprep.subr.bf16.mxu0 %v4500_v31  ;;  %2911 = vmatprep.subr.bf16.mxu1 %v4505_v38 }
 0x677   :  { %2871 = vmatpush1.bf16.msra.mxu0 %v4512_v39  ;;  %2912 = vmatpush1.bf16.msra.mxu1 %v4517_v40 }
 0x678   :  { %3441 = vmatprep.subr.bf16.mxu0 %v3751_v6 }
 0x72d   :  { %v2573_v48 = vpop.f32.mrb[40].mxu0  ;;  %v2614_v55 = vpop.f32.mrb[40].mxu1 }
 0x72e   :  { %v2621_v22 = vadd.f32 %v2573_v48, %v4761_v23  ;;  %v2623_v26 = vadd.f32 %v2614_v55, %v4762_v24  ;;  %v2575_v25 = vpop.f32.mrb[41].mxu0  ;;  %v2616_v27 = vpop.f32.mrb[41].mxu1 }
 0x72f   :  { %v2622_v35 = vadd.f32 %v2575_v25, %v4763_v1  ;;  %v2624_v28 = vadd.f32 %v2616_v27, %v4764_v36  ;;  %v2577_v29 = vpop.f32.mrb[42].mxu0  ;;  %v2618_v32 = vpop.f32.mrb[42].mxu1 }
 0x730   :  { %v3385_v34 = vmul.f32 -1.442695, %v2621_v22  ;;  %v2578_v44 = vpop.f32.mrb[43].mxu0  ;;  %v2619_v37 = vpop.f32.mrb[43].mxu1 }
 0x731   :  { %v3386_v45 = vmul.f32 -1.442695, %v2622_v35  ;;  %v3387_v17 = vmul.f32 -1.442695, %v2624_v28 }
 0x732   :  { %3713 = vpow2.f32 %v3385_v34 }
 0x733   :  { %3715 = vpow2.f32 %v3386_v45 }
 0x734   :  { %3717 = vpow2.f32 %v3387_v17  ;;  %v3423_v17 = vld [vmem:[%s4722_s5] ss:$0 sm:$0xff] }
 0x735   :  { %3719 = vtanh.f32 %v2623_v26 }
 0x73c   :  { %v3714_v4 = vpop.eup %3713 }
 0x73d   :  { %v3716_v33 = vpop.eup %3715  ;;  %v2628_v19 = vadd.f32 1.0, %v3714_v4 }
 0x73e   :  { %v2634_v61 = vadd.f32 1.0, %v3716_v33  ;;  %v3718_v30 = vpop.eup %3717 }
 0x73f   :  { %3721 = vrcp.f32 %v2628_v19  ;;  %v3720_v21 = vpop.eup %3719  ;;  %v2641_v38 = vadd.f32 1.0, %v3718_v30 }
 0x740   :  { %3723 = vrcp.f32 %v2634_v61 }
 0x741   :  { %3725 = vrcp.f32 %v2641_v38 }
 0x749   :  { %v3722_v14 = vpop.eup %3721 }
 0x74a   :  { %v3724_v16 = vpop.eup %3723  ;;  %v2645_v31 = vmul.f32 %v3722_v14, %v3720_v21 }
 0x74b   :  { %v2644_v39 = vmul.f32 %v3724_v16, %v4625_v58  ;;  %v3726_v49 = vpop.eup %3725 }
 0x74d   :  { %v4670_v40 = vadd.f32 %v2645_v31, %v2644_v39 }
 0x74f   :  { %3727 = vtanh.f32 %v4670_v40 }
 0x759   :  { %v3728_v11 = vpop.eup %3727 }
 0x75a   :  { %v4673_v53 = vmul.f32 %v3728_v11, %v3726_v49 }
 0x75c   :  { %v2663_v54 = vpack.c.bf16 %v4673_v53, %v4673_v53  ;;  %v2652_v2 = vmax.f32 %v4631_v63, %v4673_v53 }
 0x75e   :  { %2889 = vmatmul.mubr.bf16.vlgmr.msra.gmra.mrb[44].mxu0 %v2663_v54  ;;  %2930 = vmatmul.mubr.bf16.vlgmr.msra.gmra.mrb[44].mxu1 %v2663_v54 }
 0x75f   :  { %3442 = vmatpush3.bf16.msra.mxu0 %v3609_v5  ;;  %3457 = vmatprep.mubr.msk.bf16.mxu0 %vm3752_vm0, %v3751_v6 }
 0x760   :  { %3443 = vmatprep.subr.bf16.mxu0 %v3751_v6 }
 0x763   :  { %3444 = vmatpush3.bf16.msra.mxu0 %v3610_v8 }
 0x764   :  { %3445 = vmatprep.subr.bf16.mxu0 %v3751_v6 }
 0x767   :  { %3446 = vmatpush3.bf16.msra.mxu0 %v3611_v9 }
 0x768   :  { %3447 = vmatprep.subr.bf16.mxu0 %v3751_v6 }
 0x76b   :  { %3448 = vmatpush3.bf16.msra.mxu0 %v3612_v10 }
 0x76c   :  { %3449 = vmatprep.subr.bf16.mxu0 %v3751_v6 }
 0x76f   :  { %3450 = vmatpush3.bf16.msra.mxu0 %v3613_v12 }
 0x770   :  { %3451 = vmatprep.subr.bf16.mxu0 %v3751_v6 }
 0x773   :  { %3452 = vmatpush3.bf16.msra.mxu0 %v3614_v13 }
 0x774   :  { %3453 = vmatprep.subr.bf16.mxu0 %v3751_v6 }
 0x777   :  { %3454 = vmatpush3.bf16.msra.mxu0 %v3615_v7 }
 0x778   :  { %3455 = vmatprep.subr.bf16.mxu0 %v3751_v6 }
 0x77b   :  { %3456 = vmatpush3.bf16.msra.mxu0 %v3616_v41 }
 0x831   :  { %v2890_v15 = vpop.f32.mrb[44].mxu0  ;;  %v2931_v18 = vpop.f32.mrb[44].mxu1 }
 0x832   :  { %v2938_v43 = vadd.f32 %v2890_v15, %v4765_v42  ;;  %v2940_v50 = vadd.f32 %v2931_v18, %v4766_v47  ;;  %v2892_v51 = vpop.f32.mrb[45].mxu0  ;;  %v2933_v52 = vpop.f32.mrb[45].mxu1 }
 0x833   :  { %v2939_v56 = vadd.f32 %v2892_v51, %v4767_v20  ;;  %v2941_v57 = vadd.f32 %v2933_v52, %v4768_v3  ;;  %v2894_v46 = vpop.f32.mrb[46].mxu0  ;;  %v2935_v58 = vpop.f32.mrb[46].mxu1 }
 0x834   :  { %v3420_v59 = vmul.f32 -1.442695, %v2938_v43  ;;  %v2895_v60 = vpop.f32.mrb[47].mxu0  ;;  %v2936_v62 = vpop.f32.mrb[47].mxu1 }
 0x835   :  { %v3421_v0 = vmul.f32 -1.442695, %v2939_v56  ;;  %v3422_v48 = vmul.f32 -1.442695, %v2941_v57 }
 0x836   :  { %3729 = vpow2.f32 %v3420_v59 }
 0x837   :  { %3731 = vpow2.f32 %v3421_v0 }
 0x838   :  { %3733 = vpow2.f32 %v3422_v48 }
 0x839   :  { %3735 = vtanh.f32 %v2940_v50 }
 0x840   :  { %v3730_v55 = vpop.eup %3729 }
 0x841   :  { %v3732_v23 = vpop.eup %3731  ;;  %v2945_v22 = vadd.f32 1.0, %v3730_v55 }
 0x842   :  { %v2951_v24 = vadd.f32 1.0, %v3732_v23  ;;  %v3734_v26 = vpop.eup %3733 }
 0x843   :  { %3737 = vrcp.f32 %v2945_v22  ;;  %v3736_v25 = vpop.eup %3735  ;;  %v2958_v36 = vadd.f32 1.0, %v3734_v26 }
 0x844   :  { %3739 = vrcp.f32 %v2951_v24 }
 0x845   :  { %3741 = vrcp.f32 %v2958_v36 }
 0x84d   :  { %v3738_v27 = vpop.eup %3737 }
 0x84e   :  { %v3740_v1 = vpop.eup %3739  ;;  %v2962_v35 = vmul.f32 %v3738_v27, %v3736_v25 }
 0x84f   :  { %v2961_v28 = vmul.f32 %v3740_v1, %v4670_v40  ;;  %v3742_v32 = vpop.eup %3741 }
 0x851   :  { %v2963_v29 = vadd.f32 %v2962_v35, %v2961_v28 }
 0x853   :  { %3743 = vtanh.f32 %v2963_v29 }
 0x85d   :  { %v3744_v34 = vpop.eup %3743 }
 0x85e   :  { %v2965_v44 = vmul.f32 %v3744_v34, %v3742_v32 }
 0x860   :  { %v2969_v37 = vmax.f32 %v2652_v2, %v2965_v44 }
 0x862   :  { %v2975_v45 = vpack.c.bf16 %v2969_v37, %v2969_v37 }
 0x864   :  { %3458 = vmatmul.mubr.bf16.vlgmr.msra.gmra.mrb[48].mxu0 %v2975_v45 }
 0x937   :  { %v3081_v4 = vpop.f32.mrb[48].mxu0 }
 0x938   :  { %v3082_v33 = vadd.f32 %v3423_v17, %v3081_v4  ;;  %v3459_v19 = vpop.f32.mrb[49].mxu0 }
 0x939   :  { %v3084_v61 = vpop.f32.mrb[50].mxu0 }
 0x93a   :  { %3087 = vmax.xlane.f32.xlu0 %v3082_v33  ;;  %v3460_v30 = vpop.f32.mrb[51].mxu0 }
 0x9c7   :  { %v3088_v21 = vpop.xlane.xlu0 %3087 }
 0x9c8   :  { %v3089_v14 = vsub.f32 %v3082_v33, %v3088_v21 }
 0x9ca   :  { %v3090_v16 = vmul.f32 1.442695, %v3089_v14 }
 0x9cc   :  { %3745 = vpow2.f32 %v3090_v16 }
 0x9d6   :  { %v3746_v31 = vpop.eup %3745 }
 0x9d7   :  { %3092 = vadd.xlane.f32.xlu0 %v3746_v31 }
 0xa64   :  { %v3093_v63 = vpop.xlane.xlu0 %3092 }
 0xa65   :  { %3747 = vrcp.f32 %v3093_v63 }
 0xa6f   :  { %v3748_v38 = vpop.eup %3747 }
 0xa70   :  { %v3095_v39 = vmul.f32 %v3748_v38, %v3093_v63 }
 0xa72   :  { %v3096_v40 = vsub.f32 2.0, %v3095_v39 }
 0xa74   :  { %v3097_v49 = vmul.f32 %v3748_v38, %v3096_v40 }
 0xa76   :  { %v3098_v11 = vmul.f32 %v3746_v31, %v3097_v49 }
 0xa78   :  { %3099 = vst [vmem:[%s4723_s6] sm:$0xff] %v3098_v11 }

// kernel: lstm_model_forward.2
= control target key start
LH: loop header
LB: loop body
LE: loop exit
PB: predicated region body
PF: predicated region fallthrough
CT: control target
= control target key end

     0   :  { %v4472_v1 = vmov 0   ;;  %s4467_s1 = inlined_call_operand.vmem [shape: bf16[128,512], index: 1, kind: input, shape index: {}]   ;;  %s4468_s2 = inlined_call_operand.vmem [shape: bf16[128,512], index: 2, kind: input, shape index: {}]   ;;  %s4469_s0 = inlined_call_operand.vmem [shape: f32[8,8,128], index: 0, kind: input, shape index: {}]   ;;  %s4470_s3 = inlined_call_operand.vmem [shape: f32[1,512], index: 3, kind: input, shape index: {}]   ;;  %s4471_s4 = inlined_call_operand.vmem [shape: f32[8,8,128], index: 4, kind: output, shape index: {}]  }
   0x1   :  { %v3287_v0 = vld [vmem:[%s4467_s1 + $0x4] ss:$16 sps:$4 sm:$0xff]   ;;  %282 = vmatprep.mubr.bf16.mxu0 %v4472_v1  ;;  %355 = vmatprep.mubr.bf16.mxu1 %v4472_v1  ;;  %v3289_v2 = vld [vmem:[%s4467_s1 + $0xc] ss:$16 sps:$4 sm:$0xff]   ;;  %v3291_v3 = vld [vmem:[%s4467_s1] ss:$16 sps:$4 sm:$0xff]  }
   0x2   :  { %250 = vmatprep.subr.bf16.mxu0 %v3287_v0  ;;  %v3292_v4 = vld [vmem:[%s4467_s1 + $0x8] ss:$16 sps:$4 sm:$0xff]   ;;  %323 = vmatprep.subr.bf16.mxu1 %v3289_v2  ;;  %v3293_v5 = vld [vmem:[%s4467_s1 + $0x24] ss:$16 sps:$4 sm:$0xff]   ;;  %v3295_v6 = vld [vmem:[%s4467_s1 + $0x2c] ss:$16 sps:$4 sm:$0xff]  }
   0x3   :  { %251 = vmatpush1.bf16.msra.mxu0 %v3291_v3  ;;  %324 = vmatpush1.bf16.msra.mxu1 %v3292_v4  ;;  %v3297_v7 = vld [vmem:[%s4467_s1 + $0x20] ss:$16 sps:$4 sm:$0xff]   ;;  %v3298_v8 = vld [vmem:[%s4467_s1 + $0x28] ss:$16 sps:$4 sm:$0xff]   ;;  %v3299_v9 = vld [vmem:[%s4467_s1 + $0x44] ss:$16 sps:$4 sm:$0xff]  }
   0x4   :  { %252 = vmatprep.subr.bf16.mxu0 %v3293_v5  ;;  %325 = vmatprep.subr.bf16.mxu1 %v3295_v6  ;;  %v3301_v10 = vld [vmem:[%s4467_s1 + $0x4c] ss:$16 sps:$4 sm:$0xff]   ;;  %v3303_v11 = vld [vmem:[%s4467_s1 + $0x40] ss:$16 sps:$4 sm:$0xff]   ;;  %v3304_v12 = vld [vmem:[%s4467_s1 + $0x48] ss:$16 sps:$4 sm:$0xff]  }
   0x5   :  { %v3305_v13 = vld [vmem:[%s4467_s1 + $0x64] ss:$16 sps:$4 sm:$0xff]   ;;  %v3307_v14 = vld [vmem:[%s4467_s1 + $0x6c] ss:$16 sps:$4 sm:$0xff]   ;;  %v3309_v15 = vld [vmem:[%s4467_s1 + $0x60] ss:$16 sps:$4 sm:$0xff]  }
   0x6   :  { %v3310_v16 = vld [vmem:[%s4467_s1 + $0x68] ss:$16 sps:$4 sm:$0xff]   ;;  %v3311_v17 = vld [vmem:[%s4467_s1 + $0x84] ss:$16 sps:$4 sm:$0xff]   ;;  %v3313_v18 = vld [vmem:[%s4467_s1 + $0x8c] ss:$16 sps:$4 sm:$0xff]  }
   0x7   :  { %253 = vmatpush1.bf16.msra.mxu0 %v3297_v7  ;;  %326 = vmatpush1.bf16.msra.mxu1 %v3298_v8  ;;  %v3315_v19 = vld [vmem:[%s4467_s1 + $0x80] ss:$16 sps:$4 sm:$0xff]   ;;  %v3316_v20 = vld [vmem:[%s4467_s1 + $0x88] ss:$16 sps:$4 sm:$0xff]   ;;  %v3317_v21 = vld [vmem:[%s4467_s1 + $0xa4] ss:$16 sps:$4 sm:$0xff]  }
   0x8   :  { %254 = vmatprep.subr.bf16.mxu0 %v3299_v9  ;;  %327 = vmatprep.subr.bf16.mxu1 %v3301_v10  ;;  %v3319_v22 = vld [vmem:[%s4467_s1 + $0xac] ss:$16 sps:$4 sm:$0xff]   ;;  %v3321_v23 = vld [vmem:[%s4467_s1 + $0xa0] ss:$16 sps:$4 sm:$0xff]   ;;  %v3322_v24 = vld [vmem:[%s4467_s1 + $0xa8] ss:$16 sps:$4 sm:$0xff]  }
   0x9   :  { %v3323_v25 = vld [vmem:[%s4467_s1 + $0xc4] ss:$16 sps:$4 sm:$0xff]   ;;  %v3325_v26 = vld [vmem:[%s4467_s1 + $0xcc] ss:$16 sps:$4 sm:$0xff]   ;;  %v3327_v27 = vld [vmem:[%s4467_s1 + $0xc0] ss:$16 sps:$4 sm:$0xff]  }
   0xa   :  { %v3328_v28 = vld [vmem:[%s4467_s1 + $0xc8] ss:$16 sps:$4 sm:$0xff]   ;;  %v3329_v29 = vld [vmem:[%s4467_s1 + $0xe4] ss:$16 sps:$4 sm:$0xff]   ;;  %v3331_v30 = vld [vmem:[%s4467_s1 + $0xec] ss:$16 sps:$4 sm:$0xff]  }
   0xb   :  { %255 = vmatpush1.bf16.msra.mxu0 %v3303_v11  ;;  %328 = vmatpush1.bf16.msra.mxu1 %v3304_v12  ;;  %v3333_v31 = vld [vmem:[%s4467_s1 + $0xe0] ss:$16 sps:$4 sm:$0xff]   ;;  %v3334_v32 = vld [vmem:[%s4467_s1 + $0xe8] ss:$16 sps:$4 sm:$0xff]   ;;  %v3693_v35 = vld [vmem:[%s4468_s2 + $0x4] ss:$16 sps:$4 sm:$0xff]  }
   0xc   :  { %256 = vmatprep.subr.bf16.mxu0 %v3305_v13  ;;  %329 = vmatprep.subr.bf16.mxu1 %v3307_v14  ;;  %v24_v33 = vld [vmem:[%s4469_s0] sm:$0xff]  ;;  %v25_v34 = vld [vmem:[%s4469_s0 + $0x8] sm:$0xff]  ;;  %v26_v44 = vld [vmem:[%s4469_s0 + $0x10] sm:$0xff]  ;;  %v3560_v14 = vmov 0.0|0.0  }
   0xd   :  { %v3698_v36 = vld [vmem:[%s4468_s2 + $0xc] ss:$16 sps:$4 sm:$0xff]   ;;  %v32_v37 = vpack.c.bf16 %v25_v34, %v24_v33  ;;  %v3703_v38 = vld [vmem:[%s4468_s2] ss:$16 sps:$4 sm:$0xff]   ;;  %v3708_v39 = vld [vmem:[%s4468_s2 + $0x8] ss:$16 sps:$4 sm:$0xff]  }
   0xe   :  { %v3715_v40 = vld [vmem:[%s4468_s2 + $0x24] ss:$16 sps:$4 sm:$0xff]   ;;  %v3720_v41 = vld [vmem:[%s4468_s2 + $0x2c] ss:$16 sps:$4 sm:$0xff]   ;;  %v3725_v42 = vld [vmem:[%s4468_s2 + $0x20] ss:$16 sps:$4 sm:$0xff]  }
   0xf   :  { %257 = vmatpush1.bf16.msra.mxu0 %v3309_v15  ;;  %330 = vmatpush1.bf16.msra.mxu1 %v3310_v16  ;;  %v3730_v43 = vld [vmem:[%s4468_s2 + $0x28] ss:$16 sps:$4 sm:$0xff]   ;;  %v3745_v46 = vld [vmem:[%s4468_s2 + $0x44] ss:$16 sps:$4 sm:$0xff]   ;;  %v3750_v47 = vld [vmem:[%s4468_s2 + $0x4c] ss:$16 sps:$4 sm:$0xff]   ;;  %v70_v15 = vlaneseq }
  0x10   :  { %258 = vmatprep.subr.bf16.mxu0 %v3311_v17  ;;  %331 = vmatprep.subr.bf16.mxu1 %v3313_v18  ;;  %v27_v45 = vld [vmem:[%s4469_s0 + $0x18] sm:$0xff]  ;;  %v3757_v49 = vld [vmem:[%s4468_s2 + $0x40] ss:$16 sps:$4 sm:$0xff]   ;;  %v3769_v51 = vld [vmem:[%s4468_s2 + $0x64] ss:$16 sps:$4 sm:$0xff]  }
  0x11   :  { %v33_v48 = vpack.c.bf16 %v27_v45, %v26_v44  ;;  %v3762_v50 = vld [vmem:[%s4468_s2 + $0x48] ss:$16 sps:$4 sm:$0xff]   ;;  %v3776_v52 = vld [vmem:[%s4468_s2 + $0x6c] ss:$16 sps:$4 sm:$0xff]   ;;  %v3781_v53 = vld [vmem:[%s4468_s2 + $0x60] ss:$16 sps:$4 sm:$0xff]  }
  0x12   :  { %v3786_v54 = vld [vmem:[%s4468_s2 + $0x68] ss:$16 sps:$4 sm:$0xff]   ;;  %v28_v55 = vld [vmem:[%s4469_s0 + $0x20] sm:$0xff]  ;;  %v3806_v58 = vld [vmem:[%s4468_s2 + $0x8c] ss:$16 sps:$4 sm:$0xff]   ;;  %v71_v16 = vshrl.u32 %v70_v15, 7 }
  0x13   :  { %259 = vmatpush1.bf16.msra.mxu0 %v3315_v19  ;;  %332 = vmatpush1.bf16.msra.mxu1 %v3316_v20  ;;  %v29_v56 = vld [vmem:[%s4469_s0 + $0x28] sm:$0xff]  ;;  %v3801_v57 = vld [vmem:[%s4468_s2 + $0x84] ss:$16 sps:$4 sm:$0xff]   ;;  %v3813_v59 = vld [vmem:[%s4468_s2 + $0x80] ss:$16 sps:$4 sm:$0xff]  }
  0x14   :  { %260 = vmatprep.subr.bf16.mxu0 %v3317_v21  ;;  %333 = vmatprep.subr.bf16.mxu1 %v3319_v22  ;;  %v3818_v60 = vld [vmem:[%s4468_s2 + $0x88] ss:$16 sps:$4 sm:$0xff]   ;;  %v34_v61 = vpack.c.bf16 %v29_v56, %v28_v55  ;;  %v3823_v62 = vld [vmem:[%s4468_s2 + $0xa4] ss:$16 sps:$4 sm:$0xff]   ;;  %v3828_v63 = vld [vmem:[%s4468_s2 + $0xac] ss:$16 sps:$4 sm:$0xff]  }
  0x15   :  { %v3837_v0 = vld [vmem:[%s4468_s2 + $0xa0] ss:$16 sps:$4 sm:$0xff]   ;;  %v3842_v2 = vld [vmem:[%s4468_s2 + $0xa8] ss:$16 sps:$4 sm:$0xff]   ;;  %v3853_v5 = vld [vmem:[%s4468_s2 + $0xc4] ss:$16 sps:$4 sm:$0xff]  }
  0x16   :  { %v30_v3 = vld [vmem:[%s4469_s0 + $0x30] sm:$0xff]  ;;  %v31_v4 = vld [vmem:[%s4469_s0 + $0x38] sm:$0xff]  ;;  %v80_v17 = vsub.s32 2, %v71_v16  ;;  %v84_v18 = vsub.s32 3, %v71_v16  ;;  %v72_v19 = vsub.s32 0, %v71_v16  ;;  %v76_v21 = vsub.s32 1, %v71_v16 }
  0x17   :  { %261 = vmatpush1.bf16.msra.mxu0 %v3321_v23  ;;  %334 = vmatpush1.bf16.msra.mxu1 %v3322_v24  ;;  %v3858_v6 = vld [vmem:[%s4468_s2 + $0xcc] ss:$16 sps:$4 sm:$0xff]   ;;  %v35_v7 = vpack.c.bf16 %v31_v4, %v30_v3  ;;  %v3871_v8 = vld [vmem:[%s4468_s2 + $0xc0] ss:$16 sps:$4 sm:$0xff]   ;;  %v3876_v9 = vld [vmem:[%s4468_s2 + $0xc8] ss:$16 sps:$4 sm:$0xff]  }
  0x18   :  { %262 = vmatprep.subr.bf16.mxu0 %v3323_v25  ;;  %335 = vmatprep.subr.bf16.mxu1 %v3325_v26  ;;  %v3883_v10 = vld [vmem:[%s4468_s2 + $0xe4] ss:$16 sps:$4 sm:$0xff]   ;;  %v3888_v11 = vld [vmem:[%s4468_s2 + $0xec] ss:$16 sps:$4 sm:$0xff]   ;;  %v3895_v12 = vld [vmem:[%s4468_s2 + $0xe0] ss:$16 sps:$4 sm:$0xff]  }
  0x19   :  { %v3900_v13 = vld [vmem:[%s4468_s2 + $0xe8] ss:$16 sps:$4 sm:$0xff]   ;;  %v68_v20 = vld [vmem:[%s4470_s3] sm:$0xf] }
  0x1a   :  { %v3947_v22 = vrot.slane %v68_v20, %v80_v17  ;;  %v3953_v25 = vrot.slane %v68_v20, %v84_v18  ;;  %v73_v26 = vrot.slane %v68_v20, %v72_v19 }
  0x1b   :  { %263 = vmatpush1.bf16.msra.mxu0 %v3327_v27  ;;  %336 = vmatpush1.bf16.msra.mxu1 %v3328_v28 }
  0x1c   :  { %264 = vmatprep.subr.bf16.mxu0 %v3329_v29  ;;  %337 = vmatprep.subr.bf16.mxu1 %v3331_v30  ;;  %v77_v29 = vrot.slane %v68_v20, %v76_v21 }
  0x1f   :  { %265 = vmatpush1.bf16.msra.mxu0 %v3333_v31  ;;  %338 = vmatpush1.bf16.msra.mxu1 %v3334_v32 }
  0x20   :  { %630 = vmatprep.subr.bf16.mxu0 %v3693_v35  ;;  %671 = vmatprep.subr.bf16.mxu1 %v3698_v36 }
  0x22   :  { %283 = vmatmul.mubr.bf16.vlgmr.msra.gmra.mrb[0].mxu0 %v32_v37  ;;  %356 = vmatmul.mubr.bf16.vlgmr.msra.gmra.mrb[0].mxu1 %v32_v37 }
  0x23   :  { %631 = vmatpush1.bf16.msra.mxu0 %v3703_v38  ;;  %672 = vmatpush1.bf16.msra.mxu1 %v3708_v39 }
  0x24   :  { %632 = vmatprep.subr.bf16.mxu0 %v3715_v40  ;;  %673 = vmatprep.subr.bf16.mxu1 %v3720_v41 }
  0x25   :  { %292 = vmatprep.mubr.bf16.mxu0 %v4472_v1  ;;  %365 = vmatprep.mubr.bf16.mxu1 %v4472_v1 }
  0x27   :  { %633 = vmatpush1.bf16.msra.mxu0 %v3725_v42  ;;  %674 = vmatpush1.bf16.msra.mxu1 %v3730_v43 }
  0x28   :  { %634 = vmatprep.subr.bf16.mxu0 %v3745_v46  ;;  %675 = vmatprep.subr.bf16.mxu1 %v3750_v47 }
  0x2a   :  { %293 = vmatmul.mubr.bf16.gmra.mrb[4].mxu0 %v33_v48  ;;  %366 = vmatmul.mubr.bf16.gmra.mrb[4].mxu1 %v33_v48 }
  0x2b   :  { %635 = vmatpush1.bf16.msra.mxu0 %v3757_v49  ;;  %676 = vmatpush1.bf16.msra.mxu1 %v3762_v50 }
  0x2c   :  { %636 = vmatprep.subr.bf16.mxu0 %v3769_v51  ;;  %677 = vmatprep.subr.bf16.mxu1 %v3776_v52 }
  0x2d   :  { %302 = vmatprep.mubr.bf16.mxu0 %v4472_v1  ;;  %375 = vmatprep.mubr.bf16.mxu1 %v4472_v1 }
  0x2f   :  { %637 = vmatpush1.bf16.msra.mxu0 %v3781_v53  ;;  %678 = vmatpush1.bf16.msra.mxu1 %v3786_v54 }
  0x30   :  { %638 = vmatprep.subr.bf16.mxu0 %v3801_v57  ;;  %679 = vmatprep.subr.bf16.mxu1 %v3806_v58 }
  0x32   :  { %303 = vmatmul.mubr.bf16.gmra.mrb[8].mxu0 %v34_v61  ;;  %376 = vmatmul.mubr.bf16.gmra.mrb[8].mxu1 %v34_v61 }
  0x33   :  { %639 = vmatpush1.bf16.msra.mxu0 %v3813_v59  ;;  %680 = vmatpush1.bf16.msra.mxu1 %v3818_v60 }
  0x34   :  { %640 = vmatprep.subr.bf16.mxu0 %v3823_v62  ;;  %681 = vmatprep.subr.bf16.mxu1 %v3828_v63 }
  0x35   :  { %312 = vmatprep.mubr.bf16.mxu0 %v4472_v1  ;;  %385 = vmatprep.mubr.bf16.mxu1 %v4472_v1 }
  0x37   :  { %641 = vmatpush1.bf16.msra.mxu0 %v3837_v0  ;;  %682 = vmatpush1.bf16.msra.mxu1 %v3842_v2 }
  0x38   :  { %642 = vmatprep.subr.bf16.mxu0 %v3853_v5  ;;  %683 = vmatprep.subr.bf16.mxu1 %v3858_v6 }
  0x3a   :  { %313 = vmatmul.mubr.bf16.gmra.mrb[12].mxu0 %v35_v7  ;;  %386 = vmatmul.mubr.bf16.gmra.mrb[12].mxu1 %v35_v7 }
  0x3b   :  { %643 = vmatpush1.bf16.msra.mxu0 %v3871_v8  ;;  %684 = vmatpush1.bf16.msra.mxu1 %v3876_v9 }
  0x3c   :  { %644 = vmatprep.subr.bf16.mxu0 %v3883_v10  ;;  %685 = vmatprep.subr.bf16.mxu1 %v3888_v11 }
  0x3d   :  { %662 = vmatprep.mubr.bf16.mxu0 %v4472_v1  ;;  %703 = vmatprep.mubr.bf16.mxu1 %v4472_v1 }
  0x3f   :  { %645 = vmatpush1.bf16.msra.mxu0 %v3895_v12  ;;  %686 = vmatpush1.bf16.msra.mxu1 %v3900_v13 }
  0x40   :  { %945 = vmatprep.subr.bf16.mxu0 %v3693_v35  ;;  %986 = vmatprep.subr.bf16.mxu1 %v3698_v36 }
  0x42   :  { %663 = vmatmul.mubr.bf16.vlgmr.msra.gmra.mrb[16].mxu0 %v3560_v14  ;;  %704 = vmatmul.mubr.bf16.vlgmr.msra.gmra.mrb[16].mxu1 %v3560_v14 }
  0x43   :  { %946 = vmatpush1.bf16.msra.mxu0 %v3703_v38  ;;  %987 = vmatpush1.bf16.msra.mxu1 %v3708_v39 }
  0x44   :  { %947 = vmatprep.subr.bf16.mxu0 %v3715_v40  ;;  %988 = vmatprep.subr.bf16.mxu1 %v3720_v41 }
  0x45   :  { %977 = vmatprep.mubr.bf16.mxu0 %v4472_v1  ;;  %1018 = vmatprep.mubr.bf16.mxu1 %v4472_v1 }
  0x47   :  { %948 = vmatpush1.bf16.msra.mxu0 %v3725_v42  ;;  %989 = vmatpush1.bf16.msra.mxu1 %v3730_v43 }
  0x48   :  { %949 = vmatprep.subr.bf16.mxu0 %v3745_v46  ;;  %990 = vmatprep.subr.bf16.mxu1 %v3750_v47 }
  0x4b   :  { %950 = vmatpush1.bf16.msra.mxu0 %v3757_v49  ;;  %991 = vmatpush1.bf16.msra.mxu1 %v3762_v50 }
  0x4c   :  { %951 = vmatprep.subr.bf16.mxu0 %v3769_v51  ;;  %992 = vmatprep.subr.bf16.mxu1 %v3776_v52 }
  0x4f   :  { %952 = vmatpush1.bf16.msra.mxu0 %v3781_v53  ;;  %993 = vmatpush1.bf16.msra.mxu1 %v3786_v54 }
  0x50   :  { %953 = vmatprep.subr.bf16.mxu0 %v3801_v57  ;;  %994 = vmatprep.subr.bf16.mxu1 %v3806_v58 }
  0x53   :  { %954 = vmatpush1.bf16.msra.mxu0 %v3813_v59  ;;  %995 = vmatpush1.bf16.msra.mxu1 %v3818_v60 }
  0x54   :  { %955 = vmatprep.subr.bf16.mxu0 %v3823_v62  ;;  %996 = vmatprep.subr.bf16.mxu1 %v3828_v63 }
  0x57   :  { %956 = vmatpush1.bf16.msra.mxu0 %v3837_v0  ;;  %997 = vmatpush1.bf16.msra.mxu1 %v3842_v2 }
  0x58   :  { %957 = vmatprep.subr.bf16.mxu0 %v3853_v5  ;;  %998 = vmatprep.subr.bf16.mxu1 %v3858_v6 }
  0x5b   :  { %958 = vmatpush1.bf16.msra.mxu0 %v3871_v8  ;;  %999 = vmatpush1.bf16.msra.mxu1 %v3876_v9 }
  0x5c   :  { %959 = vmatprep.subr.bf16.mxu0 %v3883_v10  ;;  %1000 = vmatprep.subr.bf16.mxu1 %v3888_v11 }
  0x5f   :  { %960 = vmatpush1.bf16.msra.mxu0 %v3895_v12  ;;  %1001 = vmatpush1.bf16.msra.mxu1 %v3900_v13 }
  0x60   :  { %1261 = vmatprep.subr.bf16.mxu0 %v3693_v35  ;;  %1302 = vmatprep.subr.bf16.mxu1 %v3698_v36 }
  0xf5   :  { %v3949_v23 = vpop.f32.mrb[0].mxu0  ;;  %v3951_v24 = vpop.f32.mrb[0].mxu1 }
  0xf6   :  { %v286_v27 = vpop.f32.mrb[1].mxu0  ;;  %v359_v28 = vpop.f32.mrb[1].mxu1 }
  0xf7   :  { %v288_v30 = vpop.f32.mrb[2].mxu0  ;;  %v361_v31 = vpop.f32.mrb[2].mxu1 }
  0xf8   :  { %v3955_v32 = vadd.f32 %v288_v30, %v73_v26  ;;  %v290_v33 = vpop.f32.mrb[3].mxu0  ;;  %v3958_v34 = vadd.f32 %v361_v31, %v3947_v22  ;;  %v363_v37 = vpop.f32.mrb[3].mxu1 }
  0xf9   :  { %v3960_v44 = vadd.f32 %v290_v33, %v77_v29  ;;  %v3963_v45 = vadd.f32 %v363_v37, %v3953_v25 }
  0xfd   :  { %v294_v48 = vpop.f32.mrb[4].mxu0  ;;  %v367_v55 = vpop.f32.mrb[4].mxu1 }
  0xfe   :  { %v3965_v56 = vadd.f32 %v294_v48, %v73_v26  ;;  %v296_v61 = vpop.f32.mrb[5].mxu0  ;;  %v3968_v3 = vadd.f32 %v367_v55, %v3947_v22  ;;  %v369_v4 = vpop.f32.mrb[5].mxu1 }
  0xff   :  { %v3970_v7 = vadd.f32 %v296_v61, %v77_v29  ;;  %v298_v14 = vpop.f32.mrb[6].mxu0  ;;  %v3973_v15 = vadd.f32 %v369_v4, %v3953_v25  ;;  %v371_v16 = vpop.f32.mrb[6].mxu1 }
 0x100   :  { %v3975_v17 = vadd.f32 %v298_v14, %v73_v26  ;;  %v300_v18 = vpop.f32.mrb[7].mxu0  ;;  %v3978_v19 = vadd.f32 %v371_v16, %v3947_v22  ;;  %v373_v20 = vpop.f32.mrb[7].mxu1 }
 0x101   :  { %4474 = vst [vmem:[#allocation5_spill] sm:$0xff] %v3973_v15  ;;  %v3980_v21 = vadd.f32 %v300_v18, %v77_v29  ;;  %v3983_v30 = vadd.f32 %v373_v20, %v3953_v25 }
 0x102   :  { %4475 = vst [vmem:[#allocation6_spill] sm:$0xff] %v3975_v17  ;;  %4476 = vst [vmem:[#allocation7_spill] sm:$0xff] %v3978_v19 }
 0x103   :  { %4477 = vst [vmem:[#allocation8_spill] sm:$0xff] %v3980_v21  ;;  %4478 = vst [vmem:[#allocation9_spill] sm:$0xff] %v3983_v30 }
 0x105   :  { %v304_v31 = vpop.f32.mrb[8].mxu0  ;;  %v377_v33 = vpop.f32.mrb[8].mxu1 }
 0x106   :  { %v3985_v37 = vadd.f32 %v304_v31, %v73_v26  ;;  %v306_v48 = vpop.f32.mrb[9].mxu0  ;;  %v3988_v55 = vadd.f32 %v377_v33, %v3947_v22  ;;  %v379_v61 = vpop.f32.mrb[9].mxu1 }
 0x107   :  { %v3990_v4 = vadd.f32 %v306_v48, %v77_v29  ;;  %v308_v14 = vpop.f32.mrb[10].mxu0  ;;  %v3993_v16 = vadd.f32 %v379_v61, %v3953_v25  ;;  %v381_v18 = vpop.f32.mrb[10].mxu1 }
 0x108   :  { %4479 = vst [vmem:[#allocation10_spill] sm:$0xff] %v3985_v37  ;;  %4480 = vst [vmem:[#allocation11_spill] sm:$0xff] %v3988_v55  ;;  %v3995_v1 = vadd.f32 %v308_v14, %v73_v26  ;;  %v310_v20 = vpop.f32.mrb[11].mxu0  ;;  %v3998_v30 = vadd.f32 %v381_v18, %v3947_v22  ;;  %v383_v31 = vpop.f32.mrb[11].mxu1 }
 0x109   :  { %4481 = vst [vmem:[#allocation12_spill] sm:$0xff] %v3990_v4  ;;  %4482 = vst [vmem:[#allocation13_spill] sm:$0xff] %v3993_v16  ;;  %v4000_v37 = vadd.f32 %v310_v20, %v77_v29  ;;  %v4003_v33 = vadd.f32 %v383_v31, %v3953_v25 }
 0x10a   :  { %4483 = vst [vmem:[#allocation14_spill] sm:$0xff] %v3995_v1  ;;  %4484 = vst [vmem:[#allocation15_spill] sm:$0xff] %v3998_v30 }
 0x10b   :  { %4485 = vst [vmem:[#allocation16_spill] sm:$0xff] %v4000_v37  ;;  %4486 = vst [vmem:[#allocation17_spill] sm:$0xff] %v4003_v33 }
 0x10d   :  { %v314_v55 = vpop.f32.mrb[12].mxu0  ;;  %v387_v48 = vpop.f32.mrb[12].mxu1 }
 0x10e   :  { %v4005_v4 = vadd.f32 %v314_v55, %v73_v26  ;;  %v316_v21 = vpop.f32.mrb[13].mxu0  ;;  %v4008_v61 = vadd.f32 %v387_v48, %v3947_v22  ;;  %v389_v14 = vpop.f32.mrb[13].mxu1 }
 0x10f   :  { %v4010_v1 = vadd.f32 %v316_v21, %v77_v29  ;;  %v318_v16 = vpop.f32.mrb[14].mxu0  ;;  %v4013_v18 = vadd.f32 %v389_v14, %v3953_v25  ;;  %v391_v20 = vpop.f32.mrb[14].mxu1  ;;  %v285_v21 = vadd.f32 %v3949_v23, %v73_v26  ;;  %v287_v14 = vadd.f32 %v286_v27, %v77_v29 }
 0x110   :  { %4487 = vst [vmem:[#allocation18_spill] sm:$0xff] %v4005_v4  ;;  %4488 = vst [vmem:[#allocation19_spill] sm:$0xff] %v4008_v61  ;;  %v4015_v37 = vadd.f32 %v318_v16, %v73_v26  ;;  %v320_v31 = vpop.f32.mrb[15].mxu0  ;;  %v4018_v33 = vadd.f32 %v391_v20, %v3947_v22  ;;  %v393_v55 = vpop.f32.mrb[15].mxu1 }
 0x111   :  { %4489 = vst [vmem:[#allocation20_spill] sm:$0xff] %v4010_v1  ;;  %4490 = vst [vmem:[#allocation21_spill] sm:$0xff] %v4013_v18  ;;  %v4020_v4 = vadd.f32 %v320_v31, %v77_v29  ;;  %v4023_v48 = vadd.f32 %v393_v55, %v3953_v25  ;;  %v358_v1 = vadd.f32 %v3951_v24, %v3947_v22 }
 0x112   :  { %4491 = vst [vmem:[#allocation22_spill] sm:$0xff] %v4015_v37  ;;  %4492 = vst [vmem:[#allocation23_spill] sm:$0xff] %v4018_v33  ;;  %v360_v18 = vadd.f32 %v359_v28, %v3953_v25 }
 0x113   :  { %4493 = vst [vmem:[#allocation24_spill] sm:$0xff] %v4020_v4  ;;  %4494 = vst [vmem:[#allocation25_spill] sm:$0xff] %v4023_v48 }
 0x115   :  { %v664_v16 = vpop.f32.mrb[16].mxu0  ;;  %v705_v37 = vpop.f32.mrb[16].mxu1 }
 0x116   :  { %v712_v61 = vadd.f32 %v664_v16, %v285_v21  ;;  %v714_v30 = vadd.f32 %v705_v37, %v358_v1  ;;  %v666_v20 = vpop.f32.mrb[17].mxu0  ;;  %v707_v33 = vpop.f32.mrb[17].mxu1 }
 0x117   :  { %v713_v19 = vadd.f32 %v666_v20, %v287_v14  ;;  %v715_v31 = vadd.f32 %v707_v33, %v360_v18  ;;  %v668_v4 = vpop.f32.mrb[18].mxu0  ;;  %v709_v17 = vpop.f32.mrb[18].mxu1 }
 0x118   :  { %v3030_v55 = vmul.f32 -1.442695, %v712_v61  ;;  %v669_v48 = vpop.f32.mrb[19].mxu0  ;;  %v710_v15 = vpop.f32.mrb[19].mxu1 }
 0x119   :  { %v3031_v23 = vmul.f32 -1.442695, %v713_v19  ;;  %v3032_v22 = vmul.f32 -1.442695, %v715_v31  ;;  %v4495_v48 = vmov 0  }
 0x11a   :  { %3431 = vpow2.f32 %v3030_v55 }
 0x11b   :  { %3433 = vpow2.f32 %v3031_v23 }
 0x11c   :  { %3435 = vpow2.f32 %v3032_v22 }
 0x11d   :  { %3437 = vtanh.f32 %v714_v30 }
 0x124   :  { %v3432_v24 = vpop.eup %3431 }
 0x125   :  { %v3434_v26 = vpop.eup %3433  ;;  %v719_v25 = vadd.f32 1.0, %v3432_v24 }
 0x126   :  { %v725_v27 = vadd.f32 1.0, %v3434_v26  ;;  %v3436_v1 = vpop.eup %3435 }
 0x127   :  { %3439 = vrcp.f32 %v719_v25  ;;  %v3438_v28 = vpop.eup %3437  ;;  %v732_v4 = vadd.f32 1.0, %v3436_v1 }
 0x128   :  { %3441 = vrcp.f32 %v725_v27 }
 0x129   :  { %3443 = vrcp.f32 %v732_v4 }
 0x131   :  { %v3440_v29 = vpop.eup %3439 }
 0x132   :  { %v3442_v37 = vpop.eup %3441  ;;  %v736_v17 = vmul.f32 %v3440_v29, %v3438_v28 }
 0x133   :  { %v735_v33 = vmul.f32 0.0, %v3442_v37  ;;  %v3444_v19 = vpop.eup %3443 }
 0x135   :  { %v4029_v15 = vadd.f32 %v736_v17, %v735_v33 }
 0x137   :  { %3445 = vtanh.f32 %v4029_v15 }
 0x141   :  { %v3446_v61 = vpop.eup %3445 }
 0x142   :  { %v739_v18 = vmul.f32 %v3446_v61, %v3444_v19 }
 0x144   :  { %742 = vst [vmem:[%s4471_s4] sm:$0xff] %v739_v18  ;;  %v752_v30 = vpack.c.bf16 %v739_v18, %v739_v18 }
 0x146   :  { %978 = vmatmul.mubr.bf16.vlgmr.msra.gmra.mrb[20].mxu0 %v752_v30  ;;  %1019 = vmatmul.mubr.bf16.vlgmr.msra.gmra.mrb[20].mxu1 %v752_v30 }
 0x147   :  { %1262 = vmatpush1.bf16.msra.mxu0 %v3703_v38  ;;  %1303 = vmatpush1.bf16.msra.mxu1 %v3708_v39 }
 0x148   :  { %1263 = vmatprep.subr.bf16.mxu0 %v3715_v40  ;;  %1304 = vmatprep.subr.bf16.mxu1 %v3720_v41 }
 0x149   :  { %1293 = vmatprep.mubr.bf16.mxu0 %v4495_v48  ;;  %1334 = vmatprep.mubr.bf16.mxu1 %v4495_v48 }
 0x14b   :  { %1264 = vmatpush1.bf16.msra.mxu0 %v3725_v42  ;;  %1305 = vmatpush1.bf16.msra.mxu1 %v3730_v43 }
 0x14c   :  { %1265 = vmatprep.subr.bf16.mxu0 %v3745_v46  ;;  %1306 = vmatprep.subr.bf16.mxu1 %v3750_v47 }
 0x14f   :  { %1266 = vmatpush1.bf16.msra.mxu0 %v3757_v49  ;;  %1307 = vmatpush1.bf16.msra.mxu1 %v3762_v50 }
 0x150   :  { %1267 = vmatprep.subr.bf16.mxu0 %v3769_v51  ;;  %1308 = vmatprep.subr.bf16.mxu1 %v3776_v52 }
 0x153   :  { %1268 = vmatpush1.bf16.msra.mxu0 %v3781_v53  ;;  %1309 = vmatpush1.bf16.msra.mxu1 %v3786_v54 }
 0x154   :  { %1269 = vmatprep.subr.bf16.mxu0 %v3801_v57  ;;  %1310 = vmatprep.subr.bf16.mxu1 %v3806_v58 }
 0x157   :  { %1270 = vmatpush1.bf16.msra.mxu0 %v3813_v59  ;;  %1311 = vmatpush1.bf16.msra.mxu1 %v3818_v60 }
 0x158   :  { %1271 = vmatprep.subr.bf16.mxu0 %v3823_v62  ;;  %1312 = vmatprep.subr.bf16.mxu1 %v3828_v63 }
 0x15b   :  { %1272 = vmatpush1.bf16.msra.mxu0 %v3837_v0  ;;  %1313 = vmatpush1.bf16.msra.mxu1 %v3842_v2 }
 0x15c   :  { %1273 = vmatprep.subr.bf16.mxu0 %v3853_v5  ;;  %1314 = vmatprep.subr.bf16.mxu1 %v3858_v6 }
 0x15f   :  { %1274 = vmatpush1.bf16.msra.mxu0 %v3871_v8  ;;  %1315 = vmatpush1.bf16.msra.mxu1 %v3876_v9 }
 0x160   :  { %1275 = vmatprep.subr.bf16.mxu0 %v3883_v10  ;;  %1316 = vmatprep.subr.bf16.mxu1 %v3888_v11 }
 0x163   :  { %1276 = vmatpush1.bf16.msra.mxu0 %v3895_v12  ;;  %1317 = vmatpush1.bf16.msra.mxu1 %v3900_v13 }
 0x164   :  { %1577 = vmatprep.subr.bf16.mxu0 %v3693_v35  ;;  %1618 = vmatprep.subr.bf16.mxu1 %v3698_v36 }
 0x219   :  { %v979_v21 = vpop.f32.mrb[20].mxu0  ;;  %v1020_v14 = vpop.f32.mrb[20].mxu1 }
 0x21a   :  { %v1027_v16 = vadd.f32 %v979_v21, %v3955_v32  ;;  %v1029_v20 = vadd.f32 %v1020_v14, %v3958_v34  ;;  %v981_v31 = vpop.f32.mrb[21].mxu0  ;;  %v1022_v55 = vpop.f32.mrb[21].mxu1 }
 0x21b   :  { %v1028_v23 = vadd.f32 %v981_v31, %v3960_v44  ;;  %v1030_v22 = vadd.f32 %v1022_v55, %v3963_v45  ;;  %v983_v24 = vpop.f32.mrb[22].mxu0  ;;  %v1024_v26 = vpop.f32.mrb[22].mxu1  ;;  %v4152_v31 = vld [vmem:[%s4468_s2 + $0x24] ss:$16 sps:$4 sm:$0xff]   ;;  %v4157_v55 = vld [vmem:[%s4468_s2 + $0x2c] ss:$16 sps:$4 sm:$0xff]  }
 0x21c   :  { %v3065_v25 = vmul.f32 -1.442695, %v1027_v16  ;;  %v984_v27 = vpop.f32.mrb[23].mxu0  ;;  %v1025_v1 = vpop.f32.mrb[23].mxu1  ;;  %v4138_v16 = vld [vmem:[%s4468_s2] ss:$16 sps:$4 sm:$0xff]  }
 0x21d   :  { %v3066_v35 = vmul.f32 -1.442695, %v1028_v23  ;;  %v3067_v36 = vmul.f32 -1.442695, %v1030_v22  ;;  %v4162_v23 = vld [vmem:[%s4468_s2 + $0x20] ss:$16 sps:$4 sm:$0xff]  }
 0x21e   :  { %3447 = vpow2.f32 %v3065_v25  ;;  %v4167_v22 = vld [vmem:[%s4468_s2 + $0x28] ss:$16 sps:$4 sm:$0xff]   ;;  %v4176_v24 = vld [vmem:[%s4468_s2 + $0x44] ss:$16 sps:$4 sm:$0xff]   ;;  %v4181_v26 = vld [vmem:[%s4468_s2 + $0x4c] ss:$16 sps:$4 sm:$0xff]  }
 0x21f   :  { %3449 = vpow2.f32 %v3066_v35  ;;  %v4186_v25 = vld [vmem:[%s4468_s2 + $0x40] ss:$16 sps:$4 sm:$0xff]   ;;  %v4191_v27 = vld [vmem:[%s4468_s2 + $0x48] ss:$16 sps:$4 sm:$0xff]   ;;  %v4200_v1 = vld [vmem:[%s4468_s2 + $0x64] ss:$16 sps:$4 sm:$0xff]  }
 0x220   :  { %3451 = vpow2.f32 %v3067_v36  ;;  %v4205_v35 = vld [vmem:[%s4468_s2 + $0x6c] ss:$16 sps:$4 sm:$0xff]   ;;  %v4210_v36 = vld [vmem:[%s4468_s2 + $0x60] ss:$16 sps:$4 sm:$0xff]  }
 0x221   :  { %3453 = vtanh.f32 %v1029_v20  ;;  %v4143_v20 = vld [vmem:[%s4468_s2 + $0x8] ss:$16 sps:$4 sm:$0xff]  }
 0x228   :  { %v3448_v28 = vpop.eup %3447 }
 0x229   :  { %v3450_v29 = vpop.eup %3449  ;;  %v1034_v32 = vadd.f32 1.0, %v3448_v28  ;;  %v4215_v28 = vld [vmem:[%s4468_s2 + $0x68] ss:$16 sps:$4 sm:$0xff]  }
 0x22a   :  { %v1040_v34 = vadd.f32 1.0, %v3450_v29  ;;  %v3452_v44 = vpop.eup %3451  ;;  %v4224_v29 = vld [vmem:[%s4468_s2 + $0x84] ss:$16 sps:$4 sm:$0xff]  }
 0x22b   :  { %3455 = vrcp.f32 %v1034_v32  ;;  %v3454_v37 = vpop.eup %3453  ;;  %v1047_v33 = vadd.f32 1.0, %v3452_v44  ;;  %v4229_v32 = vld [vmem:[%s4468_s2 + $0x8c] ss:$16 sps:$4 sm:$0xff]   ;;  %v4239_v44 = vld [vmem:[%s4468_s2 + $0x88] ss:$16 sps:$4 sm:$0xff]  }
 0x22c   :  { %3457 = vrcp.f32 %v1040_v34  ;;  %v4234_v34 = vld [vmem:[%s4468_s2 + $0x80] ss:$16 sps:$4 sm:$0xff]  }
 0x22d   :  { %3459 = vrcp.f32 %v1047_v33  ;;  %v4269_v33 = vld [vmem:[%s4468_s2 + $0xc4] ss:$16 sps:$4 sm:$0xff]  }
 0x235   :  { %v3456_v45 = vpop.eup %3455 }
 0x236   :  { %v3458_v17 = vpop.eup %3457  ;;  %v1051_v4 = vmul.f32 %v3456_v45, %v3454_v37  ;;  %v4246_v37 = vld [vmem:[%s4468_s2 + $0xa4] ss:$16 sps:$4 sm:$0xff]   ;;  %v4253_v45 = vld [vmem:[%s4468_s2 + $0xa0] ss:$16 sps:$4 sm:$0xff]  }
 0x237   :  { %v1050_v19 = vmul.f32 %v3458_v17, %v4029_v15  ;;  %v3460_v18 = vpop.eup %3459  ;;  %v4133_v15 = vld [vmem:[%s4468_s2 + $0xc] ss:$16 sps:$4 sm:$0xff]   ;;  %v4258_v17 = vld [vmem:[%s4468_s2 + $0xa8] ss:$16 sps:$4 sm:$0xff]  }
 0x239   :  { %v4074_v61 = vadd.f32 %v1051_v4, %v1050_v19  ;;  %v4263_v4 = vld [vmem:[%s4468_s2 + $0xac] ss:$16 sps:$4 sm:$0xff]  }
 0x23a   :  { %v4274_v19 = vld [vmem:[%s4468_s2 + $0xcc] ss:$16 sps:$4 sm:$0xff]  }
 0x23b   :  { %3461 = vtanh.f32 %v4074_v61 }
 0x245   :  { %v3462_v30 = vpop.eup %3461 }
 0x246   :  { %v1054_v21 = vmul.f32 %v3462_v30, %v3460_v18  ;;  %v4287_v18 = vld [vmem:[%s4468_s2 + $0xc8] ss:$16 sps:$4 sm:$0xff]   ;;  %v4294_v30 = vld [vmem:[%s4468_s2 + $0xe4] ss:$16 sps:$4 sm:$0xff]  }
 0x248   :  { %3068 = vst [vmem:[%s4471_s4 + $0x8] sm:$0xff] %v1054_v21  ;;  %v1068_v14 = vpack.c.bf16 %v1054_v21, %v1054_v21  ;;  %v4299_v21 = vld [vmem:[%s4468_s2 + $0xec] ss:$16 sps:$4 sm:$0xff]  }
 0x24a   :  { %1294 = vmatmul.mubr.bf16.vlgmr.msra.gmra.mrb[24].mxu0 %v1068_v14  ;;  %1335 = vmatmul.mubr.bf16.vlgmr.msra.gmra.mrb[24].mxu1 %v1068_v14  ;;  %v4306_v14 = vld [vmem:[%s4468_s2 + $0xe0] ss:$16 sps:$4 sm:$0xff]  }
 0x24b   :  { %1578 = vmatpush1.bf16.msra.mxu0 %v3703_v38  ;;  %1619 = vmatpush1.bf16.msra.mxu1 %v3708_v39 }
 0x24c   :  { %1579 = vmatprep.subr.bf16.mxu0 %v3715_v40  ;;  %1620 = vmatprep.subr.bf16.mxu1 %v3720_v41 }
 0x24d   :  { %1609 = vmatprep.mubr.bf16.mxu0 %v4495_v48  ;;  %1650 = vmatprep.mubr.bf16.mxu1 %v4495_v48 }
 0x24f   :  { %1580 = vmatpush1.bf16.msra.mxu0 %v3725_v42  ;;  %1621 = vmatpush1.bf16.msra.mxu1 %v3730_v43 }
 0x250   :  { %1581 = vmatprep.subr.bf16.mxu0 %v3745_v46  ;;  %1622 = vmatprep.subr.bf16.mxu1 %v3750_v47  ;;  %v4496_v47 = vld [vmem:[#allocation5_spill] sm:$0xff] }
 0x253   :  { %1582 = vmatpush1.bf16.msra.mxu0 %v3757_v49  ;;  %1623 = vmatpush1.bf16.msra.mxu1 %v3762_v50 }
 0x254   :  { %1583 = vmatprep.subr.bf16.mxu0 %v3769_v51  ;;  %1624 = vmatprep.subr.bf16.mxu1 %v3776_v52 }
 0x257   :  { %1584 = vmatpush1.bf16.msra.mxu0 %v3781_v53  ;;  %1625 = vmatpush1.bf16.msra.mxu1 %v3786_v54 }
 0x258   :  { %1585 = vmatprep.subr.bf16.mxu0 %v3801_v57  ;;  %1626 = vmatprep.subr.bf16.mxu1 %v3806_v58 }
 0x25b   :  { %1586 = vmatpush1.bf16.msra.mxu0 %v3813_v59  ;;  %1627 = vmatpush1.bf16.msra.mxu1 %v3818_v60 }
 0x25c   :  { %1587 = vmatprep.subr.bf16.mxu0 %v3823_v62  ;;  %1628 = vmatprep.subr.bf16.mxu1 %v3828_v63 }
 0x25f   :  { %1588 = vmatpush1.bf16.msra.mxu0 %v3837_v0  ;;  %1629 = vmatpush1.bf16.msra.mxu1 %v3842_v2 }
 0x260   :  { %1589 = vmatprep.subr.bf16.mxu0 %v3853_v5  ;;  %1630 = vmatprep.subr.bf16.mxu1 %v3858_v6 }
 0x263   :  { %1590 = vmatpush1.bf16.msra.mxu0 %v3871_v8  ;;  %1631 = vmatpush1.bf16.msra.mxu1 %v3876_v9 }
 0x264   :  { %1591 = vmatprep.subr.bf16.mxu0 %v3883_v10  ;;  %1632 = vmatprep.subr.bf16.mxu1 %v3888_v11 }
 0x267   :  { %1592 = vmatpush1.bf16.msra.mxu0 %v3895_v12  ;;  %1633 = vmatpush1.bf16.msra.mxu1 %v3900_v13 }
 0x268   :  { %1934 = vmatprep.subr.bf16.mxu1 %v4133_v15 }
 0x31d   :  { %v1295_v38 = vpop.f32.mrb[24].mxu0  ;;  %v1336_v39 = vpop.f32.mrb[24].mxu1 }
 0x31e   :  { %v1343_v40 = vadd.f32 %v1295_v38, %v3965_v56  ;;  %v1345_v41 = vadd.f32 %v1336_v39, %v3968_v3  ;;  %v1297_v42 = vpop.f32.mrb[25].mxu0  ;;  %v1338_v43 = vpop.f32.mrb[25].mxu1  ;;  %v4311_v38 = vld [vmem:[%s4468_s2 + $0xe8] ss:$16 sps:$4 sm:$0xff]  }
 0x31f   :  { %v1344_v46 = vadd.f32 %v1297_v42, %v3970_v7  ;;  %v1346_v49 = vadd.f32 %v1338_v43, %v4496_v47  ;;  %v1299_v50 = vpop.f32.mrb[26].mxu0  ;;  %v1340_v51 = vpop.f32.mrb[26].mxu1  ;;  %v4128_v7 = vld [vmem:[%s4468_s2 + $0x4] ss:$16 sps:$4 sm:$0xff]  }
 0x320   :  { %v3101_v52 = vmul.f32 -1.442695, %v1343_v40  ;;  %v1300_v53 = vpop.f32.mrb[27].mxu0  ;;  %v1341_v54 = vpop.f32.mrb[27].mxu1  ;;  %1893 = vmatprep.subr.bf16.mxu0 %v4128_v7  ;;  %v4498_v43 = vld [vmem:[#allocation7_spill] sm:$0xff]  ;;  %v4499_v50 = vld [vmem:[#allocation8_spill] sm:$0xff] }
 0x321   :  { %v3102_v57 = vmul.f32 -1.442695, %v1344_v46  ;;  %v3103_v58 = vmul.f32 -1.442695, %v1346_v49 }
 0x322   :  { %3463 = vpow2.f32 %v3101_v52  ;;  %v4500_v52 = vld [vmem:[#allocation9_spill] sm:$0xff] }
 0x323   :  { %3465 = vpow2.f32 %v3102_v57 }
 0x324   :  { %3467 = vpow2.f32 %v3103_v58 }
 0x325   :  { %3469 = vtanh.f32 %v1345_v41  ;;  %v4497_v41 = vld [vmem:[#allocation6_spill] sm:$0xff] }
 0x32c   :  { %v3464_v59 = vpop.eup %3463 }
 0x32d   :  { %v3466_v60 = vpop.eup %3465  ;;  %v1350_v62 = vadd.f32 1.0, %v3464_v59 }
 0x32e   :  { %v1356_v63 = vadd.f32 1.0, %v3466_v60  ;;  %v3468_v0 = vpop.eup %3467 }
 0x32f   :  { %3471 = vrcp.f32 %v1350_v62  ;;  %v3470_v2 = vpop.eup %3469  ;;  %v1363_v9 = vadd.f32 1.0, %v3468_v0 }
 0x330   :  { %3473 = vrcp.f32 %v1356_v63 }
 0x331   :  { %3475 = vrcp.f32 %v1363_v9 }
 0x339   :  { %v3472_v5 = vpop.eup %3471 }
 0x33a   :  { %v3474_v6 = vpop.eup %3473  ;;  %v1367_v8 = vmul.f32 %v3472_v5, %v3470_v2 }
 0x33b   :  { %v1366_v10 = vmul.f32 %v3474_v6, %v4074_v61  ;;  %v3476_v12 = vpop.eup %3475  ;;  %v4282_v61 = vld [vmem:[%s4468_s2 + $0xc0] ss:$16 sps:$4 sm:$0xff]  }
 0x33d   :  { %v4117_v11 = vadd.f32 %v1367_v8, %v1366_v10 }
 0x33f   :  { %3477 = vtanh.f32 %v4117_v11 }
 0x349   :  { %v3478_v13 = vpop.eup %3477 }
 0x34a   :  { %v1370_v56 = vmul.f32 %v3478_v13, %v3476_v12 }
 0x34c   :  { %3104 = vst [vmem:[%s4471_s4 + $0x10] sm:$0xff] %v1370_v56  ;;  %v1384_v3 = vpack.c.bf16 %v1370_v56, %v1370_v56 }
 0x34e   :  { %1610 = vmatmul.mubr.bf16.vlgmr.msra.gmra.mrb[28].mxu0 %v1384_v3  ;;  %1651 = vmatmul.mubr.bf16.vlgmr.msra.gmra.mrb[28].mxu1 %v1384_v3 }
 0x34f   :  { %1925 = vmatprep.mubr.bf16.mxu0 %v4495_v48  ;;  %1966 = vmatprep.mubr.bf16.mxu1 %v4495_v48 }
 0x350   :  { %1894 = vmatpush1.bf16.msra.mxu0 %v4138_v16  ;;  %1935 = vmatpush1.bf16.msra.mxu1 %v4143_v20 }
 0x351   :  { %1895 = vmatprep.subr.bf16.mxu0 %v4152_v31  ;;  %1936 = vmatprep.subr.bf16.mxu1 %v4157_v55 }
 0x354   :  { %1896 = vmatpush1.bf16.msra.mxu0 %v4162_v23  ;;  %1937 = vmatpush1.bf16.msra.mxu1 %v4167_v22 }
 0x355   :  { %1897 = vmatprep.subr.bf16.mxu0 %v4176_v24  ;;  %1938 = vmatprep.subr.bf16.mxu1 %v4181_v26 }
 0x358   :  { %1898 = vmatpush1.bf16.msra.mxu0 %v4186_v25  ;;  %1939 = vmatpush1.bf16.msra.mxu1 %v4191_v27 }
 0x359   :  { %1899 = vmatprep.subr.bf16.mxu0 %v4200_v1  ;;  %1940 = vmatprep.subr.bf16.mxu1 %v4205_v35 }
 0x35c   :  { %1900 = vmatpush1.bf16.msra.mxu0 %v4210_v36  ;;  %1941 = vmatpush1.bf16.msra.mxu1 %v4215_v28 }
 0x35d   :  { %1901 = vmatprep.subr.bf16.mxu0 %v4224_v29  ;;  %1942 = vmatprep.subr.bf16.mxu1 %v4229_v32 }
 0x360   :  { %1902 = vmatpush1.bf16.msra.mxu0 %v4234_v34  ;;  %1943 = vmatpush1.bf16.msra.mxu1 %v4239_v44 }
 0x361   :  { %1903 = vmatprep.subr.bf16.mxu0 %v4246_v37  ;;  %1944 = vmatprep.subr.bf16.mxu1 %v4263_v4 }
 0x364   :  { %1904 = vmatpush1.bf16.msra.mxu0 %v4253_v45  ;;  %1945 = vmatpush1.bf16.msra.mxu1 %v4258_v17 }
 0x365   :  { %1905 = vmatprep.subr.bf16.mxu0 %v4269_v33  ;;  %1946 = vmatprep.subr.bf16.mxu1 %v4274_v19 }
 0x368   :  { %1906 = vmatpush1.bf16.msra.mxu0 %v4282_v61  ;;  %1947 = vmatpush1.bf16.msra.mxu1 %v4287_v18 }
 0x369   :  { %1907 = vmatprep.subr.bf16.mxu0 %v4294_v30  ;;  %1948 = vmatprep.subr.bf16.mxu1 %v4299_v21 }
 0x36c   :  { %1908 = vmatpush1.bf16.msra.mxu0 %v4306_v14  ;;  %1949 = vmatpush1.bf16.msra.mxu1 %v4311_v38 }
 0x36d   :  { %2209 = vmatprep.subr.bf16.mxu0 %v4128_v7  ;;  %2250 = vmatprep.subr.bf16.mxu1 %v4133_v15 }
 0x421   :  { %v1611_v39 = vpop.f32.mrb[28].mxu0  ;;  %v1652_v40 = vpop.f32.mrb[28].mxu1 }
 0x422   :  { %v1659_v42 = vadd.f32 %v1611_v39, %v4497_v41  ;;  %v1661_v46 = vadd.f32 %v1652_v40, %v4498_v43  ;;  %v1613_v47 = vpop.f32.mrb[29].mxu0  ;;  %v1654_v49 = vpop.f32.mrb[29].mxu1 }
 0x423   :  { %v1660_v51 = vadd.f32 %v1613_v47, %v4499_v50  ;;  %v1662_v53 = vadd.f32 %v1654_v49, %v4500_v52  ;;  %v1615_v54 = vpop.f32.mrb[30].mxu0  ;;  %v1656_v57 = vpop.f32.mrb[30].mxu1  ;;  %v4501_v47 = vld [vmem:[#allocation10_spill] sm:$0xff]  ;;  %v4502_v50 = vld [vmem:[#allocation11_spill] sm:$0xff] }
 0x424   :  { %v3137_v58 = vmul.f32 -1.442695, %v1659_v42  ;;  %v1616_v59 = vpop.f32.mrb[31].mxu0  ;;  %v1657_v60 = vpop.f32.mrb[31].mxu1  ;;  %v4503_v54 = vld [vmem:[#allocation12_spill] sm:$0xff] }
 0x425   :  { %v3138_v62 = vmul.f32 -1.442695, %v1660_v51  ;;  %v3139_v63 = vmul.f32 -1.442695, %v1662_v53 }
 0x426   :  { %3479 = vpow2.f32 %v3137_v58  ;;  %v4504_v58 = vld [vmem:[#allocation13_spill] sm:$0xff] }
 0x427   :  { %3481 = vpow2.f32 %v3138_v62 }
 0x428   :  { %3483 = vpow2.f32 %v3139_v63 }
 0x429   :  { %3485 = vtanh.f32 %v1661_v46 }
 0x430   :  { %v3480_v0 = vpop.eup %3479 }
 0x431   :  { %v3482_v2 = vpop.eup %3481  ;;  %v1666_v5 = vadd.f32 1.0, %v3480_v0 }
 0x432   :  { %v1672_v6 = vadd.f32 1.0, %v3482_v2  ;;  %v3484_v8 = vpop.eup %3483 }
 0x433   :  { %3487 = vrcp.f32 %v1666_v5  ;;  %v3486_v9 = vpop.eup %3485  ;;  %v1679_v56 = vadd.f32 1.0, %v3484_v8 }
 0x434   :  { %3489 = vrcp.f32 %v1672_v6 }
 0x435   :  { %3491 = vrcp.f32 %v1679_v56 }
 0x43d   :  { %v3488_v10 = vpop.eup %3487 }
 0x43e   :  { %v3490_v12 = vpop.eup %3489  ;;  %v1683_v13 = vmul.f32 %v3488_v10, %v3486_v9 }
 0x43f   :  { %v1682_v3 = vmul.f32 %v3490_v12, %v4117_v11  ;;  %v3492_v40 = vpop.eup %3491 }
 0x441   :  { %v4324_v39 = vadd.f32 %v1683_v13, %v1682_v3 }
 0x443   :  { %3493 = vtanh.f32 %v4324_v39 }
 0x44d   :  { %v3494_v41 = vpop.eup %3493 }
 0x44e   :  { %v1686_v42 = vmul.f32 %v3494_v41, %v3492_v40 }
 0x450   :  { %3140 = vst [vmem:[%s4471_s4 + $0x18] sm:$0xff] %v1686_v42  ;;  %v1700_v43 = vpack.c.bf16 %v1686_v42, %v1686_v42 }
 0x452   :  { %1926 = vmatmul.mubr.bf16.vlgmr.msra.gmra.mrb[32].mxu0 %v1700_v43  ;;  %1967 = vmatmul.mubr.bf16.vlgmr.msra.gmra.mrb[32].mxu1 %v1700_v43 }
 0x453   :  { %2210 = vmatpush1.bf16.msra.mxu0 %v4138_v16  ;;  %2251 = vmatpush1.bf16.msra.mxu1 %v4143_v20 }
 0x454   :  { %2211 = vmatprep.subr.bf16.mxu0 %v4152_v31  ;;  %2252 = vmatprep.subr.bf16.mxu1 %v4157_v55 }
 0x455   :  { %2241 = vmatprep.mubr.bf16.mxu0 %v4495_v48  ;;  %2282 = vmatprep.mubr.bf16.mxu1 %v4495_v48 }
 0x457   :  { %2212 = vmatpush1.bf16.msra.mxu0 %v4162_v23  ;;  %2253 = vmatpush1.bf16.msra.mxu1 %v4167_v22 }
 0x458   :  { %2213 = vmatprep.subr.bf16.mxu0 %v4176_v24  ;;  %2254 = vmatprep.subr.bf16.mxu1 %v4181_v26 }
 0x45b   :  { %2214 = vmatpush1.bf16.msra.mxu0 %v4186_v25  ;;  %2255 = vmatpush1.bf16.msra.mxu1 %v4191_v27 }
 0x45c   :  { %2215 = vmatprep.subr.bf16.mxu0 %v4200_v1  ;;  %2256 = vmatprep.subr.bf16.mxu1 %v4205_v35 }
 0x45f   :  { %2216 = vmatpush1.bf16.msra.mxu0 %v4210_v36  ;;  %2257 = vmatpush1.bf16.msra.mxu1 %v4215_v28 }
 0x460   :  { %2217 = vmatprep.subr.bf16.mxu0 %v4224_v29  ;;  %2258 = vmatprep.subr.bf16.mxu1 %v4229_v32 }
 0x463   :  { %2218 = vmatpush1.bf16.msra.mxu0 %v4234_v34  ;;  %2259 = vmatpush1.bf16.msra.mxu1 %v4239_v44 }
 0x464   :  { %2219 = vmatprep.subr.bf16.mxu0 %v4246_v37  ;;  %2260 = vmatprep.subr.bf16.mxu1 %v4263_v4 }
 0x467   :  { %2220 = vmatpush1.bf16.msra.mxu0 %v4253_v45  ;;  %2261 = vmatpush1.bf16.msra.mxu1 %v4258_v17 }
 0x468   :  { %2221 = vmatprep.subr.bf16.mxu0 %v4269_v33  ;;  %2262 = vmatprep.subr.bf16.mxu1 %v4274_v19 }
 0x46b   :  { %2222 = vmatpush1.bf16.msra.mxu0 %v4282_v61  ;;  %2263 = vmatpush1.bf16.msra.mxu1 %v4287_v18 }
 0x46c   :  { %2223 = vmatprep.subr.bf16.mxu0 %v4294_v30  ;;  %2264 = vmatprep.subr.bf16.mxu1 %v4299_v21 }
 0x46f   :  { %2224 = vmatpush1.bf16.msra.mxu0 %v4306_v14  ;;  %2265 = vmatpush1.bf16.msra.mxu1 %v4311_v38 }
 0x470   :  { %2525 = vmatprep.subr.bf16.mxu0 %v4128_v7  ;;  %2566 = vmatprep.subr.bf16.mxu1 %v4133_v15 }
 0x525   :  { %v1927_v11 = vpop.f32.mrb[32].mxu0  ;;  %v1968_v46 = vpop.f32.mrb[32].mxu1 }
 0x526   :  { %v1975_v49 = vadd.f32 %v1927_v11, %v4501_v47  ;;  %v1977_v51 = vadd.f32 %v1968_v46, %v4502_v50  ;;  %v1929_v52 = vpop.f32.mrb[33].mxu0  ;;  %v1970_v53 = vpop.f32.mrb[33].mxu1 }
 0x527   :  { %v1976_v57 = vadd.f32 %v1929_v52, %v4503_v54  ;;  %v1978_v59 = vadd.f32 %v1970_v53, %v4504_v58  ;;  %v1931_v60 = vpop.f32.mrb[34].mxu0  ;;  %v1972_v62 = vpop.f32.mrb[34].mxu1  ;;  %v4505_v52 = vld [vmem:[#allocation14_spill] sm:$0xff]  ;;  %v4506_v54 = vld [vmem:[#allocation15_spill] sm:$0xff] }
 0x528   :  { %v3173_v63 = vmul.f32 -1.442695, %v1975_v49  ;;  %v1932_v0 = vpop.f32.mrb[35].mxu0  ;;  %v1973_v2 = vpop.f32.mrb[35].mxu1  ;;  %v4507_v60 = vld [vmem:[#allocation16_spill] sm:$0xff] }
 0x529   :  { %v3174_v5 = vmul.f32 -1.442695, %v1976_v57  ;;  %v3175_v6 = vmul.f32 -1.442695, %v1978_v59 }
 0x52a   :  { %3495 = vpow2.f32 %v3173_v63  ;;  %v4508_v63 = vld [vmem:[#allocation17_spill] sm:$0xff] }
 0x52b   :  { %3497 = vpow2.f32 %v3174_v5 }
 0x52c   :  { %3499 = vpow2.f32 %v3175_v6 }
 0x52d   :  { %3501 = vtanh.f32 %v1977_v51 }
 0x534   :  { %v3496_v8 = vpop.eup %3495 }
 0x535   :  { %v3498_v9 = vpop.eup %3497  ;;  %v1982_v10 = vadd.f32 1.0, %v3496_v8 }
 0x536   :  { %v1988_v12 = vadd.f32 1.0, %v3498_v9  ;;  %v3500_v13 = vpop.eup %3499 }
 0x537   :  { %3503 = vrcp.f32 %v1982_v10  ;;  %v3502_v56 = vpop.eup %3501  ;;  %v1995_v42 = vadd.f32 1.0, %v3500_v13 }
 0x538   :  { %3505 = vrcp.f32 %v1988_v12 }
 0x539   :  { %3507 = vrcp.f32 %v1995_v42 }
 0x541   :  { %v3504_v3 = vpop.eup %3503 }
 0x542   :  { %v3506_v40 = vpop.eup %3505  ;;  %v1999_v41 = vmul.f32 %v3504_v3, %v3502_v56 }
 0x543   :  { %v1998_v43 = vmul.f32 %v3506_v40, %v4324_v39  ;;  %v3508_v46 = vpop.eup %3507 }
 0x545   :  { %v4369_v11 = vadd.f32 %v1999_v41, %v1998_v43 }
 0x547   :  { %3509 = vtanh.f32 %v4369_v11 }
 0x551   :  { %v3510_v47 = vpop.eup %3509 }
 0x552   :  { %v2002_v49 = vmul.f32 %v3510_v47, %v3508_v46 }
 0x554   :  { %3176 = vst [vmem:[%s4471_s4 + $0x20] sm:$0xff] %v2002_v49  ;;  %v2016_v50 = vpack.c.bf16 %v2002_v49, %v2002_v49 }
 0x556   :  { %2242 = vmatmul.mubr.bf16.vlgmr.msra.gmra.mrb[36].mxu0 %v2016_v50  ;;  %2283 = vmatmul.mubr.bf16.vlgmr.msra.gmra.mrb[36].mxu1 %v2016_v50 }
 0x557   :  { %2526 = vmatpush1.bf16.msra.mxu0 %v4138_v16  ;;  %2567 = vmatpush1.bf16.msra.mxu1 %v4143_v20 }
 0x558   :  { %2527 = vmatprep.subr.bf16.mxu0 %v4152_v31  ;;  %2568 = vmatprep.subr.bf16.mxu1 %v4157_v55 }
 0x559   :  { %2557 = vmatprep.mubr.bf16.mxu0 %v4495_v48  ;;  %2598 = vmatprep.mubr.bf16.mxu1 %v4495_v48 }
 0x55b   :  { %2528 = vmatpush1.bf16.msra.mxu0 %v4162_v23  ;;  %2569 = vmatpush1.bf16.msra.mxu1 %v4167_v22 }
 0x55c   :  { %2529 = vmatprep.subr.bf16.mxu0 %v4176_v24  ;;  %2570 = vmatprep.subr.bf16.mxu1 %v4181_v26 }
 0x55f   :  { %2530 = vmatpush1.bf16.msra.mxu0 %v4186_v25  ;;  %2571 = vmatpush1.bf16.msra.mxu1 %v4191_v27 }
 0x560   :  { %2531 = vmatprep.subr.bf16.mxu0 %v4200_v1  ;;  %2572 = vmatprep.subr.bf16.mxu1 %v4205_v35 }
 0x563   :  { %2532 = vmatpush1.bf16.msra.mxu0 %v4210_v36  ;;  %2573 = vmatpush1.bf16.msra.mxu1 %v4215_v28 }
 0x564   :  { %2533 = vmatprep.subr.bf16.mxu0 %v4224_v29  ;;  %2574 = vmatprep.subr.bf16.mxu1 %v4229_v32 }
 0x567   :  { %2534 = vmatpush1.bf16.msra.mxu0 %v4234_v34  ;;  %2575 = vmatpush1.bf16.msra.mxu1 %v4239_v44 }
 0x568   :  { %2535 = vmatprep.subr.bf16.mxu0 %v4246_v37  ;;  %2576 = vmatprep.subr.bf16.mxu1 %v4263_v4 }
 0x56b   :  { %2536 = vmatpush1.bf16.msra.mxu0 %v4253_v45  ;;  %2577 = vmatpush1.bf16.msra.mxu1 %v4258_v17 }
 0x56c   :  { %2537 = vmatprep.subr.bf16.mxu0 %v4269_v33  ;;  %2578 = vmatprep.subr.bf16.mxu1 %v4274_v19 }
 0x56f   :  { %2538 = vmatpush1.bf16.msra.mxu0 %v4282_v61  ;;  %2579 = vmatpush1.bf16.msra.mxu1 %v4287_v18 }
 0x570   :  { %2539 = vmatprep.subr.bf16.mxu0 %v4294_v30  ;;  %2580 = vmatprep.subr.bf16.mxu1 %v4299_v21 }
 0x573   :  { %2540 = vmatpush1.bf16.msra.mxu0 %v4306_v14  ;;  %2581 = vmatpush1.bf16.msra.mxu1 %v4311_v38 }
 0x574   :  { %2841 = vmatprep.subr.bf16.mxu0 %v4128_v7  ;;  %2882 = vmatprep.subr.bf16.mxu1 %v4133_v15 }
 0x629   :  { %v2243_v39 = vpop.f32.mrb[36].mxu0  ;;  %v2284_v51 = vpop.f32.mrb[36].mxu1 }
 0x62a   :  { %v2291_v53 = vadd.f32 %v2243_v39, %v4505_v52  ;;  %v2293_v57 = vadd.f32 %v2284_v51, %v4506_v54  ;;  %v2245_v58 = vpop.f32.mrb[37].mxu0  ;;  %v2286_v59 = vpop.f32.mrb[37].mxu1 }
 0x62b   :  { %v2292_v62 = vadd.f32 %v2245_v58, %v4507_v60  ;;  %v2294_v0 = vadd.f32 %v2286_v59, %v4508_v63  ;;  %v2247_v2 = vpop.f32.mrb[38].mxu0  ;;  %v2288_v5 = vpop.f32.mrb[38].mxu1  ;;  %v4513_v60 = vld [vmem:[#allocation22_spill] sm:$0xff]  ;;  %v4514_v63 = vld [vmem:[#allocation23_spill] sm:$0xff] }
 0x62c   :  { %v3209_v6 = vmul.f32 -1.442695, %v2291_v53  ;;  %v2248_v8 = vpop.f32.mrb[39].mxu0  ;;  %v2289_v9 = vpop.f32.mrb[39].mxu1 }
 0x62d   :  { %v3210_v7 = vmul.f32 -1.442695, %v2292_v62  ;;  %v3211_v15 = vmul.f32 -1.442695, %v2294_v0  ;;  %v4516_v9 = vld [vmem:[#allocation25_spill] sm:$0xff] }
 0x62e   :  { %3511 = vpow2.f32 %v3209_v6  ;;  %v4515_v6 = vld [vmem:[#allocation24_spill] sm:$0xff] }
 0x62f   :  { %3513 = vpow2.f32 %v3210_v7 }
 0x630   :  { %3515 = vpow2.f32 %v3211_v15 }
 0x631   :  { %3517 = vtanh.f32 %v2293_v57 }
 0x638   :  { %v3512_v10 = vpop.eup %3511 }
 0x639   :  { %v3514_v12 = vpop.eup %3513  ;;  %v2298_v13 = vadd.f32 1.0, %v3512_v10 }
 0x63a   :  { %v2304_v56 = vadd.f32 1.0, %v3514_v12  ;;  %v3516_v3 = vpop.eup %3515 }
 0x63b   :  { %3519 = vrcp.f32 %v2298_v13  ;;  %v3518_v40 = vpop.eup %3517  ;;  %v2311_v46 = vadd.f32 1.0, %v3516_v3 }
 0x63c   :  { %3521 = vrcp.f32 %v2304_v56 }
 0x63d   :  { %3523 = vrcp.f32 %v2311_v46 }
 0x645   :  { %v3520_v41 = vpop.eup %3519 }
 0x646   :  { %v3522_v42 = vpop.eup %3521  ;;  %v2315_v43 = vmul.f32 %v3520_v41, %v3518_v40 }
 0x647   :  { %v2314_v47 = vmul.f32 %v3522_v42, %v4369_v11  ;;  %v3524_v50 = vpop.eup %3523 }
 0x649   :  { %v4414_v49 = vadd.f32 %v2315_v43, %v2314_v47 }
 0x64b   :  { %3525 = vtanh.f32 %v4414_v49 }
 0x655   :  { %v3526_v39 = vpop.eup %3525 }
 0x656   :  { %v2318_v51 = vmul.f32 %v3526_v39, %v3524_v50 }
 0x658   :  { %3212 = vst [vmem:[%s4471_s4 + $0x28] sm:$0xff] %v2318_v51  ;;  %v2332_v52 = vpack.c.bf16 %v2318_v51, %v2318_v51 }
 0x65a   :  { %2558 = vmatmul.mubr.bf16.vlgmr.msra.gmra.mrb[40].mxu0 %v2332_v52  ;;  %2599 = vmatmul.mubr.bf16.vlgmr.msra.gmra.mrb[40].mxu1 %v2332_v52 }
 0x65b   :  { %2842 = vmatpush1.bf16.msra.mxu0 %v4138_v16  ;;  %2883 = vmatpush1.bf16.msra.mxu1 %v4143_v20  ;;  %v4509_v20 = vld [vmem:[#allocation18_spill] sm:$0xff] }
 0x65c   :  { %2843 = vmatprep.subr.bf16.mxu0 %v4152_v31  ;;  %2884 = vmatprep.subr.bf16.mxu1 %v4157_v55  ;;  %v4510_v55 = vld [vmem:[#allocation19_spill] sm:$0xff] }
 0x65d   :  { %2873 = vmatprep.mubr.bf16.mxu0 %v4495_v48  ;;  %2914 = vmatprep.mubr.bf16.mxu1 %v4495_v48 }
 0x65f   :  { %2844 = vmatpush1.bf16.msra.mxu0 %v4162_v23  ;;  %2885 = vmatpush1.bf16.msra.mxu1 %v4167_v22 }
 0x660   :  { %2845 = vmatprep.subr.bf16.mxu0 %v4176_v24  ;;  %2886 = vmatprep.subr.bf16.mxu1 %v4181_v26  ;;  %v4511_v26 = vld [vmem:[#allocation20_spill] sm:$0xff] }
 0x663   :  { %2846 = vmatpush1.bf16.msra.mxu0 %v4186_v25  ;;  %2887 = vmatpush1.bf16.msra.mxu1 %v4191_v27  ;;  %v4512_v27 = vld [vmem:[#allocation21_spill] sm:$0xff] }
 0x664   :  { %2847 = vmatprep.subr.bf16.mxu0 %v4200_v1  ;;  %2888 = vmatprep.subr.bf16.mxu1 %v4205_v35 }
 0x667   :  { %2848 = vmatpush1.bf16.msra.mxu0 %v4210_v36  ;;  %2889 = vmatpush1.bf16.msra.mxu1 %v4215_v28 }
 0x668   :  { %2849 = vmatprep.subr.bf16.mxu0 %v4224_v29  ;;  %2890 = vmatprep.subr.bf16.mxu1 %v4229_v32 }
 0x66b   :  { %2850 = vmatpush1.bf16.msra.mxu0 %v4234_v34  ;;  %2891 = vmatpush1.bf16.msra.mxu1 %v4239_v44 }
 0x66c   :  { %2851 = vmatprep.subr.bf16.mxu0 %v4246_v37  ;;  %2892 = vmatprep.subr.bf16.mxu1 %v4263_v4 }
 0x66f   :  { %2852 = vmatpush1.bf16.msra.mxu0 %v4253_v45  ;;  %2893 = vmatpush1.bf16.msra.mxu1 %v4258_v17 }
 0x670   :  { %2853 = vmatprep.subr.bf16.mxu0 %v4269_v33  ;;  %2894 = vmatprep.subr.bf16.mxu1 %v4274_v19 }
 0x673   :  { %2854 = vmatpush1.bf16.msra.mxu0 %v4282_v61  ;;  %2895 = vmatpush1.bf16.msra.mxu1 %v4287_v18 }
 0x674   :  { %2855 = vmatprep.subr.bf16.mxu0 %v4294_v30  ;;  %2896 = vmatprep.subr.bf16.mxu1 %v4299_v21 }
 0x677   :  { %2856 = vmatpush1.bf16.msra.mxu0 %v4306_v14  ;;  %2897 = vmatpush1.bf16.msra.mxu1 %v4311_v38 }
 0x72d   :  { %v2559_v48 = vpop.f32.mrb[40].mxu0  ;;  %v2600_v16 = vpop.f32.mrb[40].mxu1 }
 0x72e   :  { %v2607_v31 = vadd.f32 %v2559_v48, %v4509_v20  ;;  %v2609_v23 = vadd.f32 %v2600_v16, %v4510_v55  ;;  %v2561_v22 = vpop.f32.mrb[41].mxu0  ;;  %v2602_v24 = vpop.f32.mrb[41].mxu1 }
 0x72f   :  { %v2608_v25 = vadd.f32 %v2561_v22, %v4511_v26  ;;  %v2610_v1 = vadd.f32 %v2602_v24, %v4512_v27  ;;  %v2563_v35 = vpop.f32.mrb[42].mxu0  ;;  %v2604_v36 = vpop.f32.mrb[42].mxu1 }
 0x730   :  { %v3245_v28 = vmul.f32 -1.442695, %v2607_v31  ;;  %v2564_v29 = vpop.f32.mrb[43].mxu0  ;;  %v2605_v32 = vpop.f32.mrb[43].mxu1 }
 0x731   :  { %v3246_v34 = vmul.f32 -1.442695, %v2608_v25  ;;  %v3247_v44 = vmul.f32 -1.442695, %v2610_v1 }
 0x732   :  { %3527 = vpow2.f32 %v3245_v28 }
 0x733   :  { %3529 = vpow2.f32 %v3246_v34 }
 0x734   :  { %3531 = vpow2.f32 %v3247_v44 }
 0x735   :  { %3533 = vtanh.f32 %v2609_v23 }
 0x73c   :  { %v3528_v37 = vpop.eup %3527 }
 0x73d   :  { %v3530_v45 = vpop.eup %3529  ;;  %v2614_v17 = vadd.f32 1.0, %v3528_v37 }
 0x73e   :  { %v2620_v4 = vadd.f32 1.0, %v3530_v45  ;;  %v3532_v33 = vpop.eup %3531 }
 0x73f   :  { %3535 = vrcp.f32 %v2614_v17  ;;  %v3534_v19 = vpop.eup %3533  ;;  %v2627_v21 = vadd.f32 1.0, %v3532_v33 }
 0x740   :  { %3537 = vrcp.f32 %v2620_v4 }
 0x741   :  { %3539 = vrcp.f32 %v2627_v21 }
 0x749   :  { %v3536_v61 = vpop.eup %3535 }
 0x74a   :  { %v3538_v18 = vpop.eup %3537  ;;  %v2631_v30 = vmul.f32 %v3536_v61, %v3534_v19 }
 0x74b   :  { %v2630_v14 = vmul.f32 %v3538_v18, %v4414_v49  ;;  %v3540_v11 = vpop.eup %3539 }
 0x74d   :  { %v2632_v38 = vadd.f32 %v2631_v30, %v2630_v14 }
 0x74f   :  { %3541 = vtanh.f32 %v2632_v38 }
 0x759   :  { %v3542_v53 = vpop.eup %3541 }
 0x75a   :  { %v2634_v54 = vmul.f32 %v3542_v53, %v3540_v11 }
 0x75c   :  { %3248 = vst [vmem:[%s4471_s4 + $0x30] sm:$0xff] %v2634_v54  ;;  %v2648_v57 = vpack.c.bf16 %v2634_v54, %v2634_v54 }
 0x75e   :  { %2874 = vmatmul.mubr.bf16.vlgmr.msra.gmra.mrb[44].mxu0 %v2648_v57  ;;  %2915 = vmatmul.mubr.bf16.vlgmr.msra.gmra.mrb[44].mxu1 %v2648_v57 }
 0x831   :  { %v2875_v58 = vpop.f32.mrb[44].mxu0  ;;  %v2916_v59 = vpop.f32.mrb[44].mxu1 }
 0x832   :  { %v2923_v62 = vadd.f32 %v2875_v58, %v4513_v60  ;;  %v2925_v0 = vadd.f32 %v2916_v59, %v4514_v63  ;;  %v2877_v2 = vpop.f32.mrb[45].mxu0  ;;  %v2918_v5 = vpop.f32.mrb[45].mxu1 }
 0x833   :  { %v2924_v8 = vadd.f32 %v2877_v2, %v4515_v6  ;;  %v2926_v7 = vadd.f32 %v2918_v5, %v4516_v9  ;;  %v2879_v15 = vpop.f32.mrb[46].mxu0  ;;  %v2920_v10 = vpop.f32.mrb[46].mxu1 }
 0x834   :  { %v3281_v12 = vmul.f32 -1.442695, %v2923_v62  ;;  %v2880_v13 = vpop.f32.mrb[47].mxu0  ;;  %v2921_v56 = vpop.f32.mrb[47].mxu1 }
 0x835   :  { %v3282_v3 = vmul.f32 -1.442695, %v2924_v8  ;;  %v3283_v40 = vmul.f32 -1.442695, %v2926_v7 }
 0x836   :  { %3543 = vpow2.f32 %v3281_v12 }
 0x837   :  { %3545 = vpow2.f32 %v3282_v3 }
 0x838   :  { %3547 = vpow2.f32 %v3283_v40 }
 0x839   :  { %3549 = vtanh.f32 %v2925_v0 }
 0x840   :  { %v3544_v41 = vpop.eup %3543 }
 0x841   :  { %v3546_v42 = vpop.eup %3545  ;;  %v2930_v43 = vadd.f32 1.0, %v3544_v41 }
 0x842   :  { %v2936_v46 = vadd.f32 1.0, %v3546_v42  ;;  %v3548_v47 = vpop.eup %3547 }
 0x843   :  { %3551 = vrcp.f32 %v2930_v43  ;;  %v3550_v49 = vpop.eup %3549  ;;  %v2943_v52 = vadd.f32 1.0, %v3548_v47 }
 0x844   :  { %3553 = vrcp.f32 %v2936_v46 }
 0x845   :  { %3555 = vrcp.f32 %v2943_v52 }
 0x84d   :  { %v3552_v50 = vpop.eup %3551 }
 0x84e   :  { %v3554_v39 = vpop.eup %3553  ;;  %v2947_v51 = vmul.f32 %v3552_v50, %v3550_v49 }
 0x84f   :  { %v2946_v48 = vmul.f32 %v3554_v39, %v2632_v38  ;;  %v3556_v20 = vpop.eup %3555 }
 0x851   :  { %v2948_v16 = vadd.f32 %v2947_v51, %v2946_v48 }
 0x853   :  { %3557 = vtanh.f32 %v2948_v16 }
 0x85d   :  { %v3558_v31 = vpop.eup %3557 }
 0x85e   :  { %v2950_v55 = vmul.f32 %v3558_v31, %v3556_v20 }
 0x860   :  { %3284 = vst [vmem:[%s4471_s4 + $0x38] sm:$0xff] %v2950_v55 }

</bundles_post_ra>
